<compile_context>
chip_gen: v7x
topology: tpu7x:2x2x1
jax: 0.10.0
libtpu: 0.0.40
codegen_flags: <defaults>
</compile_context>

<pallas_src>
import functools

import jax
import jax.numpy as jnp
from jax.experimental import pallas as pl
from jax.experimental.pallas import tpu as pltpu


# ----------------------------------------------------------------------------
# Fused kernel: AvgPool(5,3) + Conv1x1 + Linear1 + ReLU + Linear2
# ----------------------------------------------------------------------------
def fused_aux_kernel(x_ref, wc_ref, bc_ref, w1_hbm, b1_ref, w2_hbm, b2_ref,
                     o_ref, w1_vmem, w2_vmem, act_ref, dma_sem):
    # x_ref:   (N, H, W, Cin) f32 (VMEM)       wc_ref: (Cin, 128) f32
    # bc_ref:  (1, 128) f32                    w1_hbm: (2048, 1024) bf16 (HBM, pl.ANY)
    # b1_ref:  (1, 1024) f32                   w2_hbm: (1024, OUTP) bf16 (HBM, pl.ANY)
    # b2_ref:  (1, OUTP) f32                   o_ref:  (N, OUTP) f32
    # w1_vmem / w2_vmem: VMEM staging          act_ref: (N, 2048) f32 scratch ((h, w, c) order)

    # Kick off the big weight DMAs first; the pool / 1x1-conv stage hides under them.
    w1_copy = pltpu.make_async_copy(w1_hbm, w1_vmem, dma_sem.at[0])
    w1_copy.start()
    w2_copy = pltpu.make_async_copy(w2_hbm, w2_vmem, dma_sem.at[1])
    w2_copy.start()

    n, hdim, wdim, cin = x_ref.shape
    ho = (hdim - 5) // 3 + 1
    wo = (wdim - 5) // 3 + 1
    cout = wc_ref.shape[1]
    inv_win = jnp.float32(1.0 / 25.0)

    # Separable 5x5 / stride-3 average pooling, all static slices (no unaligned pl.ds,
    # no cross-sublane reductions): 5 row adds, then 5 shifted adds along W.
    nwin = wdim - 4
    pooled_blocks = []
    for i in range(ho):
        row_sum = x_ref[:, 3 * i, :, :]                         # (N, W, Cin)
        for r in range(1, 5):
            row_sum = row_sum + x_ref[:, 3 * i + r, :, :]
        win_sum = row_sum[:, 0:nwin, :]                         # (N, W-4, Cin)
        for s in range(1, 5):
            win_sum = win_sum + row_sum[:, s:s + nwin, :]
        for j in range(wo):
            pooled_blocks.append(win_sum[:, 3 * j, :] * inv_win)   # (N, Cin)

    # One fused 1x1-conv matmul for all 16 pooled positions (review opt 5).
    pooled_all = jnp.concatenate(pooled_blocks, axis=0)         # (HO*WO*N, Cin), p-major
    conv = jnp.dot(pooled_all, wc_ref[...],
                   preferred_element_type=jnp.float32) + bc_ref[...]   # (HO*WO*N, 128)

    # Scatter into the (N, 2048) activation in (h, w, c) flatten order (matches the
    # row-permuted W1); 128-wide lane-dense stores, kept in f32 for accuracy.
    for p in range(ho * wo):
        act_ref[:, pl.ds(p * cout, cout)] = conv[p * n:(p + 1) * n, :]

    # Dense layers: wait for W1, then Linear1 + ReLU + Linear2 back to back.
    w1_copy.wait()
    h1 = jnp.dot(act_ref[...].astype(w1_vmem.dtype), w1_vmem[...],
                 preferred_element_type=jnp.float32)
    h1 = jnp.maximum(h1 + b1_ref[...], 0.0)
    # TODO(synk): Dropout(p=0.7) is identity at inference; train-mode stochastic dropout omitted.
    w2_copy.wait()
    out = jnp.dot(h1.astype(w2_vmem.dtype), w2_vmem[...],
                  preferred_element_type=jnp.float32) + b2_ref[...]
    o_ref[...] = out.astype(o_ref.dtype)


# ----------------------------------------------------------------------------
# pallas_call wrapper (single invocation, whole problem resident in VMEM)
# ----------------------------------------------------------------------------
def _fused_pallas_call(x_nhwc, wc, bc, w1, b1, w2, b2):
    n, h, w, cin = x_nhwc.shape
    ho = (h - 5) // 3 + 1
    wo = (w - 5) // 3 + 1
    cout = wc.shape[1]
    feat, hidden = w1.shape
    outp = w2.shape[1]
    if feat != ho * wo * cout:
        raise ValueError(
            f"Linear1 expects {feat} features but pooled conv gives {ho * wo * cout} "
            f"(H={h}, W={w} must pool to 4x4 for the GoogLeNet aux head).")

    vmem = pltpu.MemorySpace.VMEM
    cost = pl.CostEstimate(
        flops=2 * n * (ho * wo * cin * cout + feat * hidden + hidden * outp),
        transcendentals=0,
        bytes_accessed=int(x_nhwc.size * x_nhwc.dtype.itemsize
                           + w1.size * w1.dtype.itemsize
                           + w2.size * w2.dtype.itemsize
                           + (wc.size + bc.size + b1.size + b2.size) * 4
                           + n * outp * 4),
    )

    return pl.pallas_call(
        fused_aux_kernel,
        out_shape=jax.ShapeDtypeStruct((n, outp), jnp.float32),
        in_specs=[
            pl.BlockSpec(memory_space=vmem),    # x (NHWC)
            pl.BlockSpec(memory_space=vmem),    # conv1 weight (Cin, 128)
            pl.BlockSpec(memory_space=vmem),    # conv1 bias   (1, 128)
            pl.BlockSpec(memory_space=pl.ANY),  # W1 stays in HBM; manual DMA in-body
            pl.BlockSpec(memory_space=vmem),    # b1 (1, 1024)
            pl.BlockSpec(memory_space=pl.ANY),  # W2 stays in HBM; manual DMA in-body
            pl.BlockSpec(memory_space=vmem),    # b2 (1, OUTP) padded lane-dense
        ],
        out_specs=pl.BlockSpec(memory_space=vmem),
        scratch_shapes=[
            pltpu.VMEM((feat, hidden), w1.dtype),   # W1 staging (~4 MiB bf16)
            pltpu.VMEM((hidden, outp), w2.dtype),   # W2 staging (~256 KiB bf16)
            pltpu.VMEM((n, feat), jnp.float32),     # flattened conv activations (N, 2048) f32
            pltpu.SemaphoreType.DMA((2,)),
        ],
        compiler_params=pltpu.CompilerParams(vmem_limit_bytes=8 * 1024 * 1024),
        cost_estimate=cost,
    )(x_nhwc, wc, bc, w1, b1, w2, b2)


# ----------------------------------------------------------------------------
# One-time weight preparation (transpose, flatten-permutation fold, pad, bf16)
# ----------------------------------------------------------------------------
def prepare_params(params, weight_dtype=jnp.bfloat16):
    cout, cin = params["conv1_w"].shape[:2]
    wc = params["conv1_w"].reshape(cout, cin).T.astype(jnp.float32)      # (Cin, 128)
    bc = params["conv1_b"].reshape(1, cout).astype(jnp.float32)

    hidden, feat = params["linear1_w"].shape                             # (1024, 2048)
    hw = feat // cout
    # Torch flattens the conv output in (c, h, w) order; the kernel builds (h, w, c).
    # Fold that permutation into W1's rows once, here.
    w1 = params["linear1_w"].T                                           # (feat, hidden), rows (c, p)
    w1 = w1.reshape(cout, hw, hidden).transpose(1, 0, 2).reshape(feat, hidden)  # rows (p, c)
    w1 = w1.astype(weight_dtype)
    b1 = params["linear1_b"].reshape(1, hidden).astype(jnp.float32)

    out_ch = params["linear2_w"].shape[0]
    out_pad = ((out_ch + 127) // 128) * 128                              # lane-dense output width
    w2 = jnp.zeros((hidden, out_pad), weight_dtype)
    w2 = w2.at[:, :out_ch].set(params["linear2_w"].T.astype(weight_dtype))
    b2 = jnp.zeros((1, out_pad), jnp.float32)
    b2 = b2.at[:, :out_ch].set(params["linear2_b"].astype(jnp.float32))
    return {"wc": wc, "bc": bc, "w1": w1, "b1": b1, "w2": w2, "b2": b2}


def auxiliary_classification_forward(x_nchw, prep, out_channels):
    """x_nchw: (N, Cin, H, W) float32 -> (N, out_channels) float32."""
    x_nhwc = jnp.transpose(x_nchw, (0, 2, 3, 1))   # NCHW -> NHWC (channels on lanes)
    out_padded = _fused_pallas_call(x_nhwc, prep["wc"], prep["bc"], prep["w1"],
                                    prep["b1"], prep["w2"], prep["b2"])
    return out_padded[:, :out_channels]


# ----------------------------------------------------------------------------
# Pure-JAX reference (exact PyTorch semantics, f32 weights)
# ----------------------------------------------------------------------------
def _reference_forward(x_nchw, params):
    n, cin, h, w = x_nchw.shape
    x = jnp.transpose(x_nchw, (0, 2, 3, 1))
    ho, wo = (h - 5) // 3 + 1, (w - 5) // 3 + 1
    rows = []
    for i in range(ho):
        cols = []
        for j in range(wo):
            cols.append(jnp.mean(x[:, 3 * i:3 * i + 5, 3 * j:3 * j + 5, :], axis=(1, 2)))
        rows.append(jnp.stack(cols, axis=1))
    pooled = jnp.stack(rows, axis=1)                                     # (N, ho, wo, Cin)
    wc = params["conv1_w"].reshape(128, cin).T
    conv = jnp.einsum("nijc,ck->nijk", pooled, wc) + params["conv1_b"]
    flat = jnp.transpose(conv, (0, 3, 1, 2)).reshape(n, -1)              # torch (c, h, w) flatten
    h1 = jnp.maximum(flat @ params["linear1_w"].T + params["linear1_b"], 0.0)
    return h1 @ params["linear2_w"].T + params["linear2_b"]


if __name__ == "__main__":
    key = jax.random.PRNGKey(0)
    N, Cin, H, W = 2, 32, 14, 14          # GoogLeNet aux heads see 14x14 feature maps
    out_channels = 10

    kx, k1, k2, k3, k4, k5, k6 = jax.random.split(key, 7)
    x = jax.random.normal(kx, (N, Cin, H, W), jnp.float32)

    params = {
        # Conv2d(Cin, 128, kernel_size=1)
        "conv1_w": 0.05 * jax.random.normal(k1, (128, Cin, 1, 1), jnp.float32),
        "conv1_b": 0.05 * jax.random.normal(k2, (128,), jnp.float32),
        # Linear(128*4*4, 1024)
        "linear1_w": 0.02 * jax.random.normal(k3, (1024, 128 * 4 * 4), jnp.float32),
        "linear1_b": 0.02 * jax.random.normal(k4, (1024,), jnp.float32),
        # Linear(1024, out_channels)
        "linear2_w": 0.02 * jax.random.normal(k5, (out_channels, 1024), jnp.float32),
        "linear2_b": 0.02 * jax.random.normal(k6, (out_channels,), jnp.float32),
    }

    prep = prepare_params(params)   # one-time weight prep (outside jit)
    fwd = jax.jit(functools.partial(auxiliary_classification_forward,
                                    out_channels=out_channels))

    out = fwd(x, prep)
    jax.block_until_ready(out)
    assert out.shape == (N, out_channels), out.shape

    ref = _reference_forward(x, params)
    max_err = float(jnp.max(jnp.abs(out - ref)))
    assert jnp.allclose(out, ref, atol=2e-2, rtol=2e-2), f"max abs err {max_err}"

    print("KERNEL_OK")
</pallas_src>

<mosaic_0001>
module attributes {stable_mosaic.version = 11 : i64} {
  func.func @fused_aux_kernel(%arg0: memref<2x14x14x32xf32, #tpu.memory_space<vmem>>, %arg1: memref<32x128xf32, #tpu.memory_space<vmem>>, %arg2: memref<1x128xf32, #tpu.memory_space<vmem>>, %arg3: memref<2048x1024xbf16, #tpu.memory_space<any>>, %arg4: memref<1x1024xf32, #tpu.memory_space<vmem>>, %arg5: memref<1024x128xbf16, #tpu.memory_space<any>>, %arg6: memref<1x128xf32, #tpu.memory_space<vmem>>, %arg7: memref<2x128xf32, #tpu.memory_space<vmem>>, %arg8: memref<2048x1024xbf16, #tpu.memory_space<vmem>>, %arg9: memref<1024x128xbf16, #tpu.memory_space<vmem>>, %arg10: memref<2x2048xf32, #tpu.memory_space<vmem>>, %arg11: memref<2x!tpu.dma_semaphore, #tpu.memory_space<semaphore_mem>>) attributes {dimension_semantics = [], scalar_prefetch = 0 : i64, scratch_operands = 4 : i64, tpu.core_type = #tpu.core_type<tc>} {
    %c0_i32 = arith.constant 0 : i32
    %0 = tpu.memref_slice %arg11[%c0_i32] : memref<2x!tpu.dma_semaphore, #tpu.memory_space<semaphore_mem>> -> memref<1x!tpu.dma_semaphore, #tpu.memory_space<semaphore_mem>>
    %1 = tpu.memref_squeeze %0 : memref<1x!tpu.dma_semaphore, #tpu.memory_space<semaphore_mem>> -> memref<!tpu.dma_semaphore, #tpu.memory_space<semaphore_mem>>
    tpu.enqueue_dma source(%arg3 : memref<2048x1024xbf16, #tpu.memory_space<any>>) target(%arg8 : memref<2048x1024xbf16, #tpu.memory_space<vmem>>) target_semaphore(%1 : memref<!tpu.dma_semaphore, #tpu.memory_space<semaphore_mem>>)
    %c1_i32 = arith.constant 1 : i32
    %2 = tpu.memref_slice %arg11[%c1_i32] : memref<2x!tpu.dma_semaphore, #tpu.memory_space<semaphore_mem>> -> memref<1x!tpu.dma_semaphore, #tpu.memory_space<semaphore_mem>>
    %3 = tpu.memref_squeeze %2 : memref<1x!tpu.dma_semaphore, #tpu.memory_space<semaphore_mem>> -> memref<!tpu.dma_semaphore, #tpu.memory_space<semaphore_mem>>
    tpu.enqueue_dma source(%arg5 : memref<1024x128xbf16, #tpu.memory_space<any>>) target(%arg9 : memref<1024x128xbf16, #tpu.memory_space<vmem>>) target_semaphore(%3 : memref<!tpu.dma_semaphore, #tpu.memory_space<semaphore_mem>>)
    %c0 = arith.constant 0 : index
    %c0_0 = arith.constant 0 : index
    %c0_1 = arith.constant 0 : index
    %c0_2 = arith.constant 0 : index
    %4 = vector.load %arg0[%c0, %c0_0, %c0_1, %c0_2] : memref<2x14x14x32xf32, #tpu.memory_space<vmem>>, vector<2x1x14x32xf32>
    %5 = vector.shape_cast %4 : vector<2x1x14x32xf32> to vector<2x14x32xf32>
    %c0_3 = arith.constant 0 : index
    %c1 = arith.constant 1 : index
    %c0_4 = arith.constant 0 : index
    %c0_5 = arith.constant 0 : index
    %6 = vector.load %arg0[%c0_3, %c1, %c0_4, %c0_5] : memref<2x14x14x32xf32, #tpu.memory_space<vmem>>, vector<2x1x14x32xf32>
    %7 = vector.shape_cast %6 : vector<2x1x14x32xf32> to vector<2x14x32xf32>
    %8 = arith.addf %5, %7 : vector<2x14x32xf32>
    %c0_6 = arith.constant 0 : index
    %c2 = arith.constant 2 : index
    %c0_7 = arith.constant 0 : index
    %c0_8 = arith.constant 0 : index
    %9 = vector.load %arg0[%c0_6, %c2, %c0_7, %c0_8] : memref<2x14x14x32xf32, #tpu.memory_space<vmem>>, vector<2x1x14x32xf32>
    %10 = vector.shape_cast %9 : vector<2x1x14x32xf32> to vector<2x14x32xf32>
    %11 = arith.addf %8, %10 : vector<2x14x32xf32>
    %c0_9 = arith.constant 0 : index
    %c3 = arith.constant 3 : index
    %c0_10 = arith.constant 0 : index
    %c0_11 = arith.constant 0 : index
    %12 = vector.load %arg0[%c0_9, %c3, %c0_10, %c0_11] : memref<2x14x14x32xf32, #tpu.memory_space<vmem>>, vector<2x1x14x32xf32>
    %13 = vector.shape_cast %12 : vector<2x1x14x32xf32> to vector<2x14x32xf32>
    %14 = arith.addf %11, %13 : vector<2x14x32xf32>
    %c0_12 = arith.constant 0 : index
    %c4 = arith.constant 4 : index
    %c0_13 = arith.constant 0 : index
    %c0_14 = arith.constant 0 : index
    %15 = vector.load %arg0[%c0_12, %c4, %c0_13, %c0_14] : memref<2x14x14x32xf32, #tpu.memory_space<vmem>>, vector<2x1x14x32xf32>
    %16 = vector.shape_cast %15 : vector<2x1x14x32xf32> to vector<2x14x32xf32>
    %17 = arith.addf %14, %16 : vector<2x14x32xf32>
    %18 = vector.extract_strided_slice %17 {offsets = [0, 0, 0], sizes = [2, 10, 32], strides = [1, 1, 1]} : vector<2x14x32xf32> to vector<2x10x32xf32>
    %19 = vector.extract_strided_slice %17 {offsets = [0, 1, 0], sizes = [2, 10, 32], strides = [1, 1, 1]} : vector<2x14x32xf32> to vector<2x10x32xf32>
    %20 = arith.addf %18, %19 : vector<2x10x32xf32>
    %21 = vector.extract_strided_slice %17 {offsets = [0, 2, 0], sizes = [2, 10, 32], strides = [1, 1, 1]} : vector<2x14x32xf32> to vector<2x10x32xf32>
    %22 = arith.addf %20, %21 : vector<2x10x32xf32>
    %23 = vector.extract_strided_slice %17 {offsets = [0, 3, 0], sizes = [2, 10, 32], strides = [1, 1, 1]} : vector<2x14x32xf32> to vector<2x10x32xf32>
    %24 = arith.addf %22, %23 : vector<2x10x32xf32>
    %25 = vector.extract_strided_slice %17 {offsets = [0, 4, 0], sizes = [2, 10, 32], strides = [1, 1, 1]} : vector<2x14x32xf32> to vector<2x10x32xf32>
    %26 = arith.addf %24, %25 : vector<2x10x32xf32>
    %27 = vector.extract_strided_slice %26 {offsets = [0, 0, 0], sizes = [2, 1, 32], strides = [1, 1, 1]} : vector<2x10x32xf32> to vector<2x1x32xf32>
    %28 = vector.shape_cast %27 : vector<2x1x32xf32> to vector<2x32xf32>
    %cst = arith.constant 4.000000e-02 : f32
    %29 = vector.broadcast %cst : f32 to vector<2x32xf32>
    %30 = arith.mulf %28, %29 : vector<2x32xf32>
    %31 = vector.extract_strided_slice %26 {offsets = [0, 3, 0], sizes = [2, 1, 32], strides = [1, 1, 1]} : vector<2x10x32xf32> to vector<2x1x32xf32>
    %32 = vector.shape_cast %31 : vector<2x1x32xf32> to vector<2x32xf32>
    %cst_15 = arith.constant 4.000000e-02 : f32
    %33 = vector.broadcast %cst_15 : f32 to vector<2x32xf32>
    %34 = arith.mulf %32, %33 : vector<2x32xf32>
    %35 = vector.extract_strided_slice %26 {offsets = [0, 6, 0], sizes = [2, 1, 32], strides = [1, 1, 1]} : vector<2x10x32xf32> to vector<2x1x32xf32>
    %36 = vector.shape_cast %35 : vector<2x1x32xf32> to vector<2x32xf32>
    %cst_16 = arith.constant 4.000000e-02 : f32
    %37 = vector.broadcast %cst_16 : f32 to vector<2x32xf32>
    %38 = arith.mulf %36, %37 : vector<2x32xf32>
    %39 = vector.extract_strided_slice %26 {offsets = [0, 9, 0], sizes = [2, 1, 32], strides = [1, 1, 1]} : vector<2x10x32xf32> to vector<2x1x32xf32>
    %40 = vector.shape_cast %39 : vector<2x1x32xf32> to vector<2x32xf32>
    %cst_17 = arith.constant 4.000000e-02 : f32
    %41 = vector.broadcast %cst_17 : f32 to vector<2x32xf32>
    %42 = arith.mulf %40, %41 : vector<2x32xf32>
    %c0_18 = arith.constant 0 : index
    %c3_19 = arith.constant 3 : index
    %c0_20 = arith.constant 0 : index
    %c0_21 = arith.constant 0 : index
    %43 = vector.load %arg0[%c0_18, %c3_19, %c0_20, %c0_21] : memref<2x14x14x32xf32, #tpu.memory_space<vmem>>, vector<2x1x14x32xf32>
    %44 = vector.shape_cast %43 : vector<2x1x14x32xf32> to vector<2x14x32xf32>
    %c0_22 = arith.constant 0 : index
    %c4_23 = arith.constant 4 : index
    %c0_24 = arith.constant 0 : index
    %c0_25 = arith.constant 0 : index
    %45 = vector.load %arg0[%c0_22, %c4_23, %c0_24, %c0_25] : memref<2x14x14x32xf32, #tpu.memory_space<vmem>>, vector<2x1x14x32xf32>
    %46 = vector.shape_cast %45 : vector<2x1x14x32xf32> to vector<2x14x32xf32>
    %47 = arith.addf %44, %46 : vector<2x14x32xf32>
    %c0_26 = arith.constant 0 : index
    %c5 = arith.constant 5 : index
    %c0_27 = arith.constant 0 : index
    %c0_28 = arith.constant 0 : index
    %48 = vector.load %arg0[%c0_26, %c5, %c0_27, %c0_28] : memref<2x14x14x32xf32, #tpu.memory_space<vmem>>, vector<2x1x14x32xf32>
    %49 = vector.shape_cast %48 : vector<2x1x14x32xf32> to vector<2x14x32xf32>
    %50 = arith.addf %47, %49 : vector<2x14x32xf32>
    %c0_29 = arith.constant 0 : index
    %c6 = arith.constant 6 : index
    %c0_30 = arith.constant 0 : index
    %c0_31 = arith.constant 0 : index
    %51 = vector.load %arg0[%c0_29, %c6, %c0_30, %c0_31] : memref<2x14x14x32xf32, #tpu.memory_space<vmem>>, vector<2x1x14x32xf32>
    %52 = vector.shape_cast %51 : vector<2x1x14x32xf32> to vector<2x14x32xf32>
    %53 = arith.addf %50, %52 : vector<2x14x32xf32>
    %c0_32 = arith.constant 0 : index
    %c7 = arith.constant 7 : index
    %c0_33 = arith.constant 0 : index
    %c0_34 = arith.constant 0 : index
    %54 = vector.load %arg0[%c0_32, %c7, %c0_33, %c0_34] : memref<2x14x14x32xf32, #tpu.memory_space<vmem>>, vector<2x1x14x32xf32>
    %55 = vector.shape_cast %54 : vector<2x1x14x32xf32> to vector<2x14x32xf32>
    %56 = arith.addf %53, %55 : vector<2x14x32xf32>
    %57 = vector.extract_strided_slice %56 {offsets = [0, 0, 0], sizes = [2, 10, 32], strides = [1, 1, 1]} : vector<2x14x32xf32> to vector<2x10x32xf32>
    %58 = vector.extract_strided_slice %56 {offsets = [0, 1, 0], sizes = [2, 10, 32], strides = [1, 1, 1]} : vector<2x14x32xf32> to vector<2x10x32xf32>
    %59 = arith.addf %57, %58 : vector<2x10x32xf32>
    %60 = vector.extract_strided_slice %56 {offsets = [0, 2, 0], sizes = [2, 10, 32], strides = [1, 1, 1]} : vector<2x14x32xf32> to vector<2x10x32xf32>
    %61 = arith.addf %59, %60 : vector<2x10x32xf32>
    %62 = vector.extract_strided_slice %56 {offsets = [0, 3, 0], sizes = [2, 10, 32], strides = [1, 1, 1]} : vector<2x14x32xf32> to vector<2x10x32xf32>
    %63 = arith.addf %61, %62 : vector<2x10x32xf32>
    %64 = vector.extract_strided_slice %56 {offsets = [0, 4, 0], sizes = [2, 10, 32], strides = [1, 1, 1]} : vector<2x14x32xf32> to vector<2x10x32xf32>
    %65 = arith.addf %63, %64 : vector<2x10x32xf32>
    %66 = vector.extract_strided_slice %65 {offsets = [0, 0, 0], sizes = [2, 1, 32], strides = [1, 1, 1]} : vector<2x10x32xf32> to vector<2x1x32xf32>
    %67 = vector.shape_cast %66 : vector<2x1x32xf32> to vector<2x32xf32>
    %cst_35 = arith.constant 4.000000e-02 : f32
    %68 = vector.broadcast %cst_35 : f32 to vector<2x32xf32>
    %69 = arith.mulf %67, %68 : vector<2x32xf32>
    %70 = vector.extract_strided_slice %65 {offsets = [0, 3, 0], sizes = [2, 1, 32], strides = [1, 1, 1]} : vector<2x10x32xf32> to vector<2x1x32xf32>
    %71 = vector.shape_cast %70 : vector<2x1x32xf32> to vector<2x32xf32>
    %cst_36 = arith.constant 4.000000e-02 : f32
    %72 = vector.broadcast %cst_36 : f32 to vector<2x32xf32>
    %73 = arith.mulf %71, %72 : vector<2x32xf32>
    %74 = vector.extract_strided_slice %65 {offsets = [0, 6, 0], sizes = [2, 1, 32], strides = [1, 1, 1]} : vector<2x10x32xf32> to vector<2x1x32xf32>
    %75 = vector.shape_cast %74 : vector<2x1x32xf32> to vector<2x32xf32>
    %cst_37 = arith.constant 4.000000e-02 : f32
    %76 = vector.broadcast %cst_37 : f32 to vector<2x32xf32>
    %77 = arith.mulf %75, %76 : vector<2x32xf32>
    %78 = vector.extract_strided_slice %65 {offsets = [0, 9, 0], sizes = [2, 1, 32], strides = [1, 1, 1]} : vector<2x10x32xf32> to vector<2x1x32xf32>
    %79 = vector.shape_cast %78 : vector<2x1x32xf32> to vector<2x32xf32>
    %cst_38 = arith.constant 4.000000e-02 : f32
    %80 = vector.broadcast %cst_38 : f32 to vector<2x32xf32>
    %81 = arith.mulf %79, %80 : vector<2x32xf32>
    %c0_39 = arith.constant 0 : index
    %c6_40 = arith.constant 6 : index
    %c0_41 = arith.constant 0 : index
    %c0_42 = arith.constant 0 : index
    %82 = vector.load %arg0[%c0_39, %c6_40, %c0_41, %c0_42] : memref<2x14x14x32xf32, #tpu.memory_space<vmem>>, vector<2x1x14x32xf32>
    %83 = vector.shape_cast %82 : vector<2x1x14x32xf32> to vector<2x14x32xf32>
    %c0_43 = arith.constant 0 : index
    %c7_44 = arith.constant 7 : index
    %c0_45 = arith.constant 0 : index
    %c0_46 = arith.constant 0 : index
    %84 = vector.load %arg0[%c0_43, %c7_44, %c0_45, %c0_46] : memref<2x14x14x32xf32, #tpu.memory_space<vmem>>, vector<2x1x14x32xf32>
    %85 = vector.shape_cast %84 : vector<2x1x14x32xf32> to vector<2x14x32xf32>
    %86 = arith.addf %83, %85 : vector<2x14x32xf32>
    %c0_47 = arith.constant 0 : index
    %c8 = arith.constant 8 : index
    %c0_48 = arith.constant 0 : index
    %c0_49 = arith.constant 0 : index
    %87 = vector.load %arg0[%c0_47, %c8, %c0_48, %c0_49] : memref<2x14x14x32xf32, #tpu.memory_space<vmem>>, vector<2x1x14x32xf32>
    %88 = vector.shape_cast %87 : vector<2x1x14x32xf32> to vector<2x14x32xf32>
    %89 = arith.addf %86, %88 : vector<2x14x32xf32>
    %c0_50 = arith.constant 0 : index
    %c9 = arith.constant 9 : index
    %c0_51 = arith.constant 0 : index
    %c0_52 = arith.constant 0 : index
    %90 = vector.load %arg0[%c0_50, %c9, %c0_51, %c0_52] : memref<2x14x14x32xf32, #tpu.memory_space<vmem>>, vector<2x1x14x32xf32>
    %91 = vector.shape_cast %90 : vector<2x1x14x32xf32> to vector<2x14x32xf32>
    %92 = arith.addf %89, %91 : vector<2x14x32xf32>
    %c0_53 = arith.constant 0 : index
    %c10 = arith.constant 10 : index
    %c0_54 = arith.constant 0 : index
    %c0_55 = arith.constant 0 : index
    %93 = vector.load %arg0[%c0_53, %c10, %c0_54, %c0_55] : memref<2x14x14x32xf32, #tpu.memory_space<vmem>>, vector<2x1x14x32xf32>
    %94 = vector.shape_cast %93 : vector<2x1x14x32xf32> to vector<2x14x32xf32>
    %95 = arith.addf %92, %94 : vector<2x14x32xf32>
    %96 = vector.extract_strided_slice %95 {offsets = [0, 0, 0], sizes = [2, 10, 32], strides = [1, 1, 1]} : vector<2x14x32xf32> to vector<2x10x32xf32>
    %97 = vector.extract_strided_slice %95 {offsets = [0, 1, 0], sizes = [2, 10, 32], strides = [1, 1, 1]} : vector<2x14x32xf32> to vector<2x10x32xf32>
    %98 = arith.addf %96, %97 : vector<2x10x32xf32>
    %99 = vector.extract_strided_slice %95 {offsets = [0, 2, 0], sizes = [2, 10, 32], strides = [1, 1, 1]} : vector<2x14x32xf32> to vector<2x10x32xf32>
    %100 = arith.addf %98, %99 : vector<2x10x32xf32>
    %101 = vector.extract_strided_slice %95 {offsets = [0, 3, 0], sizes = [2, 10, 32], strides = [1, 1, 1]} : vector<2x14x32xf32> to vector<2x10x32xf32>
    %102 = arith.addf %100, %101 : vector<2x10x32xf32>
    %103 = vector.extract_strided_slice %95 {offsets = [0, 4, 0], sizes = [2, 10, 32], strides = [1, 1, 1]} : vector<2x14x32xf32> to vector<2x10x32xf32>
    %104 = arith.addf %102, %103 : vector<2x10x32xf32>
    %105 = vector.extract_strided_slice %104 {offsets = [0, 0, 0], sizes = [2, 1, 32], strides = [1, 1, 1]} : vector<2x10x32xf32> to vector<2x1x32xf32>
    %106 = vector.shape_cast %105 : vector<2x1x32xf32> to vector<2x32xf32>
    %cst_56 = arith.constant 4.000000e-02 : f32
    %107 = vector.broadcast %cst_56 : f32 to vector<2x32xf32>
    %108 = arith.mulf %106, %107 : vector<2x32xf32>
    %109 = vector.extract_strided_slice %104 {offsets = [0, 3, 0], sizes = [2, 1, 32], strides = [1, 1, 1]} : vector<2x10x32xf32> to vector<2x1x32xf32>
    %110 = vector.shape_cast %109 : vector<2x1x32xf32> to vector<2x32xf32>
    %cst_57 = arith.constant 4.000000e-02 : f32
    %111 = vector.broadcast %cst_57 : f32 to vector<2x32xf32>
    %112 = arith.mulf %110, %111 : vector<2x32xf32>
    %113 = vector.extract_strided_slice %104 {offsets = [0, 6, 0], sizes = [2, 1, 32], strides = [1, 1, 1]} : vector<2x10x32xf32> to vector<2x1x32xf32>
    %114 = vector.shape_cast %113 : vector<2x1x32xf32> to vector<2x32xf32>
    %cst_58 = arith.constant 4.000000e-02 : f32
    %115 = vector.broadcast %cst_58 : f32 to vector<2x32xf32>
    %116 = arith.mulf %114, %115 : vector<2x32xf32>
    %117 = vector.extract_strided_slice %104 {offsets = [0, 9, 0], sizes = [2, 1, 32], strides = [1, 1, 1]} : vector<2x10x32xf32> to vector<2x1x32xf32>
    %118 = vector.shape_cast %117 : vector<2x1x32xf32> to vector<2x32xf32>
    %cst_59 = arith.constant 4.000000e-02 : f32
    %119 = vector.broadcast %cst_59 : f32 to vector<2x32xf32>
    %120 = arith.mulf %118, %119 : vector<2x32xf32>
    %c0_60 = arith.constant 0 : index
    %c9_61 = arith.constant 9 : index
    %c0_62 = arith.constant 0 : index
    %c0_63 = arith.constant 0 : index
    %121 = vector.load %arg0[%c0_60, %c9_61, %c0_62, %c0_63] : memref<2x14x14x32xf32, #tpu.memory_space<vmem>>, vector<2x1x14x32xf32>
    %122 = vector.shape_cast %121 : vector<2x1x14x32xf32> to vector<2x14x32xf32>
    %c0_64 = arith.constant 0 : index
    %c10_65 = arith.constant 10 : index
    %c0_66 = arith.constant 0 : index
    %c0_67 = arith.constant 0 : index
    %123 = vector.load %arg0[%c0_64, %c10_65, %c0_66, %c0_67] : memref<2x14x14x32xf32, #tpu.memory_space<vmem>>, vector<2x1x14x32xf32>
    %124 = vector.shape_cast %123 : vector<2x1x14x32xf32> to vector<2x14x32xf32>
    %125 = arith.addf %122, %124 : vector<2x14x32xf32>
    %c0_68 = arith.constant 0 : index
    %c11 = arith.constant 11 : index
    %c0_69 = arith.constant 0 : index
    %c0_70 = arith.constant 0 : index
    %126 = vector.load %arg0[%c0_68, %c11, %c0_69, %c0_70] : memref<2x14x14x32xf32, #tpu.memory_space<vmem>>, vector<2x1x14x32xf32>
    %127 = vector.shape_cast %126 : vector<2x1x14x32xf32> to vector<2x14x32xf32>
    %128 = arith.addf %125, %127 : vector<2x14x32xf32>
    %c0_71 = arith.constant 0 : index
    %c12 = arith.constant 12 : index
    %c0_72 = arith.constant 0 : index
    %c0_73 = arith.constant 0 : index
    %129 = vector.load %arg0[%c0_71, %c12, %c0_72, %c0_73] : memref<2x14x14x32xf32, #tpu.memory_space<vmem>>, vector<2x1x14x32xf32>
    %130 = vector.shape_cast %129 : vector<2x1x14x32xf32> to vector<2x14x32xf32>
    %131 = arith.addf %128, %130 : vector<2x14x32xf32>
    %c0_74 = arith.constant 0 : index
    %c13 = arith.constant 13 : index
    %c0_75 = arith.constant 0 : index
    %c0_76 = arith.constant 0 : index
    %132 = vector.load %arg0[%c0_74, %c13, %c0_75, %c0_76] : memref<2x14x14x32xf32, #tpu.memory_space<vmem>>, vector<2x1x14x32xf32>
    %133 = vector.shape_cast %132 : vector<2x1x14x32xf32> to vector<2x14x32xf32>
    %134 = arith.addf %131, %133 : vector<2x14x32xf32>
    %135 = vector.extract_strided_slice %134 {offsets = [0, 0, 0], sizes = [2, 10, 32], strides = [1, 1, 1]} : vector<2x14x32xf32> to vector<2x10x32xf32>
    %136 = vector.extract_strided_slice %134 {offsets = [0, 1, 0], sizes = [2, 10, 32], strides = [1, 1, 1]} : vector<2x14x32xf32> to vector<2x10x32xf32>
    %137 = arith.addf %135, %136 : vector<2x10x32xf32>
    %138 = vector.extract_strided_slice %134 {offsets = [0, 2, 0], sizes = [2, 10, 32], strides = [1, 1, 1]} : vector<2x14x32xf32> to vector<2x10x32xf32>
    %139 = arith.addf %137, %138 : vector<2x10x32xf32>
    %140 = vector.extract_strided_slice %134 {offsets = [0, 3, 0], sizes = [2, 10, 32], strides = [1, 1, 1]} : vector<2x14x32xf32> to vector<2x10x32xf32>
    %141 = arith.addf %139, %140 : vector<2x10x32xf32>
    %142 = vector.extract_strided_slice %134 {offsets = [0, 4, 0], sizes = [2, 10, 32], strides = [1, 1, 1]} : vector<2x14x32xf32> to vector<2x10x32xf32>
    %143 = arith.addf %141, %142 : vector<2x10x32xf32>
    %144 = vector.extract_strided_slice %143 {offsets = [0, 0, 0], sizes = [2, 1, 32], strides = [1, 1, 1]} : vector<2x10x32xf32> to vector<2x1x32xf32>
    %145 = vector.shape_cast %144 : vector<2x1x32xf32> to vector<2x32xf32>
    %cst_77 = arith.constant 4.000000e-02 : f32
    %146 = vector.broadcast %cst_77 : f32 to vector<2x32xf32>
    %147 = arith.mulf %145, %146 : vector<2x32xf32>
    %148 = vector.extract_strided_slice %143 {offsets = [0, 3, 0], sizes = [2, 1, 32], strides = [1, 1, 1]} : vector<2x10x32xf32> to vector<2x1x32xf32>
    %149 = vector.shape_cast %148 : vector<2x1x32xf32> to vector<2x32xf32>
    %cst_78 = arith.constant 4.000000e-02 : f32
    %150 = vector.broadcast %cst_78 : f32 to vector<2x32xf32>
    %151 = arith.mulf %149, %150 : vector<2x32xf32>
    %152 = vector.extract_strided_slice %143 {offsets = [0, 6, 0], sizes = [2, 1, 32], strides = [1, 1, 1]} : vector<2x10x32xf32> to vector<2x1x32xf32>
    %153 = vector.shape_cast %152 : vector<2x1x32xf32> to vector<2x32xf32>
    %cst_79 = arith.constant 4.000000e-02 : f32
    %154 = vector.broadcast %cst_79 : f32 to vector<2x32xf32>
    %155 = arith.mulf %153, %154 : vector<2x32xf32>
    %156 = vector.extract_strided_slice %143 {offsets = [0, 9, 0], sizes = [2, 1, 32], strides = [1, 1, 1]} : vector<2x10x32xf32> to vector<2x1x32xf32>
    %157 = vector.shape_cast %156 : vector<2x1x32xf32> to vector<2x32xf32>
    %cst_80 = arith.constant 4.000000e-02 : f32
    %158 = vector.broadcast %cst_80 : f32 to vector<2x32xf32>
    %159 = arith.mulf %157, %158 : vector<2x32xf32>
    %160 = tpu.concatenate %30, %34, %38, %42, %69, %73, %77, %81, %108, %112, %116, %120, %147, %151, %155, %159 in 0 : vector<2x32xf32>, vector<2x32xf32>, vector<2x32xf32>, vector<2x32xf32>, vector<2x32xf32>, vector<2x32xf32>, vector<2x32xf32>, vector<2x32xf32>, vector<2x32xf32>, vector<2x32xf32>, vector<2x32xf32>, vector<2x32xf32>, vector<2x32xf32>, vector<2x32xf32>, vector<2x32xf32>, vector<2x32xf32> -> vector<32x32xf32>
    %c0_81 = arith.constant 0 : index
    %c0_82 = arith.constant 0 : index
    %161 = vector.load %arg1[%c0_81, %c0_82] : memref<32x128xf32, #tpu.memory_space<vmem>>, vector<32x128xf32>
    %cst_83 = arith.constant dense<0.000000e+00> : vector<32x128xf32>
    %162 = tpu.matmul %160, %161, %cst_83 {dimension_numbers = #tpu.dot_dimension_numbers<[1], [0], [0], [1], [0, 0, 1, 1], [], []>} : vector<32x32xf32>, vector<32x128xf32>, vector<32x128xf32> -> vector<32x128xf32>
    %c0_84 = arith.constant 0 : index
    %c0_85 = arith.constant 0 : index
    %163 = vector.load %arg2[%c0_84, %c0_85] : memref<1x128xf32, #tpu.memory_space<vmem>>, vector<1x128xf32>
    %164 = vector.broadcast %163 : vector<1x128xf32> to vector<32x128xf32>
    %165 = arith.addf %162, %164 : vector<32x128xf32>
    %166 = vector.extract_strided_slice %165 {offsets = [0, 0], sizes = [2, 128], strides = [1, 1]} : vector<32x128xf32> to vector<2x128xf32>
    %c0_86 = arith.constant 0 : index
    %c0_87 = arith.constant 0 : index
    %167 = vector.load %arg10[%c0_86, %c0_87] : memref<2x2048xf32, #tpu.memory_space<vmem>>, vector<2x128xf32>
    tpu.vector_store %arg10[%c0_86, %c0_87], %166 {strides = array<i32>} : memref<2x2048xf32, #tpu.memory_space<vmem>>, vector<2x128xf32>,
    %168 = vector.extract_strided_slice %165 {offsets = [2, 0], sizes = [2, 128], strides = [1, 1]} : vector<32x128xf32> to vector<2x128xf32>
    %c0_88 = arith.constant 0 : index
    %c128 = arith.constant 128 : index
    %169 = vector.load %arg10[%c0_88, %c128] : memref<2x2048xf32, #tpu.memory_space<vmem>>, vector<2x128xf32>
    tpu.vector_store %arg10[%c0_88, %c128], %168 {strides = array<i32>} : memref<2x2048xf32, #tpu.memory_space<vmem>>, vector<2x128xf32>,
    %170 = vector.extract_strided_slice %165 {offsets = [4, 0], sizes = [2, 128], strides = [1, 1]} : vector<32x128xf32> to vector<2x128xf32>
    %c0_89 = arith.constant 0 : index
    %c256 = arith.constant 256 : index
    %171 = vector.load %arg10[%c0_89, %c256] : memref<2x2048xf32, #tpu.memory_space<vmem>>, vector<2x128xf32>
    tpu.vector_store %arg10[%c0_89, %c256], %170 {strides = array<i32>} : memref<2x2048xf32, #tpu.memory_space<vmem>>, vector<2x128xf32>,
    %172 = vector.extract_strided_slice %165 {offsets = [6, 0], sizes = [2, 128], strides = [1, 1]} : vector<32x128xf32> to vector<2x128xf32>
    %c0_90 = arith.constant 0 : index
    %c384 = arith.constant 384 : index
    %173 = vector.load %arg10[%c0_90, %c384] : memref<2x2048xf32, #tpu.memory_space<vmem>>, vector<2x128xf32>
    tpu.vector_store %arg10[%c0_90, %c384], %172 {strides = array<i32>} : memref<2x2048xf32, #tpu.memory_space<vmem>>, vector<2x128xf32>,
    %174 = vector.extract_strided_slice %165 {offsets = [8, 0], sizes = [2, 128], strides = [1, 1]} : vector<32x128xf32> to vector<2x128xf32>
    %c0_91 = arith.constant 0 : index
    %c512 = arith.constant 512 : index
    %175 = vector.load %arg10[%c0_91, %c512] : memref<2x2048xf32, #tpu.memory_space<vmem>>, vector<2x128xf32>
    tpu.vector_store %arg10[%c0_91, %c512], %174 {strides = array<i32>} : memref<2x2048xf32, #tpu.memory_space<vmem>>, vector<2x128xf32>,
    %176 = vector.extract_strided_slice %165 {offsets = [10, 0], sizes = [2, 128], strides = [1, 1]} : vector<32x128xf32> to vector<2x128xf32>
    %c0_92 = arith.constant 0 : index
    %c640 = arith.constant 640 : index
    %177 = vector.load %arg10[%c0_92, %c640] : memref<2x2048xf32, #tpu.memory_space<vmem>>, vector<2x128xf32>
    tpu.vector_store %arg10[%c0_92, %c640], %176 {strides = array<i32>} : memref<2x2048xf32, #tpu.memory_space<vmem>>, vector<2x128xf32>,
    %178 = vector.extract_strided_slice %165 {offsets = [12, 0], sizes = [2, 128], strides = [1, 1]} : vector<32x128xf32> to vector<2x128xf32>
    %c0_93 = arith.constant 0 : index
    %c768 = arith.constant 768 : index
    %179 = vector.load %arg10[%c0_93, %c768] : memref<2x2048xf32, #tpu.memory_space<vmem>>, vector<2x128xf32>
    tpu.vector_store %arg10[%c0_93, %c768], %178 {strides = array<i32>} : memref<2x2048xf32, #tpu.memory_space<vmem>>, vector<2x128xf32>,
    %180 = vector.extract_strided_slice %165 {offsets = [14, 0], sizes = [2, 128], strides = [1, 1]} : vector<32x128xf32> to vector<2x128xf32>
    %c0_94 = arith.constant 0 : index
    %c896 = arith.constant 896 : index
    %181 = vector.load %arg10[%c0_94, %c896] : memref<2x2048xf32, #tpu.memory_space<vmem>>, vector<2x128xf32>
    tpu.vector_store %arg10[%c0_94, %c896], %180 {strides = array<i32>} : memref<2x2048xf32, #tpu.memory_space<vmem>>, vector<2x128xf32>,
    %182 = vector.extract_strided_slice %165 {offsets = [16, 0], sizes = [2, 128], strides = [1, 1]} : vector<32x128xf32> to vector<2x128xf32>
    %c0_95 = arith.constant 0 : index
    %c1024 = arith.constant 1024 : index
    %183 = vector.load %arg10[%c0_95, %c1024] : memref<2x2048xf32, #tpu.memory_space<vmem>>, vector<2x128xf32>
    tpu.vector_store %arg10[%c0_95, %c1024], %182 {strides = array<i32>} : memref<2x2048xf32, #tpu.memory_space<vmem>>, vector<2x128xf32>,
    %184 = vector.extract_strided_slice %165 {offsets = [18, 0], sizes = [2, 128], strides = [1, 1]} : vector<32x128xf32> to vector<2x128xf32>
    %c0_96 = arith.constant 0 : index
    %c1152 = arith.constant 1152 : index
    %185 = vector.load %arg10[%c0_96, %c1152] : memref<2x2048xf32, #tpu.memory_space<vmem>>, vector<2x128xf32>
    tpu.vector_store %arg10[%c0_96, %c1152], %184 {strides = array<i32>} : memref<2x2048xf32, #tpu.memory_space<vmem>>, vector<2x128xf32>,
    %186 = vector.extract_strided_slice %165 {offsets = [20, 0], sizes = [2, 128], strides = [1, 1]} : vector<32x128xf32> to vector<2x128xf32>
    %c0_97 = arith.constant 0 : index
    %c1280 = arith.constant 1280 : index
    %187 = vector.load %arg10[%c0_97, %c1280] : memref<2x2048xf32, #tpu.memory_space<vmem>>, vector<2x128xf32>
    tpu.vector_store %arg10[%c0_97, %c1280], %186 {strides = array<i32>} : memref<2x2048xf32, #tpu.memory_space<vmem>>, vector<2x128xf32>,
    %188 = vector.extract_strided_slice %165 {offsets = [22, 0], sizes = [2, 128], strides = [1, 1]} : vector<32x128xf32> to vector<2x128xf32>
    %c0_98 = arith.constant 0 : index
    %c1408 = arith.constant 1408 : index
    %189 = vector.load %arg10[%c0_98, %c1408] : memref<2x2048xf32, #tpu.memory_space<vmem>>, vector<2x128xf32>
    tpu.vector_store %arg10[%c0_98, %c1408], %188 {strides = array<i32>} : memref<2x2048xf32, #tpu.memory_space<vmem>>, vector<2x128xf32>,
    %190 = vector.extract_strided_slice %165 {offsets = [24, 0], sizes = [2, 128], strides = [1, 1]} : vector<32x128xf32> to vector<2x128xf32>
    %c0_99 = arith.constant 0 : index
    %c1536 = arith.constant 1536 : index
    %191 = vector.load %arg10[%c0_99, %c1536] : memref<2x2048xf32, #tpu.memory_space<vmem>>, vector<2x128xf32>
    tpu.vector_store %arg10[%c0_99, %c1536], %190 {strides = array<i32>} : memref<2x2048xf32, #tpu.memory_space<vmem>>, vector<2x128xf32>,
    %192 = vector.extract_strided_slice %165 {offsets = [26, 0], sizes = [2, 128], strides = [1, 1]} : vector<32x128xf32> to vector<2x128xf32>
    %c0_100 = arith.constant 0 : index
    %c1664 = arith.constant 1664 : index
    %193 = vector.load %arg10[%c0_100, %c1664] : memref<2x2048xf32, #tpu.memory_space<vmem>>, vector<2x128xf32>
    tpu.vector_store %arg10[%c0_100, %c1664], %192 {strides = array<i32>} : memref<2x2048xf32, #tpu.memory_space<vmem>>, vector<2x128xf32>,
    %194 = vector.extract_strided_slice %165 {offsets = [28, 0], sizes = [2, 128], strides = [1, 1]} : vector<32x128xf32> to vector<2x128xf32>
    %c0_101 = arith.constant 0 : index
    %c1792 = arith.constant 1792 : index
    %195 = vector.load %arg10[%c0_101, %c1792] : memref<2x2048xf32, #tpu.memory_space<vmem>>, vector<2x128xf32>
    tpu.vector_store %arg10[%c0_101, %c1792], %194 {strides = array<i32>} : memref<2x2048xf32, #tpu.memory_space<vmem>>, vector<2x128xf32>,
    %196 = vector.extract_strided_slice %165 {offsets = [30, 0], sizes = [2, 128], strides = [1, 1]} : vector<32x128xf32> to vector<2x128xf32>
    %c0_102 = arith.constant 0 : index
    %c1920 = arith.constant 1920 : index
    %197 = vector.load %arg10[%c0_102, %c1920] : memref<2x2048xf32, #tpu.memory_space<vmem>>, vector<2x128xf32>
    tpu.vector_store %arg10[%c0_102, %c1920], %196 {strides = array<i32>} : memref<2x2048xf32, #tpu.memory_space<vmem>>, vector<2x128xf32>,
    %c0_i32_103 = arith.constant 0 : i32
    %198 = tpu.memref_slice %arg11[%c0_i32_103] : memref<2x!tpu.dma_semaphore, #tpu.memory_space<semaphore_mem>> -> memref<1x!tpu.dma_semaphore, #tpu.memory_space<semaphore_mem>>
    %199 = tpu.memref_squeeze %198 : memref<1x!tpu.dma_semaphore, #tpu.memory_space<semaphore_mem>> -> memref<!tpu.dma_semaphore, #tpu.memory_space<semaphore_mem>>
    tpu.wait_dma2 semaphore(%199 : memref<!tpu.dma_semaphore, #tpu.memory_space<semaphore_mem>>) src(%arg3 : memref<2048x1024xbf16, #tpu.memory_space<any>>) dst(%arg8 : memref<2048x1024xbf16, #tpu.memory_space<vmem>>)
    %c0_104 = arith.constant 0 : index
    %c0_105 = arith.constant 0 : index
    %200 = vector.load %arg10[%c0_104, %c0_105] : memref<2x2048xf32, #tpu.memory_space<vmem>>, vector<2x2048xf32>
    %201 = arith.truncf %200 : vector<2x2048xf32> to vector<2x2048xbf16>
    %c0_106 = arith.constant 0 : index
    %c0_107 = arith.constant 0 : index
    %202 = vector.load %arg8[%c0_106, %c0_107] : memref<2048x1024xbf16, #tpu.memory_space<vmem>>, vector<2048x1024xbf16>
    %cst_108 = arith.constant dense<0.000000e+00> : vector<2x1024xf32>
    %203 = tpu.matmul %201, %202, %cst_108 {dimension_numbers = #tpu.dot_dimension_numbers<[1], [0], [0], [1], [0, 0, 1, 1], [], []>} : vector<2x2048xbf16>, vector<2048x1024xbf16>, vector<2x1024xf32> -> vector<2x1024xf32>
    %c0_109 = arith.constant 0 : index
    %c0_110 = arith.constant 0 : index
    %204 = vector.load %arg4[%c0_109, %c0_110] : memref<1x1024xf32, #tpu.memory_space<vmem>>, vector<1x1024xf32>
    %205 = vector.broadcast %204 : vector<1x1024xf32> to vector<2x1024xf32>
    %206 = arith.addf %203, %205 : vector<2x1024xf32>
    %cst_111 = arith.constant 0.000000e+00 : f32
    %207 = vector.broadcast %cst_111 : f32 to vector<2x1024xf32>
    %208 = arith.maximumf %206, %207 : vector<2x1024xf32>
    %c1_i32_112 = arith.constant 1 : i32
    %209 = tpu.memref_slice %arg11[%c1_i32_112] : memref<2x!tpu.dma_semaphore, #tpu.memory_space<semaphore_mem>> -> memref<1x!tpu.dma_semaphore, #tpu.memory_space<semaphore_mem>>
    %210 = tpu.memref_squeeze %209 : memref<1x!tpu.dma_semaphore, #tpu.memory_space<semaphore_mem>> -> memref<!tpu.dma_semaphore, #tpu.memory_space<semaphore_mem>>
    tpu.wait_dma2 semaphore(%210 : memref<!tpu.dma_semaphore, #tpu.memory_space<semaphore_mem>>) src(%arg5 : memref<1024x128xbf16, #tpu.memory_space<any>>) dst(%arg9 : memref<1024x128xbf16, #tpu.memory_space<vmem>>)
    %211 = arith.truncf %208 : vector<2x1024xf32> to vector<2x1024xbf16>
    %c0_113 = arith.constant 0 : index
    %c0_114 = arith.constant 0 : index
    %212 = vector.load %arg9[%c0_113, %c0_114] : memref<1024x128xbf16, #tpu.memory_space<vmem>>, vector<1024x128xbf16>
    %cst_115 = arith.constant dense<0.000000e+00> : vector<2x128xf32>
    %213 = tpu.matmul %211, %212, %cst_115 {dimension_numbers = #tpu.dot_dimension_numbers<[1], [0], [0], [1], [0, 0, 1, 1], [], []>} : vector<2x1024xbf16>, vector<1024x128xbf16>, vector<2x128xf32> -> vector<2x128xf32>
    %c0_116 = arith.constant 0 : index
    %c0_117 = arith.constant 0 : index
    %214 = vector.load %arg6[%c0_116, %c0_117] : memref<1x128xf32, #tpu.memory_space<vmem>>, vector<1x128xf32>
    %215 = vector.broadcast %214 : vector<1x128xf32> to vector<2x128xf32>
    %216 = arith.addf %213, %215 : vector<2x128xf32>
    %c0_118 = arith.constant 0 : index
    %c0_119 = arith.constant 0 : index
    %217 = vector.load %arg7[%c0_118, %c0_119] : memref<2x128xf32, #tpu.memory_space<vmem>>, vector<2x128xf32>
    tpu.vector_store %arg7[%c0_118, %c0_119], %216 {strides = array<i32>} : memref<2x128xf32, #tpu.memory_space<vmem>>, vector<2x128xf32>,
    return
  }
}

</mosaic_0001>

<bundles_post_ra>
// kernel: auxiliary_classification_forward.1
= control target key start
LH: loop header
LB: loop body
LE: loop exit
PB: predicated region body
PF: predicated region fallthrough
CT: control target
= control target key end

     0   :  { %12 = vsyncpa [#allocation7], 0  ;;  %s4714_s0 = inlined_call_operand.vmem [shape: f32[2,14,14,32], index: 0, kind: input, shape index: {}]   ;;  %s4715_s1 = inlined_call_operand.hbm [shape: f32[32,128], index: 1, kind: input, shape index: {}]   ;;  %s4716_s2 = inlined_call_operand.hbm [shape: f32[1,128], index: 2, kind: input, shape index: {}]   ;;  %s4717_s3 = inlined_call_operand.hbm [shape: bf16[2048,1024], index: 3, kind: input, shape index: {}]   ;;  %s4718_s4 = inlined_call_operand.hbm [shape: f32[1,1024], index: 4, kind: input, shape index: {}]   ;;  %s4719_s5 = inlined_call_operand.hbm [shape: bf16[1024,128], index: 5, kind: input, shape index: {}]   ;;  %s4720_s6 = inlined_call_operand.hbm [shape: f32[1,128], index: 6, kind: input, shape index: {}]   ;;  %s4721_s7 = inlined_call_operand.hbm [shape: f32[2,128], index: 7, kind: output, shape index: {}]  }
   0x1   :  { %13 = vsyncpa [#allocation10], 0 }
   0x2   :  { %14 = vsyncpa [#allocation13], 0 }
   0x3   :  { %15 = vsyncpa [#allocation8], 0  ;;  %s4053_s24 = smov [#allocation9]   ;;  %s4054_s26 = smov [#allocation6]  }
   0x4   :  { %s36_s25 = sshll.u32 %s4053_s24, 4  ;;  %s23_s27 = sshll.u32 %s4054_s26, 4  ;;  %s37_s25 = int_to_ptr.vmem [resolvable:$true] %s36_s25  ;;  %s4110_s27 = int_to_ptr.vmem [resolvable:$true] %s23_s27 }
   0x5   :  { %s3909_s30 = scalar_lea.hbm %s4716_s2, 16 }
   0x6   :  { %p3910_p0 = scmp.ne.s32.totalorder %s4716_s2, %s3909_s30  ;;  %p3913_p1 = scmp.lt.u32.totalorder %s3909_s30, %s4716_s2 }
   0x8   :  { %p3915_p2 = pnand %p3913_p1, %p3910_p0 }
   0xa   :  { %3918 = shalt.err (!%p3915_p2)
}
   0xb   :  { %s3919_s12 = scalar_lea.vmem %s37_s25, 16  ;;  %s3923_s13 = scalar_lea.vmem %s37_s25, 32 }
   0xc   :  { %p3920_p3 = scmp.ne.s32.totalorder %s37_s25, %s3919_s12  ;;  %p3924_p4 = scmp.lt.s32.totalorder %s37_s25, %s37_s25 }
   0xd   :  { %p3925_p5 = scmp.lt.s32.totalorder %s3923_s13, %s3919_s12 }
   0xf   :  { %p3926_p6 = por %p3925_p5, %p3924_p4 }
  0x11   :  { %p3927_p7 = pnand %p3926_p6, %p3920_p3 }
  0x13   :  { %3930 = shalt.err (!%p3927_p7)
}
  0x14   :  { %39 = dma.hbm_to_vmem [thread:$0]  %s4716_s2, 16, %s37_s25, [#allocation10]  }
  0x15   :  { %s3931_s18 = scalar_lea.hbm %s4715_s1, 512 }
  0x16   :  { %p3932_p8 = scmp.ne.s32.totalorder %s4715_s1, %s3931_s18  ;;  %p3935_p9 = scmp.lt.u32.totalorder %s3931_s18, %s4715_s1 }
  0x18   :  { %p3937_p10 = pnand %p3935_p9, %p3932_p8 }
  0x1a   :  { %3940 = shalt.err (!%p3937_p10)
}
  0x1b   :  { %s3941_s23 = scalar_lea.vmem %s4110_s27, 512  ;;  %p3946_p12 = scmp.lt.s32.totalorder %s4110_s27, %s4110_s27 }
  0x1c   :  { %p3942_p11 = scmp.ne.s32.totalorder %s4110_s27, %s3941_s23  ;;  %p3947_p13 = scmp.lt.s32.totalorder %s3941_s23, %s3941_s23 }
  0x1e   :  { %p3948_p0 = por %p3947_p13, %p3946_p12 }
  0x20   :  { %p3949_p1 = pnand %p3948_p0, %p3942_p11 }
  0x22   :  { %3952 = shalt.err (!%p3949_p1)
}
  0x23   :  { %s4055_s2 = smov 128   ;;  %s4056_s24 = smov 8  }
  0x24   :  { %29 = dma.hbm_to_vmem [thread:$0]  %s4715_s1, 512, %s4110_s27, [#allocation7], %s4055_s2, %s4055_s2, %s4056_s24  }
  0x25   :  { %s4057_s28 = smov [#allocation11]   ;;  %s4058_s30 = smov [#allocation12]  }
  0x26   :  { %s46_s29 = sshll.u32 %s4057_s28, 4  ;;  %s56_s8 = sshll.u32 %s4058_s30, 4  ;;  %s47_s29 = int_to_ptr.vmem [resolvable:$true] %s46_s29  ;;  %s57_s8 = int_to_ptr.vmem [resolvable:$true] %s56_s8 }
  0x27   :  { %s3953_s11 = scalar_lea.hbm %s4718_s4, 128 }
  0x28   :  { %p3954_p2 = scmp.ne.s32.totalorder %s4718_s4, %s3953_s11  ;;  %p3957_p3 = scmp.lt.u32.totalorder %s3953_s11, %s4718_s4 }
  0x2a   :  { %p3959_p4 = pnand %p3957_p3, %p3954_p2 }
  0x2c   :  { %3962 = shalt.err (!%p3959_p4)
}
  0x2d   :  { %s3963_s1 = scalar_lea.vmem %s47_s29, 128  ;;  %p3968_p6 = scmp.lt.s32.totalorder %s47_s29, %s47_s29 }
  0x2e   :  { %p3964_p5 = scmp.ne.s32.totalorder %s47_s29, %s3963_s1  ;;  %p3969_p7 = scmp.lt.s32.totalorder %s3963_s1, %s3963_s1 }
  0x30   :  { %p3970_p8 = por %p3969_p7, %p3968_p6 }
  0x32   :  { %p3971_p9 = pnand %p3970_p8, %p3964_p5 }
  0x34   :  { %3974 = shalt.err (!%p3971_p9)
}
  0x35   :  { %49 = dma.hbm_to_vmem [thread:$0]  %s4718_s4, 128, %s47_s29, [#allocation10]  }
  0x36   :  { %s3975_s19 = scalar_lea.hbm %s4720_s6, 16 }
  0x37   :  { %p3976_p10 = scmp.ne.s32.totalorder %s4720_s6, %s3975_s19  ;;  %p3979_p11 = scmp.lt.u32.totalorder %s3975_s19, %s4720_s6 }
  0x39   :  { %p3981_p12 = pnand %p3979_p11, %p3976_p10 }
  0x3b   :  { %3984 = shalt.err (!%p3981_p12)
}
  0x3c   :  { %s3985_s25 = scalar_lea.vmem %s57_s8, 16  ;;  %s3989_s26 = scalar_lea.vmem %s57_s8, 32 }
  0x3d   :  { %p3986_p13 = scmp.ne.s32.totalorder %s57_s8, %s3985_s25  ;;  %p3990_p0 = scmp.lt.s32.totalorder %s57_s8, %s57_s8 }
  0x3e   :  { %p3991_p1 = scmp.lt.s32.totalorder %s3989_s26, %s3985_s25 }
  0x40   :  { %p3992_p2 = por %p3991_p1, %p3990_p0 }
  0x42   :  { %p3993_p3 = pnand %p3992_p2, %p3986_p13 }
  0x44   :  { %3996 = shalt.err (!%p3993_p3)
}
  0x45   :  { %59 = dma.hbm_to_vmem [thread:$0]  %s4720_s6, 16, %s57_s8, [#allocation13]  }
  0x46   :  { %4041 = dma.done.wait [#allocation7], 512  }
  0x47   :  { %4042 = vsyncadd [#allocation7], 4294966784 }
  0x48   :  { %4043 = dma.done.wait [#allocation10], 144  }
  0x49   :  { %4044 = vsyncadd [#allocation10], 4294967152 }
  0x4a   :  { %4045 = dma.done.wait [#allocation13], 16  }
  0x4b   :  { %4046 = vsyncadd [#allocation13], 4294967280  ;;  %s77_s29 = sld [smem:[#allocation0]]   ;;  %s4059_s30 = smov 1024   ;;  %vm164_vm0 = vcmask 1046528   ;;  %vm179_vm1 = vcmask 1045504  }
  0x4c   :  { %89 = sst [smem:[#allocation16]] %s4059_s30  ;;  %s4060_s9 = smov 64   ;;  %vm194_vm2 = vcmask 1044480   ;;  %vm209_vm3 = vcmask 1043456   ;;  %vm532_vm4 = vcmask 1047559   ;;  %vm516_vm5 = vcmask 1041409  }
  0x4d   :  { %91 = sst [smem:[#allocation16 + $0x1]] %s4059_s30  ;;  %s4061_s10 = smov 2   ;;  %vm520_vm6 = vcmask 1043459   ;;  %vm525_vm7 = vcmask 1045509   ;;  %vm589_vm8 = vcmask 1041408   ;;  %vm613_vm9 = vcmask 261120  }
  0x4e   :  { %93 = sst [smem:[#allocation16 + $0x2]] %s4056_s24  ;;  %s4062_s11 = smov [#allocation2]  }
  0x4f   :  { %95 = sst [smem:[#allocation16 + $0x3]] %s4060_s9  ;;  %s85_s6 = sshll.u32 %s4062_s11, 4  ;;  %s86_s6 = int_to_ptr.vmem [resolvable:$true] %s85_s6 }
  0x50   :  { %97 = sst [smem:[#allocation16 + $0x4]] %s4055_s2  ;;  %s4063_s12 = smov 512  }
  0x51   :  { %99 = sst [smem:[#allocation16 + $0x5]] %s4061_s10  ;;  %s3583_s8 = sshll.u32 %s77_s29, 26 }
  0x52   :  { %101 = sst [smem:[#allocation16 + $0x6]] %s4063_s12  ;;  %s3584_s13 = sadd.s32 134217728, %s3583_s8 }
  0x53   :  { %103 = sst [smem:[#allocation16 + $0x7]] %s4060_s9  ;;  %s4064_s14 = smov 4  }
  0x54   :  { %105 = sst [smem:[#allocation16 + $0x8]] %s4064_s14  ;;  %s4065_s15 = smov [#allocation5]  }
  0x55   :  { %s4066_s1 = smov [#allocation15]   ;;  %s3997_s18 = scalar_lea.hbm %s4719_s5, 8192 }
  0x56   :  { %107 = dma.general %s4717_s3, 131072, %s86_s6, %s4065_s15, %s4066_s1, [#allocation16], %s3584_s13, 0  }
  0x57   :  { %v602_v0 = vld [vmem:[#allocation6] sm:$0xff]  ;;  %v603_v1 = vld [vmem:[#allocation6 + $0x8] sm:$0xff]  ;;  %v604_v2 = vld [vmem:[#allocation6 + $0x10] sm:$0xff]  ;;  %p3998_p4 = scmp.ne.s32.totalorder %s4719_s5, %s3997_s18  ;;  %p4001_p5 = scmp.lt.u32.totalorder %s3997_s18, %s4719_s5 }
  0x58   :  { %v3759_v3 = vpack.c.bf16 %v603_v1, %v602_v0  ;;  %v605_v4 = vld [vmem:[#allocation6 + $0x18] sm:$0xff]  ;;  %v120_v5 = vld [vmem:[%s4714_s0] sm:$0xff]  ;;  %v121_v6 = vld [vmem:[%s4714_s0 + $0x8] sm:$0x3f] }
  0x59   :  { %v3763_v7 = vpack.c.bf16 %v605_v4, %v604_v2  ;;  %v122_v8 = vld [vmem:[%s4714_s0 + $0xe0] sm:$0xff]  ;;  %v123_v9 = vld [vmem:[%s4714_s0 + $0xe8] sm:$0x3f]  ;;  %v3585_v10 = vld [vmem:[%s4714_s0 + $0x10] sm:$0xff]  ;;  %p4003_p6 = pnand %p4001_p5, %p3998_p4 }
  0x5a   :  { %3760 = vmatprep.subr.bf16.mxu0 %v3759_v3  ;;  %v3586_v11 = vld [vmem:[%s4714_s0 + $0x18] sm:$0x3f]  ;;  %v3587_v12 = vld [vmem:[%s4714_s0 + $0xf0] sm:$0xff]  ;;  %v129_v14 = vadd.f32 %v3585_v10, %v120_v5  ;;  %v3589_v18 = vld [vmem:[%s4714_s0 + $0x20] sm:$0xff] }
  0x5b   :  { %v3588_v13 = vld [vmem:[%s4714_s0 + $0xf8] sm:$0x3f]  ;;  %3762 = vmatpush3.bf16.msra.mxu0 %v3759_v3  ;;  %v130_v15 = vadd.f32 %v3586_v11, %v121_v6  ;;  %v131_v16 = vadd.f32 %v3587_v12, %v122_v8  ;;  %v3590_v19 = vld [vmem:[%s4714_s0 + $0x28] sm:$0x3f]  ;;  %v3591_v20 = vld [vmem:[%s4714_s0 + $0x100] sm:$0xff] }
  0x5c   :  { %v132_v17 = vadd.f32 %v3588_v13, %v123_v9  ;;  %3764 = vmatprep.subr.bf16.mxu0 %v3763_v7  ;;  %v3592_v21 = vld [vmem:[%s4714_s0 + $0x108] sm:$0x3f]  ;;  %v138_v22 = vadd.f32 %v3589_v18, %v129_v14  ;;  %v3593_v23 = vld [vmem:[%s4714_s0 + $0x30] sm:$0xff]  ;;  %v3594_v24 = vld [vmem:[%s4714_s0 + $0x38] sm:$0x3f] }
  0x5d   :  { %v139_v25 = vadd.f32 %v3590_v19, %v130_v15  ;;  %v140_v26 = vadd.f32 %v3591_v20, %v131_v16  ;;  %v3595_v28 = vld [vmem:[%s4714_s0 + $0x110] sm:$0xff]  ;;  %v3596_v29 = vld [vmem:[%s4714_s0 + $0x118] sm:$0x3f]  ;;  %v3597_v30 = vld [vmem:[%s4714_s0 + $0x40] sm:$0xff] }
  0x5e   :  { %v141_v27 = vadd.f32 %v3592_v21, %v132_v17  ;;  %v147_v31 = vadd.f32 %v3593_v23, %v138_v22  ;;  %v3598_v32 = vld [vmem:[%s4714_s0 + $0x48] sm:$0x3f]  ;;  %v3599_v33 = vld [vmem:[%s4714_s0 + $0x120] sm:$0xff]  ;;  %v228_v35 = vadd.f32 %v3597_v30, %v3593_v23  ;;  %v3601_v40 = vld [vmem:[%s4714_s0 + $0x50] sm:$0xff] }
  0x5f   :  { %v3600_v34 = vld [vmem:[%s4714_s0 + $0x128] sm:$0x3f]  ;;  %3766 = vmatpush3.bf16.msra.mxu0 %v3763_v7  ;;  %v148_v36 = vadd.f32 %v3594_v24, %v139_v25  ;;  %v149_v37 = vadd.f32 %v3595_v28, %v140_v26  ;;  %v229_v39 = vadd.f32 %v3598_v32, %v3594_v24  ;;  %v3602_v41 = vld [vmem:[%s4714_s0 + $0x58] sm:$0x3f]  ;;  %v230_v43 = vadd.f32 %v3599_v33, %v3595_v28  ;;  %v3603_v10 = vld [vmem:[%s4714_s0 + $0x130] sm:$0xff] }
  0x60   :  { %v150_v38 = vadd.f32 %v3596_v29, %v141_v27  ;;  %v156_v42 = vadd.f32 %v3597_v30, %v147_v31  ;;  %v231_v44 = vadd.f32 %v3600_v34, %v3596_v29  ;;  %v237_v45 = vadd.f32 %v3601_v40, %v228_v35  ;;  %v3604_v15 = vld [vmem:[%s4714_s0 + $0x138] sm:$0x3f]  ;;  %v4254_v20 = vld [vmem:[%s4714_s0 + $0x60] sm:$0xff]  ;;  %v4259_v21 = vld [vmem:[%s4714_s0 + $0x68] sm:$0x3f] }
  0x61   :  { %v157_v46 = vadd.f32 %v3598_v32, %v148_v36  ;;  %v158_v47 = vadd.f32 %v3599_v33, %v149_v37  ;;  %v238_v49 = vadd.f32 %v3602_v41, %v229_v39  ;;  %v239_v25 = vadd.f32 %v3603_v10, %v230_v43  ;;  %v4265_v26 = vld [vmem:[%s4714_s0 + $0x140] sm:$0xff]  ;;  %v4270_v27 = vld [vmem:[%s4714_s0 + $0x148] sm:$0x3f]  ;;  %v4278_v36 = vld [vmem:[%s4714_s0 + $0x78] sm:$0x3f] }
  0x62   :  { %v159_v48 = vadd.f32 %v3600_v34, %v150_v38  ;;  %v165_v50 = vrot.slane %v156_v42, 1  ;;  %v180_v51 = vrot.slane %v156_v42, 2  ;;  %v195_v52 = vrot.slane %v156_v42, 3  ;;  %v3609_v41 = vld [vmem:[%s4714_s0 + $0x70] sm:$0xff] }
  0x63   :  { %v210_v53 = vrot.slane %v156_v42, 4  ;;  %v166_v54 = vrot.slane %v157_v46, 1  ;;  %v168_v55 = vrot.slane %v158_v47, 1  ;;  %v181_v57 = vrot.slane %v157_v46, 2 }
  0x64   :  { %v169_v56 = vrot.slane %v159_v48, 1  ;;  %v183_v58 = vrot.slane %v158_v47, 2  ;;  %v184_v59 = vrot.slane %v159_v48, 2  ;;  %v196_v60 = vrot.slane %v157_v46, 3 }
  0x65   :  { %v198_v61 = vrot.slane %v158_v47, 3  ;;  %v167_v62 = vsel %vm164_vm0, %v165_v50, %v166_v54  ;;  %v176_v0 = vadd.f32 %v166_v54, %v157_v46  ;;  %v182_v4 = vsel %vm179_vm1, %v180_v51, %v181_v57 }
  0x66   :  { %v170_v63 = vsel %vm164_vm0, %v168_v55, %v169_v56  ;;  %v178_v1 = vadd.f32 %v169_v56, %v159_v48  ;;  %v175_v2 = vadd.f32 %v167_v62, %v156_v42  ;;  %v185_v5 = vsel %vm179_vm1, %v183_v58, %v184_v59  ;;  %v4288_v42 = vld [vmem:[%s4714_s0 + $0x150] sm:$0xff] }
  0x67   :  { %v177_v3 = vadd.f32 %v170_v63, %v158_v47  ;;  %v191_v6 = vadd.f32 %v181_v57, %v176_v0  ;;  %v197_v8 = vsel %vm194_vm2, %v195_v52, %v196_v60  ;;  %v199_v9 = vrot.slane %v159_v48, 3 }
  0x68   :  { %v193_v7 = vadd.f32 %v184_v59, %v178_v1  ;;  %v190_v11 = vadd.f32 %v182_v4, %v175_v2  ;;  %v211_v13 = vrot.slane %v157_v46, 4  ;;  %v213_v14 = vrot.slane %v158_v47, 4 }
  0x69   :  { %v192_v12 = vadd.f32 %v185_v5, %v177_v3  ;;  %v200_v16 = vsel %vm194_vm2, %v198_v61, %v199_v9  ;;  %v206_v17 = vadd.f32 %v196_v60, %v191_v6  ;;  %v214_v19 = vrot.slane %v159_v48, 4 }
  0x6a   :  { %v208_v18 = vadd.f32 %v199_v9, %v193_v7  ;;  %v205_v22 = vadd.f32 %v197_v8, %v190_v11  ;;  %v212_v24 = vsel %vm209_vm3, %v210_v53, %v211_v13  ;;  %v240_v31 = vadd.f32 %v3604_v15, %v231_v44 }
  0x6b   :  { %v207_v23 = vadd.f32 %v200_v16, %v192_v12  ;;  %v215_v28 = vsel %vm209_vm3, %v213_v14, %v214_v19  ;;  %v221_v29 = vadd.f32 %v211_v13, %v206_v17  ;;  %v246_v34 = vadd.f32 %v4254_v20, %v237_v45  ;;  %v4293_v45 = vld [vmem:[%s4714_s0 + $0x158] sm:$0x3f] }
  0x6c   :  { %v223_v30 = vadd.f32 %v214_v19, %v208_v18  ;;  %v220_v32 = vadd.f32 %v212_v24, %v205_v22  ;;  %v247_v35 = vadd.f32 %v4259_v21, %v238_v49  ;;  %v248_v39 = vadd.f32 %v4265_v26, %v239_v25 }
  0x6d   :  { %v222_v33 = vadd.f32 %v215_v28, %v207_v23  ;;  %v226_v37 = vmul.f32 0.04, %v221_v29  ;;  %v249_v40 = vadd.f32 %v4270_v27, %v240_v31  ;;  %v255_v46 = vadd.f32 %v3609_v41, %v246_v34 }
  0x6e   :  { %v227_v38 = vmul.f32 0.04, %v223_v30  ;;  %v224_v43 = vmul.f32 0.04, %v220_v32  ;;  %v256_v47 = vadd.f32 %v4278_v36, %v247_v35  ;;  %v257_v50 = vadd.f32 %v4288_v42, %v248_v39 }
  0x6f   :  { %v225_v44 = vmul.f32 0.04, %v222_v33  ;;  %v530_v48 = vrot.slane %v226_v37, 3  ;;  %v258_v51 = vadd.f32 %v4293_v45, %v249_v40  ;;  %v263_v57 = vrot.slane %v255_v46, 1 }
  0x70   :  { %v531_v49 = vrot.slane %v227_v38, 2  ;;  %v519_v53 = vrot.slane %v224_v43, 1  ;;  %v523_v54 = vrot.slane %v224_v43, 2  ;;  %v264_v58 = vrot.slane %v256_v47, 1 }
  0x71   :  { %v515_v52 = vrot.slane %v225_v44, 7  ;;  %v524_v55 = vrot.slane %v225_v44, 1  ;;  %v266_v59 = vrot.slane %v257_v50, 1  ;;  %v267_v63 = vrot.slane %v258_v51, 1 }
  0x72   :  { %v533_v56 = vsel %vm532_vm4, %v531_v49, %v530_v48  ;;  %v521_v61 = vsel %vm520_vm6, %v225_v44, %v519_v53  ;;  %v265_v1 = vsel %vm164_vm0, %v263_v57, %v264_v58  ;;  %v274_v2 = vadd.f32 %v264_v58, %v256_v47  ;;  %v3614_v44 = vld [vmem:[%s4714_s0 + $0x88] sm:$0x3f] }
  0x73   :  { %v517_v60 = vsel %vm516_vm5, %v515_v52, %v224_v43  ;;  %v526_v62 = vsel %vm525_vm7, %v524_v55, %v523_v54  ;;  %v277_v3 = vrot.slane %v255_v46, 2  ;;  %v268_v5 = vsel %vm164_vm0, %v266_v59, %v267_v63  ;;  %v3613_v43 = vld [vmem:[%s4714_s0 + $0x80] sm:$0xff] }
  0x74   :  { %v590_v0 = vsel %vm589_vm8, %v517_v60, %v521_v61  ;;  %v273_v6 = vadd.f32 %v265_v1, %v255_v46  ;;  %v276_v7 = vadd.f32 %v267_v63, %v258_v51  ;;  %v275_v9 = vadd.f32 %v268_v5, %v257_v50  ;;  %v4336_v60 = vld [vmem:[%s4714_s0 + $0x90] sm:$0xff]  ;;  %v4352_v1 = vld [vmem:[%s4714_s0 + $0x178] sm:$0x3f] }
  0x75   :  { %v591_v4 = vsel %vm209_vm3, %v590_v0, %v526_v62  ;;  %v278_v10 = vrot.slane %v256_v47, 2  ;;  %v280_v11 = vrot.slane %v257_v50, 2  ;;  %v281_v12 = vrot.slane %v258_v51, 2 }
  0x76   :  { %v592_v8 = vsel %vm179_vm1, %v591_v4, %v533_v56  ;;  %v291_v13 = vrot.slane %v255_v46, 3  ;;  %v292_v14 = vrot.slane %v256_v47, 3  ;;  %v294_v15 = vrot.slane %v257_v50, 3  ;;  %v3621_v4 = vld [vmem:[%s4714_s0 + $0xa0] sm:$0xff] }
  0x77   :  { %3753 = vmatprep.mubr.msk.f32.mxu0 %vm613_vm9, %v592_v8  ;;  %v279_v16 = vsel %vm179_vm1, %v277_v3, %v278_v10  ;;  %v288_v17 = vadd.f32 %v278_v10, %v274_v2  ;;  %v295_v18 = vrot.slane %v258_v51, 3  ;;  %v305_v19 = vrot.slane %v255_v46, 4  ;;  %v3622_v8 = vld [vmem:[%s4714_s0 + $0xa8] sm:$0x3f] }
  0x78   :  { %v282_v22 = vsel %vm179_vm1, %v280_v11, %v281_v12  ;;  %v287_v23 = vadd.f32 %v279_v16, %v273_v6  ;;  %v290_v24 = vadd.f32 %v281_v12, %v276_v7  ;;  %v293_v25 = vsel %vm194_vm2, %v291_v13, %v292_v14  ;;  %v3624_v13 = vld [vmem:[%s4714_s0 + $0x188] sm:$0x3f] }
  0x79   :  { %v289_v28 = vadd.f32 %v282_v22, %v275_v9  ;;  %v296_v29 = vsel %vm194_vm2, %v294_v15, %v295_v18  ;;  %v302_v30 = vadd.f32 %v292_v14, %v288_v17  ;;  %v306_v31 = vrot.slane %v256_v47, 4  ;;  %v3623_v9 = vld [vmem:[%s4714_s0 + $0x180] sm:$0xff] }
  0x7a   :  { %v301_v32 = vadd.f32 %v293_v25, %v287_v23  ;;  %v304_v33 = vadd.f32 %v295_v18, %v290_v24  ;;  %v308_v34 = vrot.slane %v257_v50, 4  ;;  %v309_v35 = vrot.slane %v258_v51, 4  ;;  %v3615_v50 = vld [vmem:[%s4714_s0 + $0x160] sm:$0xff] }
  0x7b   :  { %v303_v37 = vadd.f32 %v296_v29, %v289_v28  ;;  %v307_v38 = vsel %vm209_vm3, %v305_v19, %v306_v31  ;;  %v316_v39 = vadd.f32 %v306_v31, %v302_v30  ;;  %v323_v40 = vadd.f32 %v3609_v41, %v4254_v20  ;;  %v3616_v20 = vld [vmem:[%s4714_s0 + $0x168] sm:$0x3f] }
  0x7c   :  { %v310_v46 = vsel %vm209_vm3, %v308_v34, %v309_v35  ;;  %v315_v47 = vadd.f32 %v307_v38, %v301_v32  ;;  %v318_v48 = vadd.f32 %v309_v35, %v304_v33  ;;  %v324_v49 = vadd.f32 %v4278_v36, %v4259_v21 }
  0x7d   :  { %v317_v41 = vadd.f32 %v310_v46, %v303_v37  ;;  %v321_v51 = vmul.f32 0.04, %v316_v39  ;;  %v325_v52 = vadd.f32 %v4288_v42, %v4265_v26  ;;  %v326_v53 = vadd.f32 %v4293_v45, %v4270_v27  ;;  %v4341_v26 = vld [vmem:[%s4714_s0 + $0x98] sm:$0x3f]  ;;  %v4346_v27 = vld [vmem:[%s4714_s0 + $0x170] sm:$0xff] }
  0x7e   :  { %v319_v54 = vmul.f32 0.04, %v315_v47  ;;  %v322_v55 = vmul.f32 0.04, %v318_v48  ;;  %v332_v56 = vadd.f32 %v3613_v43, %v323_v40  ;;  %v333_v21 = vadd.f32 %v3614_v44, %v324_v49 }
  0x7f   :  { %v320_v36 = vmul.f32 0.04, %v317_v41  ;;  %v549_v57 = vrot.slane %v321_v51, 3  ;;  %v334_v58 = vadd.f32 %v3615_v50, %v325_v52  ;;  %v335_v59 = vadd.f32 %v3616_v20, %v326_v53 }
  0x80   :  { %v540_v61 = vrot.slane %v319_v54, 1  ;;  %v543_v62 = vrot.slane %v319_v54, 2  ;;  %v550_v63 = vrot.slane %v322_v55, 2  ;;  %v341_v42 = vadd.f32 %v4336_v60, %v332_v56 }
  0x81   :  { %v537_v45 = vrot.slane %v320_v36, 7  ;;  %v544_v0 = vrot.slane %v320_v36, 1  ;;  %v342_v2 = vadd.f32 %v4341_v26, %v333_v21  ;;  %v343_v3 = vadd.f32 %v4346_v27, %v334_v58 }
  0x82   :  { %v541_v5 = vsel %vm520_vm6, %v320_v36, %v540_v61  ;;  %v551_v6 = vsel %vm532_vm4, %v550_v63, %v549_v57  ;;  %v344_v7 = vadd.f32 %v4352_v1, %v335_v59  ;;  %v350_v10 = vadd.f32 %v3621_v4, %v341_v42  ;;  %v3625_v61 = vld [vmem:[%s4714_s0 + $0xb0] sm:$0xff] }
  0x83   :  { %v538_v11 = vsel %vm516_vm5, %v537_v45, %v319_v54  ;;  %v545_v12 = vsel %vm525_vm7, %v544_v0, %v543_v62  ;;  %v351_v14 = vadd.f32 %v3622_v8, %v342_v2  ;;  %v352_v15 = vadd.f32 %v3623_v9, %v343_v3  ;;  %v3626_v62 = vld [vmem:[%s4714_s0 + $0xb8] sm:$0x3f]  ;;  %v3627_v2 = vld [vmem:[%s4714_s0 + $0x190] sm:$0xff] }
  0x84   :  { %v593_v16 = vsel %vm589_vm8, %v538_v11, %v541_v5  ;;  %v353_v17 = vadd.f32 %v3624_v13, %v344_v7  ;;  %v358_v18 = vrot.slane %v350_v10, 1  ;;  %v372_v19 = vrot.slane %v350_v10, 2  ;;  %v3628_v3 = vld [vmem:[%s4714_s0 + $0x198] sm:$0x3f]  ;;  %v3631_v11 = vld [vmem:[%s4714_s0 + $0x1a0] sm:$0xff] }
  0x85   :  { %v594_v22 = vsel %vm209_vm3, %v593_v16, %v545_v12  ;;  %v359_v23 = vrot.slane %v351_v14, 1  ;;  %v361_v24 = vrot.slane %v352_v15, 1  ;;  %v373_v25 = vrot.slane %v351_v14, 2  ;;  %v3633_v12 = vld [vmem:[%s4714_s0 + $0xd0] sm:$0xff] }
  0x86   :  { %v595_v28 = vsel %vm179_vm1, %v594_v22, %v551_v6  ;;  %v362_v29 = vrot.slane %v353_v17, 1  ;;  %v375_v30 = vrot.slane %v352_v15, 2  ;;  %v376_v31 = vrot.slane %v353_v17, 2 }
  0x87   :  { %3754 = vmatmul.mubr.msk.f32.vlgmr.msra.gmra.mrb[0].mxu0 %vm613_vm9, %v595_v28  ;;  %v360_v32 = vsel %vm164_vm0, %v358_v18, %v359_v23  ;;  %v369_v33 = vadd.f32 %v359_v23, %v351_v14  ;;  %v374_v34 = vsel %vm179_vm1, %v372_v19, %v373_v25  ;;  %v386_v35 = vrot.slane %v350_v10, 3  ;;  %v3635_v18 = vld [vmem:[%s4714_s0 + $0x1b0] sm:$0xff] }
  0x88   :  { %v363_v37 = vsel %vm164_vm0, %v361_v24, %v362_v29  ;;  %v368_v38 = vadd.f32 %v360_v32, %v350_v10  ;;  %v371_v39 = vadd.f32 %v362_v29, %v353_v17  ;;  %v377_v40 = vsel %vm179_vm1, %v375_v30, %v376_v31 }
  0x89   :  { %v370_v43 = vadd.f32 %v363_v37, %v352_v15  ;;  %v383_v44 = vadd.f32 %v373_v25, %v369_v33  ;;  %v387_v46 = vrot.slane %v351_v14, 3  ;;  %v389_v47 = vrot.slane %v352_v15, 3  ;;  %v3636_v25 = vld [vmem:[%s4714_s0 + $0x1b8] sm:$0x3f] }
  0x8a   :  { %v382_v48 = vadd.f32 %v374_v34, %v368_v38  ;;  %v385_v49 = vadd.f32 %v376_v31, %v371_v39  ;;  %v390_v50 = vrot.slane %v353_v17, 3  ;;  %v400_v20 = vrot.slane %v350_v10, 4 }
  0x8b   :  { %v384_v41 = vadd.f32 %v377_v40, %v370_v43  ;;  %v388_v51 = vsel %vm194_vm2, %v386_v35, %v387_v46  ;;  %v397_v52 = vadd.f32 %v387_v46, %v383_v44  ;;  %v401_v53 = vrot.slane %v351_v14, 4 }
  0x8c   :  { %v391_v54 = vsel %vm194_vm2, %v389_v47, %v390_v50  ;;  %v396_v55 = vadd.f32 %v388_v51, %v382_v48  ;;  %v399_v56 = vadd.f32 %v390_v50, %v385_v49  ;;  %v403_v21 = vrot.slane %v352_v15, 4 }
  0x8d   :  { %v398_v36 = vadd.f32 %v391_v54, %v384_v41  ;;  %v402_v57 = vsel %vm209_vm3, %v400_v20, %v401_v53  ;;  %v404_v58 = vrot.slane %v353_v17, 4  ;;  %v411_v59 = vadd.f32 %v401_v53, %v397_v52  ;;  %v3634_v17 = vld [vmem:[%s4714_s0 + $0xd8] sm:$0x3f] }
  0x8e   :  { %v410_v63 = vadd.f32 %v402_v57, %v396_v55  ;;  %v418_v42 = vadd.f32 %v3621_v4, %v4336_v60  ;;  %v419_v45 = vadd.f32 %v3622_v8, %v4341_v26  ;;  %v420_v0 = vadd.f32 %v3623_v9, %v4346_v27  ;;  %v3629_v60 = vld [vmem:[%s4714_s0 + $0xc0] sm:$0xff]  ;;  %v3630_v26 = vld [vmem:[%s4714_s0 + $0xc8] sm:$0x3f] }
  0x8f   :  { %v405_v5 = vsel %vm209_vm3, %v403_v21, %v404_v58  ;;  %v413_v6 = vadd.f32 %v404_v58, %v399_v56  ;;  %v416_v7 = vmul.f32 0.04, %v411_v59  ;;  %v421_v10 = vadd.f32 %v3624_v13, %v4352_v1  ;;  %v3632_v1 = vld [vmem:[%s4714_s0 + $0x1a8] sm:$0x3f]  ;;  %s4067_s0 = smov [#allocation3]  }
  0x90   :  { %v412_v27 = vadd.f32 %v405_v5, %v398_v36  ;;  %v414_v4 = vmul.f32 0.04, %v410_v63  ;;  %v427_v8 = vadd.f32 %v3625_v61, %v418_v42  ;;  %v428_v9 = vadd.f32 %v3626_v62, %v419_v45  ;;  %s116_s2 = sshll.u32 %s4067_s0, 4  ;;  %s117_s2 = int_to_ptr.vmem [resolvable:$true] %s116_s2 }
  0x91   :  { %v417_v13 = vmul.f32 0.04, %v413_v6  ;;  %v567_v14 = vrot.slane %v416_v7, 3  ;;  %v429_v15 = vadd.f32 %v3627_v2, %v420_v0  ;;  %v430_v16 = vadd.f32 %v3628_v3, %v421_v10 }
  0x92   :  { %v415_v19 = vmul.f32 0.04, %v412_v27  ;;  %v558_v22 = vrot.slane %v414_v4, 1  ;;  %v561_v23 = vrot.slane %v414_v4, 2  ;;  %v436_v24 = vadd.f32 %v3629_v60, %v427_v8 }
  0x93   :  { %v568_v28 = vrot.slane %v417_v13, 2  ;;  %v437_v29 = vadd.f32 %v3630_v26, %v428_v9  ;;  %v438_v30 = vadd.f32 %v3631_v11, %v429_v15  ;;  %v439_v31 = vadd.f32 %v3632_v1, %v430_v16 }
  0x94   :  { %v555_v32 = vrot.slane %v415_v19, 7  ;;  %v559_v33 = vsel %vm520_vm6, %v415_v19, %v558_v22  ;;  %v562_v34 = vrot.slane %v415_v19, 1  ;;  %v445_v35 = vadd.f32 %v3633_v12, %v436_v24 }
  0x95   :  { %v569_v37 = vsel %vm532_vm4, %v568_v28, %v567_v14  ;;  %v446_v38 = vadd.f32 %v3634_v17, %v437_v29  ;;  %v447_v39 = vadd.f32 %v3635_v18, %v438_v30  ;;  %v448_v40 = vadd.f32 %v3636_v25, %v439_v31 }
  0x96   :  { %v556_v43 = vsel %vm516_vm5, %v555_v32, %v414_v4  ;;  %v563_v44 = vsel %vm525_vm7, %v562_v34, %v561_v23  ;;  %v453_v46 = vrot.slane %v445_v35, 1  ;;  %v467_v47 = vrot.slane %v445_v35, 2 }
  0x97   :  { %v596_v48 = vsel %vm589_vm8, %v556_v43, %v559_v33  ;;  %v454_v49 = vrot.slane %v446_v38, 1  ;;  %v456_v50 = vrot.slane %v447_v39, 1  ;;  %v457_v20 = vrot.slane %v448_v40, 1 }
  0x98   :  { %v597_v41 = vsel %vm209_vm3, %v596_v48, %v563_v44  ;;  %v468_v51 = vrot.slane %v446_v38, 2  ;;  %v470_v52 = vrot.slane %v447_v39, 2  ;;  %v471_v53 = vrot.slane %v448_v40, 2 }
  0x99   :  { %v598_v54 = vsel %vm179_vm1, %v597_v41, %v569_v37  ;;  %v455_v55 = vsel %vm164_vm0, %v453_v46, %v454_v49  ;;  %v458_v56 = vsel %vm164_vm0, %v456_v50, %v457_v20  ;;  %v464_v21 = vadd.f32 %v454_v49, %v446_v38 }
  0x9a   :  { %3756 = vmatprep.mubr.msk.f32.mxu0 %vm613_vm9, %v598_v54  ;;  %v463_v36 = vadd.f32 %v455_v55, %v445_v35  ;;  %v465_v57 = vadd.f32 %v458_v56, %v447_v39  ;;  %v466_v58 = vadd.f32 %v457_v20, %v448_v40  ;;  %v469_v59 = vsel %vm179_vm1, %v467_v47, %v468_v51 }
  0x9b   :  { %v472_v61 = vsel %vm179_vm1, %v470_v52, %v471_v53  ;;  %v478_v62 = vadd.f32 %v468_v51, %v464_v21  ;;  %v481_v63 = vrot.slane %v445_v35, 3  ;;  %v482_v42 = vrot.slane %v446_v38, 3 }
  0x9c   :  { %v477_v45 = vadd.f32 %v469_v59, %v463_v36  ;;  %v479_v0 = vadd.f32 %v472_v61, %v465_v57  ;;  %v480_v2 = vadd.f32 %v471_v53, %v466_v58  ;;  %v484_v3 = vrot.slane %v447_v39, 3 }
  0x9d   :  { %v483_v5 = vsel %vm194_vm2, %v481_v63, %v482_v42  ;;  %v485_v6 = vrot.slane %v448_v40, 3  ;;  %v492_v7 = vadd.f32 %v482_v42, %v478_v62  ;;  %v495_v10 = vrot.slane %v445_v35, 4 }
  0x9e   :  { %v491_v60 = vadd.f32 %v483_v5, %v477_v45  ;;  %v496_v26 = vrot.slane %v446_v38, 4  ;;  %v498_v27 = vrot.slane %v447_v39, 4  ;;  %v499_v4 = vrot.slane %v448_v40, 4 }
  0x9f   :  { %v486_v8 = vsel %vm194_vm2, %v484_v3, %v485_v6  ;;  %v494_v9 = vadd.f32 %v485_v6, %v480_v2 }
  0xa0   :  { %v493_v11 = vadd.f32 %v486_v8, %v479_v0  ;;  %v497_v1 = vsel %vm209_vm3, %v495_v10, %v496_v26  ;;  %v500_v12 = vsel %vm209_vm3, %v498_v27, %v499_v4  ;;  %v506_v13 = vadd.f32 %v496_v26, %v492_v7 }
  0xa1   :  { %v505_v14 = vadd.f32 %v497_v1, %v491_v60  ;;  %v508_v15 = vadd.f32 %v499_v4, %v494_v9 }
  0xa2   :  { %v507_v16 = vadd.f32 %v500_v12, %v493_v11  ;;  %v511_v17 = vmul.f32 0.04, %v506_v13 }
  0xa3   :  { %v509_v18 = vmul.f32 0.04, %v505_v14  ;;  %v512_v19 = vmul.f32 0.04, %v508_v15 }
  0xa4   :  { %v510_v22 = vmul.f32 0.04, %v507_v16  ;;  %v585_v23 = vrot.slane %v511_v17, 3 }
  0xa5   :  { %v576_v24 = vrot.slane %v509_v18, 1  ;;  %v579_v25 = vrot.slane %v509_v18, 2  ;;  %v586_v28 = vrot.slane %v512_v19, 2 }
  0xa6   :  { %v573_v29 = vrot.slane %v510_v22, 7  ;;  %v580_v30 = vrot.slane %v510_v22, 1 }
  0xa7   :  { %v577_v31 = vsel %vm520_vm6, %v510_v22, %v576_v24  ;;  %v587_v34 = vsel %vm532_vm4, %v586_v28, %v585_v23 }
  0xa8   :  { %v574_v32 = vsel %vm516_vm5, %v573_v29, %v509_v18  ;;  %v581_v33 = vsel %vm525_vm7, %v580_v30, %v579_v25 }
  0xa9   :  { %v599_v35 = vsel %vm589_vm8, %v574_v32, %v577_v31 }
  0xaa   :  { %v600_v37 = vsel %vm209_vm3, %v599_v35, %v581_v33 }
  0xab   :  { %v601_v38 = vsel %vm179_vm1, %v600_v37, %v587_v34 }
  0xac   :  { %3757 = vmatmul.mubr.msk.f32.gmra.mrb[2].mxu0 %vm613_vm9, %v601_v38 }
  0xad   :  { %4006 = shalt.err (!%p4003_p6)  }
  0xae   :  { %s4007_s22 = scalar_lea.vmem %s117_s2, 8192  ;;  %p4012_p8 = scmp.lt.s32.totalorder %s117_s2, %s117_s2 }
  0xaf   :  { %p4008_p7 = scmp.ne.s32.totalorder %s117_s2, %s4007_s22  ;;  %p4013_p9 = scmp.lt.s32.totalorder %s4007_s22, %s4007_s22 }
  0xb1   :  { %p4014_p10 = por %p4013_p9, %p4012_p8 }
  0xb3   :  { %p4015_p11 = pnand %p4014_p10, %p4008_p7 }
  0xb5   :  { %4018 = shalt.err (!%p4015_p11)  }
  0xb6   :  { %119 = dma.hbm_to_vmem [thread:$0]  %s4719_s5, 8192, %s117_s2, [#allocation5 + $0x1]  ;;  %v4068_v39 = vmov 1983009808   ;;  %v716_v43 = vlaneseq  ;;  %v3637_v47 = vld [vmem:[#allocation9] ss:$0 sm:$0xff] }
  0xb7   :  { %v714_v40 = vunpack.c.l.s4 %v4068_v39 }
  0xb8   :  { %v4461_v46 = vshrl.u32 %v716_v43, 7 }
  0xb9   :  { %v715_v44 = vunpack.c.0.s8 %v714_v40 }
  0xbb   :  { %v4464_v48 = vsub.s32 %v715_v44, %v4461_v46 }
 0x15a   :  { %v3755_v49 = vpop.f32.mrb[0].mxu0 }
 0x15b   :  { %v698_v50 = vadd.f32 %v3755_v49, %v3637_v47  ;;  %v692_v20 = vpop.f32.mrb[1].mxu0 }
 0x15c   :  { %v693_v41 = vadd.f32 %v3637_v47, %v692_v20 }
 0x15d   :  { %736 = vst [vmem:[#allocation4 + $0x8] sm:$0x3] %v698_v50  ;;  %v744_v51 = vrot.slane %v698_v50, %v4464_v48  ;;  %v748_v52 = vcombine.high %v698_v50, %v698_v50 }
 0x15e   :  { %711 = vst [vmem:[#allocation4] sm:$0x3] %v693_v41  ;;  %v719_v53 = vrot.slane %v693_v41, %v4464_v48  ;;  %v723_v54 = vcombine.high %v693_v41, %v693_v41 }
 0x15f   :  { %v745_v55 = vcombine.high %v744_v51, %v744_v51  ;;  %v755_v56 = vrot.slane %v748_v52, %v4464_v48  ;;  %3643 = vst.sshfl [vmem:[#allocation4 + $0xc] sm:$0x3 pattern:$0x76325410] %v748_v52 }
 0x160   :  { %v720_v21 = vcombine.high %v719_v53, %v719_v53  ;;  %v730_v36 = vrot.slane %v723_v54, %v4464_v48  ;;  %3642 = vst.sshfl [vmem:[#allocation4 + $0x4] sm:$0x3 pattern:$0x76325410] %v723_v54 }
 0x161   :  { %747 = vst [vmem:[#allocation4 + $0xa] sm:$0x3] %v745_v55  ;;  %v758_v57 = vcombine.high %v755_v56, %v755_v56 }
 0x162   :  { %722 = vst [vmem:[#allocation4 + $0x2] sm:$0x3] %v720_v21  ;;  %v733_v58 = vcombine.high %v730_v36, %v730_v36 }
 0x163   :  { %760 = vst [vmem:[#allocation4 + $0xe] sm:$0x3] %v758_v57 }
 0x164   :  { %735 = vst [vmem:[#allocation4 + $0x6] sm:$0x3] %v733_v58 }
 0x17f   :  { %v3758_v59 = vpop.f32.mrb[2].mxu0 }
 0x180   :  { %v708_v61 = vadd.f32 %v3758_v59, %v3637_v47  ;;  %v702_v62 = vpop.f32.mrb[3].mxu0 }
 0x181   :  { %v703_v63 = vadd.f32 %v3637_v47, %v702_v62 }
 0x182   :  { %786 = vst [vmem:[#allocation4 + $0x18] sm:$0x3] %v708_v61  ;;  %v794_v42 = vrot.slane %v708_v61, %v4464_v48  ;;  %v798_v45 = vcombine.high %v708_v61, %v708_v61 }
 0x183   :  { %761 = vst [vmem:[#allocation4 + $0x10] sm:$0x3] %v703_v63  ;;  %v769_v0 = vrot.slane %v703_v63, %v4464_v48  ;;  %v773_v2 = vcombine.high %v703_v63, %v703_v63 }
 0x184   :  { %v795_v3 = vcombine.high %v794_v42, %v794_v42  ;;  %v805_v5 = vrot.slane %v798_v45, %v4464_v48  ;;  %3645 = vst.sshfl [vmem:[#allocation4 + $0x1c] sm:$0x3 pattern:$0x76325410] %v798_v45 }
 0x185   :  { %v770_v6 = vcombine.high %v769_v0, %v769_v0  ;;  %v780_v7 = vrot.slane %v773_v2, %v4464_v48  ;;  %3644 = vst.sshfl [vmem:[#allocation4 + $0x14] sm:$0x3 pattern:$0x76325410] %v773_v2 }
 0x186   :  { %797 = vst [vmem:[#allocation4 + $0x1a] sm:$0x3] %v795_v3  ;;  %v808_v10 = vcombine.high %v805_v5, %v805_v5 }
 0x187   :  { %772 = vst [vmem:[#allocation4 + $0x12] sm:$0x3] %v770_v6  ;;  %v783_v60 = vcombine.high %v780_v7, %v780_v7 }
 0x188   :  { %810 = vst [vmem:[#allocation4 + $0x1e] sm:$0x3] %v808_v10 }
 0x189   :  { %785 = vst [vmem:[#allocation4 + $0x16] sm:$0x3] %v783_v60 }
 0x18a   :  { %4047 = dma.done.wait [#allocation5], 131072 }
 0x18b   :  { %4048 = vsyncadd [#allocation5], 4294836224  ;;  %v924_v26 = vld [vmem:[#allocation2 + $0x8] sm:$0xff]  ;;  %v926_v27 = vld [vmem:[#allocation2 + $0x18] sm:$0xff] }
 0x18c   :  { %v923_v4 = vld [vmem:[#allocation2] sm:$0xff]  ;;  %1989 = vmatprep.subr.bf16.mxu1 %v924_v26  ;;  %2317 = vmatprep.subr.bf16.mxu0 %v926_v27  ;;  %v925_v8 = vld [vmem:[#allocation2 + $0x10] sm:$0xff]  ;;  %v932_v9 = vld [vmem:[#allocation2 + $0x48] sm:$0xff] }
 0x18d   :  { %v934_v11 = vld [vmem:[#allocation2 + $0x58] sm:$0xff]  ;;  %1990 = vmatpush1.bf16.msra.mxu1 %v923_v4  ;;  %2318 = vmatpush1.bf16.msra.mxu0 %v925_v8  ;;  %v931_v1 = vld [vmem:[#allocation2 + $0x40] sm:$0xff]  ;;  %v933_v12 = vld [vmem:[#allocation2 + $0x50] sm:$0xff] }
 0x18e   :  { %1991 = vmatprep.subr.bf16.mxu1 %v932_v9  ;;  %2319 = vmatprep.subr.bf16.mxu0 %v934_v11  ;;  %v940_v13 = vld [vmem:[#allocation2 + $0x88] sm:$0xff]  ;;  %v942_v14 = vld [vmem:[#allocation2 + $0x98] sm:$0xff]  ;;  %v939_v15 = vld [vmem:[#allocation2 + $0x80] sm:$0xff] }
 0x18f   :  { %v941_v16 = vld [vmem:[#allocation2 + $0x90] sm:$0xff]  ;;  %v948_v17 = vld [vmem:[#allocation2 + $0xc8] sm:$0xff]  ;;  %v950_v18 = vld [vmem:[#allocation2 + $0xd8] sm:$0xff] }
 0x190   :  { %v947_v19 = vld [vmem:[#allocation2 + $0xc0] sm:$0xff]  ;;  %v949_v22 = vld [vmem:[#allocation2 + $0xd0] sm:$0xff]  ;;  %v956_v23 = vld [vmem:[#allocation2 + $0x108] sm:$0xff] }
 0x191   :  { %1992 = vmatpush1.bf16.msra.mxu1 %v931_v1  ;;  %2320 = vmatpush1.bf16.msra.mxu0 %v933_v12  ;;  %v958_v24 = vld [vmem:[#allocation2 + $0x118] sm:$0xff]  ;;  %v955_v25 = vld [vmem:[#allocation2 + $0x100] sm:$0xff]  ;;  %v957_v28 = vld [vmem:[#allocation2 + $0x110] sm:$0xff] }
 0x192   :  { %1993 = vmatprep.subr.bf16.mxu1 %v940_v13  ;;  %2321 = vmatprep.subr.bf16.mxu0 %v942_v14  ;;  %v964_v29 = vld [vmem:[#allocation2 + $0x148] sm:$0xff]  ;;  %v966_v30 = vld [vmem:[#allocation2 + $0x158] sm:$0xff]  ;;  %v963_v31 = vld [vmem:[#allocation2 + $0x140] sm:$0xff] }
 0x193   :  { %v965_v32 = vld [vmem:[#allocation2 + $0x150] sm:$0xff]  ;;  %v972_v33 = vld [vmem:[#allocation2 + $0x188] sm:$0xff]  ;;  %v974_v34 = vld [vmem:[#allocation2 + $0x198] sm:$0xff] }
 0x194   :  { %v4474_v35 = vld [vmem:[#allocation4] sm:$0xff]  ;;  %v973_v39 = vld [vmem:[#allocation2 + $0x190] sm:$0xff]  ;;  %v980_v40 = vld [vmem:[#allocation2 + $0x1c8] sm:$0xff] }
 0x195   :  { %1994 = vmatpush1.bf16.msra.mxu1 %v939_v15  ;;  %2322 = vmatpush1.bf16.msra.mxu0 %v941_v16  ;;  %v4478_v37 = vrot.slane %v4474_v35, %v4464_v48  ;;  %v971_v38 = vld [vmem:[#allocation2 + $0x180] sm:$0xff]  ;;  %v982_v43 = vld [vmem:[#allocation2 + $0x1d8] sm:$0xff]  ;;  %v981_v50 = vld [vmem:[#allocation2 + $0x1d0] sm:$0xff]  ;;  %v823_v26 = vcombine.high %v4474_v35, %v4474_v35 }
 0x196   :  { %1995 = vmatprep.subr.bf16.mxu1 %v948_v17  ;;  %2323 = vmatprep.subr.bf16.mxu0 %v950_v18  ;;  %v979_v49 = vld [vmem:[#allocation2 + $0x1c0] sm:$0xff]  ;;  %v988_v20 = vld [vmem:[#allocation2 + $0x208] sm:$0xff]  ;;  %v990_v41 = vld [vmem:[#allocation2 + $0x218] sm:$0xff] }
 0x197   :  { %v838_v44 = vcombine.high %v4478_v37, %v4478_v37  ;;  %v987_v51 = vld [vmem:[#allocation2 + $0x200] sm:$0xff]  ;;  %v989_v52 = vld [vmem:[#allocation2 + $0x210] sm:$0xff]  ;;  %v996_v53 = vld [vmem:[#allocation2 + $0x248] sm:$0xff]  ;;  %v4489_v11 = vrot.slane %v823_v26, %v4464_v48  ;;  %v4495_v16 = vpack.c.bf16 %v4478_v37, %v4478_v37 }
 0x198   :  { %v998_v54 = vld [vmem:[#allocation2 + $0x258] sm:$0xff]  ;;  %v995_v55 = vld [vmem:[#allocation2 + $0x240] sm:$0xff]  ;;  %v997_v56 = vld [vmem:[#allocation2 + $0x250] sm:$0xff] }
 0x199   :  { %1996 = vmatpush1.bf16.msra.mxu1 %v947_v19  ;;  %2324 = vmatpush1.bf16.msra.mxu0 %v949_v22  ;;  %v4482_v47 = vpack.c.bf16 %v838_v44, %v838_v44  ;;  %v1004_v21 = vld [vmem:[#allocation2 + $0x288] sm:$0xff]  ;;  %v1006_v36 = vld [vmem:[#allocation2 + $0x298] sm:$0xff]  ;;  %v1003_v57 = vld [vmem:[#allocation2 + $0x280] sm:$0xff]  ;;  %v839_v15 = vcombine.high %v4489_v11, %v4489_v11 }
 0x19a   :  { %1997 = vmatprep.subr.bf16.mxu1 %v956_v23  ;;  %2325 = vmatprep.subr.bf16.mxu0 %v958_v24  ;;  %v1005_v58 = vld [vmem:[#allocation2 + $0x290] sm:$0xff]  ;;  %v1012_v59 = vld [vmem:[#allocation2 + $0x2c8] sm:$0xff]  ;;  %v1014_v61 = vld [vmem:[#allocation2 + $0x2d8] sm:$0xff] }
 0x19b   :  { %2021 = vmatprep.mubr.bf16.mxu1 %v4482_v47  ;;  %2349 = vmatprep.mubr.bf16.mxu0 %v4482_v47  ;;  %v1011_v62 = vld [vmem:[#allocation2 + $0x2c0] sm:$0xff]  ;;  %v1013_v63 = vld [vmem:[#allocation2 + $0x2d0] sm:$0xff]  ;;  %v1020_v42 = vld [vmem:[#allocation2 + $0x308] sm:$0xff]  ;;  %v4497_v23 = vpack.c.bf16 %v839_v15, %v839_v15 }
 0x19c   :  { %v1022_v45 = vld [vmem:[#allocation2 + $0x318] sm:$0xff]  ;;  %v1019_v0 = vld [vmem:[#allocation2 + $0x300] sm:$0xff]  ;;  %v1021_v2 = vld [vmem:[#allocation2 + $0x310] sm:$0xff] }
 0x19d   :  { %1998 = vmatpush1.bf16.msra.mxu1 %v955_v25  ;;  %2326 = vmatpush1.bf16.msra.mxu0 %v957_v28  ;;  %v1028_v3 = vld [vmem:[#allocation2 + $0x348] sm:$0xff]  ;;  %v1030_v5 = vld [vmem:[#allocation2 + $0x358] sm:$0xff]  ;;  %v1027_v6 = vld [vmem:[#allocation2 + $0x340] sm:$0xff] }
 0x19e   :  { %1999 = vmatprep.subr.bf16.mxu1 %v964_v29  ;;  %2327 = vmatprep.subr.bf16.mxu0 %v966_v30  ;;  %v1029_v7 = vld [vmem:[#allocation2 + $0x350] sm:$0xff]  ;;  %v1036_v10 = vld [vmem:[#allocation2 + $0x388] sm:$0xff]  ;;  %v1038_v60 = vld [vmem:[#allocation2 + $0x398] sm:$0xff] }
 0x19f   :  { %v1035_v27 = vld [vmem:[#allocation2 + $0x380] sm:$0xff]  ;;  %v1037_v4 = vld [vmem:[#allocation2 + $0x390] sm:$0xff]  ;;  %v1044_v8 = vld [vmem:[#allocation2 + $0x3c8] sm:$0xff] }
 0x1a0   :  { %v1046_v9 = vld [vmem:[#allocation2 + $0x3d8] sm:$0xff]  ;;  %v1043_v1 = vld [vmem:[#allocation2 + $0x3c0] sm:$0xff]  ;;  %v1045_v12 = vld [vmem:[#allocation2 + $0x3d0] sm:$0xff] }
 0x1a1   :  { %2000 = vmatpush1.bf16.msra.mxu1 %v963_v31  ;;  %2328 = vmatpush1.bf16.msra.mxu0 %v965_v32  ;;  %v1052_v13 = vld [vmem:[#allocation2 + $0x408] sm:$0xff]  ;;  %v1054_v14 = vld [vmem:[#allocation2 + $0x418] sm:$0xff]  ;;  %v1051_v17 = vld [vmem:[#allocation2 + $0x400] sm:$0xff] }
 0x1a2   :  { %2001 = vmatprep.subr.bf16.mxu1 %v972_v33  ;;  %2329 = vmatprep.subr.bf16.mxu0 %v974_v34  ;;  %v1053_v18 = vld [vmem:[#allocation2 + $0x410] sm:$0xff]  ;;  %v1060_v19 = vld [vmem:[#allocation2 + $0x448] sm:$0xff]  ;;  %v1062_v22 = vld [vmem:[#allocation2 + $0x458] sm:$0xff] }
 0x1a3   :  { %v1059_v24 = vld [vmem:[#allocation2 + $0x440] sm:$0xff]  ;;  %v1061_v25 = vld [vmem:[#allocation2 + $0x450] sm:$0xff]  ;;  %v1068_v28 = vld [vmem:[#allocation2 + $0x488] sm:$0xff] }
 0x1a4   :  { %v1070_v29 = vld [vmem:[#allocation2 + $0x498] sm:$0xff]  ;;  %v1067_v30 = vld [vmem:[#allocation2 + $0x480] sm:$0xff]  ;;  %v1069_v31 = vld [vmem:[#allocation2 + $0x490] sm:$0xff] }
 0x1a5   :  { %2002 = vmatpush1.bf16.msra.mxu1 %v971_v38  ;;  %2330 = vmatpush1.bf16.msra.mxu0 %v973_v39  ;;  %v1076_v32 = vld [vmem:[#allocation2 + $0x4c8] sm:$0xff]  ;;  %v1078_v33 = vld [vmem:[#allocation2 + $0x4d8] sm:$0xff]  ;;  %v1075_v34 = vld [vmem:[#allocation2 + $0x4c0] sm:$0xff] }
 0x1a6   :  { %2003 = vmatprep.subr.bf16.mxu1 %v980_v40  ;;  %2331 = vmatprep.subr.bf16.mxu0 %v982_v43  ;;  %v1077_v35 = vld [vmem:[#allocation2 + $0x4d0] sm:$0xff]  ;;  %v1084_v37 = vld [vmem:[#allocation2 + $0x508] sm:$0xff]  ;;  %v1086_v38 = vld [vmem:[#allocation2 + $0x518] sm:$0xff] }
 0x1a7   :  { %v1083_v39 = vld [vmem:[#allocation2 + $0x500] sm:$0xff]  ;;  %v1085_v40 = vld [vmem:[#allocation2 + $0x510] sm:$0xff]  ;;  %v1092_v43 = vld [vmem:[#allocation2 + $0x548] sm:$0xff] }
 0x1a8   :  { %v1094_v44 = vld [vmem:[#allocation2 + $0x558] sm:$0xff]  ;;  %v1147_v26 = vld [vmem:[#allocation2 + $0x700] sm:$0xff] }
 0x1a9   :  { %2004 = vmatpush1.bf16.msra.mxu1 %v979_v49  ;;  %2332 = vmatpush1.bf16.msra.mxu0 %v981_v50  ;;  %v1091_v49 = vld [vmem:[#allocation2 + $0x540] sm:$0xff]  ;;  %v1093_v50 = vld [vmem:[#allocation2 + $0x550] sm:$0xff] }
 0x1aa   :  { %2005 = vmatprep.subr.bf16.mxu1 %v988_v20  ;;  %2333 = vmatprep.subr.bf16.mxu0 %v990_v41  ;;  %v1100_v20 = vld [vmem:[#allocation2 + $0x588] sm:$0xff]  ;;  %v1102_v41 = vld [vmem:[#allocation2 + $0x598] sm:$0xff]  ;;  %v1163_v15 = vld [vmem:[#allocation2 + $0x780] sm:$0xff] }
 0x1ad   :  { %2006 = vmatpush1.bf16.msra.mxu1 %v987_v51  ;;  %2334 = vmatpush1.bf16.msra.mxu0 %v989_v52  ;;  %v1099_v51 = vld [vmem:[#allocation2 + $0x580] sm:$0xff]  ;;  %v1101_v52 = vld [vmem:[#allocation2 + $0x590] sm:$0xff] }
 0x1ae   :  { %2007 = vmatprep.subr.bf16.mxu1 %v996_v53  ;;  %2335 = vmatprep.subr.bf16.mxu0 %v998_v54  ;;  %v1108_v53 = vld [vmem:[#allocation2 + $0x5c8] sm:$0xff]  ;;  %v1110_v54 = vld [vmem:[#allocation2 + $0x5d8] sm:$0xff] }
 0x1b1   :  { %2008 = vmatpush1.bf16.msra.mxu1 %v995_v55  ;;  %2336 = vmatpush1.bf16.msra.mxu0 %v997_v56  ;;  %v1107_v55 = vld [vmem:[#allocation2 + $0x5c0] sm:$0xff]  ;;  %v1109_v56 = vld [vmem:[#allocation2 + $0x5d0] sm:$0xff] }
 0x1b2   :  { %2009 = vmatprep.subr.bf16.mxu1 %v1004_v21  ;;  %2337 = vmatprep.subr.bf16.mxu0 %v1006_v36  ;;  %v1116_v21 = vld [vmem:[#allocation2 + $0x608] sm:$0xff]  ;;  %v1118_v36 = vld [vmem:[#allocation2 + $0x618] sm:$0xff] }
 0x1b5   :  { %2010 = vmatpush1.bf16.msra.mxu1 %v1003_v57  ;;  %2338 = vmatpush1.bf16.msra.mxu0 %v1005_v58  ;;  %v1115_v57 = vld [vmem:[#allocation2 + $0x600] sm:$0xff]  ;;  %v1117_v58 = vld [vmem:[#allocation2 + $0x610] sm:$0xff] }
 0x1b6   :  { %2011 = vmatprep.subr.bf16.mxu1 %v1012_v59  ;;  %2339 = vmatprep.subr.bf16.mxu0 %v1014_v61  ;;  %v1124_v59 = vld [vmem:[#allocation2 + $0x648] sm:$0xff]  ;;  %v1126_v61 = vld [vmem:[#allocation2 + $0x658] sm:$0xff] }
 0x1b9   :  { %2012 = vmatpush1.bf16.msra.mxu1 %v1011_v62  ;;  %2340 = vmatpush1.bf16.msra.mxu0 %v1013_v63  ;;  %v1123_v62 = vld [vmem:[#allocation2 + $0x640] sm:$0xff]  ;;  %v1125_v63 = vld [vmem:[#allocation2 + $0x650] sm:$0xff] }
 0x1ba   :  { %2013 = vmatprep.subr.bf16.mxu1 %v1020_v42  ;;  %2341 = vmatprep.subr.bf16.mxu0 %v1022_v45  ;;  %v1132_v42 = vld [vmem:[#allocation2 + $0x688] sm:$0xff]  ;;  %v1134_v45 = vld [vmem:[#allocation2 + $0x698] sm:$0xff] }
 0x1bd   :  { %2014 = vmatpush1.bf16.msra.mxu1 %v1019_v0  ;;  %2342 = vmatpush1.bf16.msra.mxu0 %v1021_v2  ;;  %v1131_v0 = vld [vmem:[#allocation2 + $0x680] sm:$0xff]  ;;  %v1133_v2 = vld [vmem:[#allocation2 + $0x690] sm:$0xff] }
 0x1be   :  { %2015 = vmatprep.subr.bf16.mxu1 %v1028_v3  ;;  %2343 = vmatprep.subr.bf16.mxu0 %v1030_v5  ;;  %v1140_v3 = vld [vmem:[#allocation2 + $0x6c8] sm:$0xff]  ;;  %v1142_v5 = vld [vmem:[#allocation2 + $0x6d8] sm:$0xff] }
 0x1c1   :  { %2016 = vmatpush1.bf16.msra.mxu1 %v1027_v6  ;;  %2344 = vmatpush1.bf16.msra.mxu0 %v1029_v7  ;;  %v1139_v6 = vld [vmem:[#allocation2 + $0x6c0] sm:$0xff]  ;;  %v1141_v7 = vld [vmem:[#allocation2 + $0x6d0] sm:$0xff] }
 0x1c2   :  { %2017 = vmatprep.subr.bf16.mxu1 %v1036_v10  ;;  %2345 = vmatprep.subr.bf16.mxu0 %v1038_v60  ;;  %v1148_v10 = vld [vmem:[#allocation2 + $0x708] sm:$0xff]  ;;  %v1150_v60 = vld [vmem:[#allocation2 + $0x718] sm:$0xff] }
 0x1c5   :  { %2018 = vmatpush1.bf16.msra.mxu1 %v1035_v27  ;;  %2346 = vmatpush1.bf16.msra.mxu0 %v1037_v4  ;;  %v1149_v27 = vld [vmem:[#allocation2 + $0x710] sm:$0xff]  ;;  %v1156_v4 = vld [vmem:[#allocation2 + $0x748] sm:$0xff] }
 0x1c6   :  { %2019 = vmatprep.subr.bf16.mxu1 %v1044_v8  ;;  %2347 = vmatprep.subr.bf16.mxu0 %v1046_v9  ;;  %v1158_v8 = vld [vmem:[#allocation2 + $0x758] sm:$0xff]  ;;  %v1155_v9 = vld [vmem:[#allocation2 + $0x740] sm:$0xff] }
 0x1c9   :  { %2020 = vmatpush1.bf16.msra.mxu1 %v1043_v1  ;;  %2348 = vmatpush1.bf16.msra.mxu0 %v1045_v12  ;;  %v1157_v1 = vld [vmem:[#allocation2 + $0x750] sm:$0xff]  ;;  %v1164_v12 = vld [vmem:[#allocation2 + $0x788] sm:$0xff] }
 0x1ca   :  { %2030 = vmatprep.subr.bf16.mxu1 %v1052_v13  ;;  %2358 = vmatprep.subr.bf16.mxu0 %v1054_v14  ;;  %v1166_v13 = vld [vmem:[#allocation2 + $0x798] sm:$0xff]  ;;  %v4503_v14 = vld [vmem:[#allocation4 + $0x8] sm:$0xff] }
 0x1cc   :  { %2022 = vmatmul.mubr.bf16.vlgmr.msra.gmra.mrb[0].mxu1 %v4495_v16  ;;  %2350 = vmatmul.mubr.bf16.vlgmr.msra.gmra.mrb[4].mxu0 %v4495_v16 }
 0x1cd   :  { %2031 = vmatpush1.bf16.msra.mxu1 %v1051_v17  ;;  %2359 = vmatpush1.bf16.msra.mxu0 %v1053_v18  ;;  %v1165_v17 = vld [vmem:[#allocation2 + $0x790] sm:$0xff]  ;;  %v1172_v18 = vld [vmem:[#allocation2 + $0x7c8] sm:$0xff] }
 0x1ce   :  { %2032 = vmatprep.subr.bf16.mxu1 %v1060_v19  ;;  %2360 = vmatprep.subr.bf16.mxu0 %v1062_v22  ;;  %v1174_v19 = vld [vmem:[#allocation2 + $0x7d8] sm:$0xff]  ;;  %v4507_v22 = vrot.slane %v4503_v14, %v4464_v48 }
 0x1cf   :  { %2062 = vmatprep.mubr.bf16.mxu1 %v4497_v23  ;;  %2390 = vmatprep.mubr.bf16.mxu0 %v4497_v23 }
 0x1d1   :  { %2033 = vmatpush1.bf16.msra.mxu1 %v1059_v24  ;;  %2361 = vmatpush1.bf16.msra.mxu0 %v1061_v25  ;;  %v1171_v24 = vld [vmem:[#allocation2 + $0x7c0] sm:$0xff]  ;;  %v1173_v25 = vld [vmem:[#allocation2 + $0x7d0] sm:$0xff] }
 0x1d2   :  { %2034 = vmatprep.subr.bf16.mxu1 %v1068_v28  ;;  %2362 = vmatprep.subr.bf16.mxu0 %v1070_v29  ;;  %v1180_v28 = vld [vmem:[#allocation2 + $0x808] sm:$0xff]  ;;  %v1182_v29 = vld [vmem:[#allocation2 + $0x818] sm:$0xff] }
 0x1d5   :  { %2035 = vmatpush1.bf16.msra.mxu1 %v1067_v30  ;;  %2363 = vmatpush1.bf16.msra.mxu0 %v1069_v31  ;;  %v855_v30 = vcombine.high %v4507_v22, %v4507_v22  ;;  %v4513_v31 = vpack.c.bf16 %v4489_v11, %v4489_v11  ;;  %v1187_v11 = vld [vmem:[#allocation2 + $0x840] sm:$0xff] }
 0x1d6   :  { %2036 = vmatprep.subr.bf16.mxu1 %v1076_v32  ;;  %2364 = vmatprep.subr.bf16.mxu0 %v1078_v33  ;;  %v1179_v32 = vld [vmem:[#allocation2 + $0x800] sm:$0xff]  ;;  %v1181_v33 = vld [vmem:[#allocation2 + $0x810] sm:$0xff] }
 0x1d9   :  { %2037 = vmatpush1.bf16.msra.mxu1 %v1075_v34  ;;  %2365 = vmatpush1.bf16.msra.mxu0 %v1077_v35  ;;  %v1188_v34 = vld [vmem:[#allocation2 + $0x848] sm:$0xff]  ;;  %v1190_v35 = vld [vmem:[#allocation2 + $0x858] sm:$0xff] }
 0x1da   :  { %2038 = vmatprep.subr.bf16.mxu1 %v1084_v37  ;;  %2366 = vmatprep.subr.bf16.mxu0 %v1086_v38  ;;  %v4515_v37 = vpack.c.bf16 %v855_v30, %v855_v30  ;;  %v1189_v38 = vld [vmem:[#allocation2 + $0x850] sm:$0xff]  ;;  %v1292_v30 = vld [vmem:[#allocation2 + $0xb88] sm:$0xff] }
 0x1dd   :  { %2039 = vmatpush1.bf16.msra.mxu1 %v1083_v39  ;;  %2367 = vmatpush1.bf16.msra.mxu0 %v1085_v40  ;;  %v1196_v39 = vld [vmem:[#allocation2 + $0x888] sm:$0xff]  ;;  %v1198_v40 = vld [vmem:[#allocation2 + $0x898] sm:$0xff] }
 0x1de   :  { %2040 = vmatprep.subr.bf16.mxu1 %v1092_v43  ;;  %2368 = vmatprep.subr.bf16.mxu0 %v1094_v44  ;;  %v1195_v43 = vld [vmem:[#allocation2 + $0x880] sm:$0xff]  ;;  %v1197_v44 = vld [vmem:[#allocation2 + $0x890] sm:$0xff] }
 0x1e1   :  { %2041 = vmatpush1.bf16.msra.mxu1 %v1091_v49  ;;  %2369 = vmatpush1.bf16.msra.mxu0 %v1093_v50  ;;  %v1204_v49 = vld [vmem:[#allocation2 + $0x8c8] sm:$0xff]  ;;  %v1206_v50 = vld [vmem:[#allocation2 + $0x8d8] sm:$0xff] }
 0x1e2   :  { %2042 = vmatprep.subr.bf16.mxu1 %v1100_v20  ;;  %2370 = vmatprep.subr.bf16.mxu0 %v1102_v41  ;;  %v1203_v20 = vld [vmem:[#allocation2 + $0x8c0] sm:$0xff]  ;;  %v1205_v41 = vld [vmem:[#allocation2 + $0x8d0] sm:$0xff] }
 0x1e5   :  { %2043 = vmatpush1.bf16.msra.mxu1 %v1099_v51  ;;  %2371 = vmatpush1.bf16.msra.mxu0 %v1101_v52  ;;  %v1212_v51 = vld [vmem:[#allocation2 + $0x908] sm:$0xff]  ;;  %v1214_v52 = vld [vmem:[#allocation2 + $0x918] sm:$0xff] }
 0x1e6   :  { %2044 = vmatprep.subr.bf16.mxu1 %v1108_v53  ;;  %2372 = vmatprep.subr.bf16.mxu0 %v1110_v54  ;;  %v1211_v53 = vld [vmem:[#allocation2 + $0x900] sm:$0xff]  ;;  %v1213_v54 = vld [vmem:[#allocation2 + $0x910] sm:$0xff] }
 0x1e9   :  { %2045 = vmatpush1.bf16.msra.mxu1 %v1107_v55  ;;  %2373 = vmatpush1.bf16.msra.mxu0 %v1109_v56  ;;  %v1220_v55 = vld [vmem:[#allocation2 + $0x948] sm:$0xff]  ;;  %v1222_v56 = vld [vmem:[#allocation2 + $0x958] sm:$0xff] }
 0x1ea   :  { %2046 = vmatprep.subr.bf16.mxu1 %v1116_v21  ;;  %2374 = vmatprep.subr.bf16.mxu0 %v1118_v36  ;;  %v1219_v21 = vld [vmem:[#allocation2 + $0x940] sm:$0xff]  ;;  %v1221_v36 = vld [vmem:[#allocation2 + $0x950] sm:$0xff] }
 0x1ed   :  { %2047 = vmatpush1.bf16.msra.mxu1 %v1115_v57  ;;  %2375 = vmatpush1.bf16.msra.mxu0 %v1117_v58  ;;  %v1228_v57 = vld [vmem:[#allocation2 + $0x988] sm:$0xff]  ;;  %v1230_v58 = vld [vmem:[#allocation2 + $0x998] sm:$0xff] }
 0x1ee   :  { %2048 = vmatprep.subr.bf16.mxu1 %v1124_v59  ;;  %2376 = vmatprep.subr.bf16.mxu0 %v1126_v61  ;;  %v1227_v59 = vld [vmem:[#allocation2 + $0x980] sm:$0xff]  ;;  %v1229_v61 = vld [vmem:[#allocation2 + $0x990] sm:$0xff] }
 0x1f1   :  { %2049 = vmatpush1.bf16.msra.mxu1 %v1123_v62  ;;  %2377 = vmatpush1.bf16.msra.mxu0 %v1125_v63  ;;  %v1236_v62 = vld [vmem:[#allocation2 + $0x9c8] sm:$0xff]  ;;  %v1238_v63 = vld [vmem:[#allocation2 + $0x9d8] sm:$0xff] }
 0x1f2   :  { %2050 = vmatprep.subr.bf16.mxu1 %v1132_v42  ;;  %2378 = vmatprep.subr.bf16.mxu0 %v1134_v45  ;;  %v1235_v42 = vld [vmem:[#allocation2 + $0x9c0] sm:$0xff]  ;;  %v1237_v45 = vld [vmem:[#allocation2 + $0x9d0] sm:$0xff] }
 0x1f5   :  { %2051 = vmatpush1.bf16.msra.mxu1 %v1131_v0  ;;  %2379 = vmatpush1.bf16.msra.mxu0 %v1133_v2  ;;  %v1244_v0 = vld [vmem:[#allocation2 + $0xa08] sm:$0xff]  ;;  %v1246_v2 = vld [vmem:[#allocation2 + $0xa18] sm:$0xff] }
 0x1f6   :  { %2052 = vmatprep.subr.bf16.mxu1 %v1140_v3  ;;  %2380 = vmatprep.subr.bf16.mxu0 %v1142_v5  ;;  %v1243_v3 = vld [vmem:[#allocation2 + $0xa00] sm:$0xff]  ;;  %v1245_v5 = vld [vmem:[#allocation2 + $0xa10] sm:$0xff] }
 0x1f9   :  { %2053 = vmatpush1.bf16.msra.mxu1 %v1139_v6  ;;  %2381 = vmatpush1.bf16.msra.mxu0 %v1141_v7  ;;  %v1252_v6 = vld [vmem:[#allocation2 + $0xa48] sm:$0xff]  ;;  %v1254_v7 = vld [vmem:[#allocation2 + $0xa58] sm:$0xff] }
 0x1fa   :  { %2054 = vmatprep.subr.bf16.mxu1 %v1148_v10  ;;  %2382 = vmatprep.subr.bf16.mxu0 %v1150_v60  ;;  %v1251_v10 = vld [vmem:[#allocation2 + $0xa40] sm:$0xff]  ;;  %v1253_v60 = vld [vmem:[#allocation2 + $0xa50] sm:$0xff] }
 0x1fd   :  { %2055 = vmatpush1.bf16.msra.mxu1 %v1147_v26  ;;  %2383 = vmatpush1.bf16.msra.mxu0 %v1149_v27  ;;  %v1260_v26 = vld [vmem:[#allocation2 + $0xa88] sm:$0xff]  ;;  %v1262_v27 = vld [vmem:[#allocation2 + $0xa98] sm:$0xff] }
 0x1fe   :  { %2056 = vmatprep.subr.bf16.mxu1 %v1156_v4  ;;  %2384 = vmatprep.subr.bf16.mxu0 %v1158_v8  ;;  %v1259_v4 = vld [vmem:[#allocation2 + $0xa80] sm:$0xff]  ;;  %v1261_v8 = vld [vmem:[#allocation2 + $0xa90] sm:$0xff] }
 0x201   :  { %2057 = vmatpush1.bf16.msra.mxu1 %v1155_v9  ;;  %2385 = vmatpush1.bf16.msra.mxu0 %v1157_v1  ;;  %v1268_v9 = vld [vmem:[#allocation2 + $0xac8] sm:$0xff]  ;;  %v1270_v1 = vld [vmem:[#allocation2 + $0xad8] sm:$0xff] }
 0x202   :  { %2058 = vmatprep.subr.bf16.mxu1 %v1164_v12  ;;  %2386 = vmatprep.subr.bf16.mxu0 %v1166_v13  ;;  %v1267_v12 = vld [vmem:[#allocation2 + $0xac0] sm:$0xff]  ;;  %v1269_v13 = vld [vmem:[#allocation2 + $0xad0] sm:$0xff] }
 0x205   :  { %2059 = vmatpush1.bf16.msra.mxu1 %v1163_v15  ;;  %2387 = vmatpush1.bf16.msra.mxu0 %v1165_v17  ;;  %v1276_v15 = vld [vmem:[#allocation2 + $0xb08] sm:$0xff]  ;;  %v1278_v17 = vld [vmem:[#allocation2 + $0xb18] sm:$0xff] }
 0x206   :  { %2060 = vmatprep.subr.bf16.mxu1 %v1172_v18  ;;  %2388 = vmatprep.subr.bf16.mxu0 %v1174_v19  ;;  %v1275_v18 = vld [vmem:[#allocation2 + $0xb00] sm:$0xff]  ;;  %v1277_v19 = vld [vmem:[#allocation2 + $0xb10] sm:$0xff] }
 0x209   :  { %2061 = vmatpush1.bf16.msra.mxu1 %v1171_v24  ;;  %2389 = vmatpush1.bf16.msra.mxu0 %v1173_v25  ;;  %v1284_v24 = vld [vmem:[#allocation2 + $0xb48] sm:$0xff]  ;;  %v1286_v25 = vld [vmem:[#allocation2 + $0xb58] sm:$0xff] }
 0x20a   :  { %2071 = vmatprep.subr.bf16.mxu1 %v1180_v28  ;;  %2399 = vmatprep.subr.bf16.mxu0 %v1182_v29  ;;  %v1283_v28 = vld [vmem:[#allocation2 + $0xb40] sm:$0xff]  ;;  %v1285_v29 = vld [vmem:[#allocation2 + $0xb50] sm:$0xff] }
 0x20c   :  { %2063 = vmatmul.mubr.bf16.vlgmr.msra.gmra.mrb[0].mxu1 %v4513_v31  ;;  %2391 = vmatmul.mubr.bf16.vlgmr.msra.gmra.mrb[4].mxu0 %v4513_v31 }
 0x20d   :  { %2072 = vmatpush1.bf16.msra.mxu1 %v1179_v32  ;;  %2400 = vmatpush1.bf16.msra.mxu0 %v1181_v33  ;;  %v1294_v32 = vld [vmem:[#allocation2 + $0xb98] sm:$0xff]  ;;  %v840_v33 = vcombine.high %v4503_v14, %v4503_v14 }
 0x20e   :  { %2073 = vmatprep.subr.bf16.mxu1 %v1188_v34  ;;  %2401 = vmatprep.subr.bf16.mxu0 %v1190_v35  ;;  %v1291_v34 = vld [vmem:[#allocation2 + $0xb80] sm:$0xff]  ;;  %v1293_v35 = vld [vmem:[#allocation2 + $0xb90] sm:$0xff] }
 0x20f   :  { %2103 = vmatprep.mubr.bf16.mxu1 %v4515_v37  ;;  %2431 = vmatprep.mubr.bf16.mxu0 %v4515_v37 }
 0x211   :  { %2074 = vmatpush1.bf16.msra.mxu1 %v1187_v11  ;;  %2402 = vmatpush1.bf16.msra.mxu0 %v1189_v38  ;;  %v1300_v11 = vld [vmem:[#allocation2 + $0xbc8] sm:$0xff]  ;;  %v1302_v38 = vld [vmem:[#allocation2 + $0xbd8] sm:$0xff] }
 0x212   :  { %2075 = vmatprep.subr.bf16.mxu1 %v1196_v39  ;;  %2403 = vmatprep.subr.bf16.mxu0 %v1198_v40  ;;  %v4524_v39 = vrot.slane %v840_v33, %v4464_v48  ;;  %v1299_v40 = vld [vmem:[#allocation2 + $0xbc0] sm:$0xff] }
 0x213   :  { %v1395_v33 = vld [vmem:[#allocation2 + $0xec0] sm:$0xff] }
 0x214   :  { %v856_v14 = vcombine.high %v4524_v39, %v4524_v39 }
 0x215   :  { %2076 = vmatpush1.bf16.msra.mxu1 %v1195_v43  ;;  %2404 = vmatpush1.bf16.msra.mxu0 %v1197_v44  ;;  %v1301_v43 = vld [vmem:[#allocation2 + $0xbd0] sm:$0xff]  ;;  %v1308_v44 = vld [vmem:[#allocation2 + $0xc08] sm:$0xff] }
 0x216   :  { %2077 = vmatprep.subr.bf16.mxu1 %v1204_v49  ;;  %2405 = vmatprep.subr.bf16.mxu0 %v1206_v50  ;;  %v1310_v49 = vld [vmem:[#allocation2 + $0xc18] sm:$0xff]  ;;  %v4530_v50 = vpack.c.bf16 %v4507_v22, %v4507_v22  ;;  %v1315_v22 = vld [vmem:[#allocation2 + $0xc40] sm:$0xff] }
 0x219   :  { %2078 = vmatpush1.bf16.msra.mxu1 %v1203_v20  ;;  %2406 = vmatpush1.bf16.msra.mxu0 %v1205_v41  ;;  %v1307_v20 = vld [vmem:[#allocation2 + $0xc00] sm:$0xff]  ;;  %v1309_v41 = vld [vmem:[#allocation2 + $0xc10] sm:$0xff] }
 0x21a   :  { %2079 = vmatprep.subr.bf16.mxu1 %v1212_v51  ;;  %2407 = vmatprep.subr.bf16.mxu0 %v1214_v52  ;;  %v1316_v51 = vld [vmem:[#allocation2 + $0xc48] sm:$0xff]  ;;  %v1318_v52 = vld [vmem:[#allocation2 + $0xc58] sm:$0xff] }
 0x21d   :  { %2080 = vmatpush1.bf16.msra.mxu1 %v1211_v53  ;;  %2408 = vmatpush1.bf16.msra.mxu0 %v1213_v54  ;;  %v4532_v53 = vpack.c.bf16 %v856_v14, %v856_v14  ;;  %v1317_v54 = vld [vmem:[#allocation2 + $0xc50] sm:$0xff] }
 0x21e   :  { %2081 = vmatprep.subr.bf16.mxu1 %v1220_v55  ;;  %2409 = vmatprep.subr.bf16.mxu0 %v1222_v56  ;;  %v1324_v55 = vld [vmem:[#allocation2 + $0xc88] sm:$0xff]  ;;  %v1326_v56 = vld [vmem:[#allocation2 + $0xc98] sm:$0xff]  ;;  %v1413_v14 = vld [vmem:[#allocation2 + $0xf50] sm:$0xff] }
 0x221   :  { %2082 = vmatpush1.bf16.msra.mxu1 %v1219_v21  ;;  %2410 = vmatpush1.bf16.msra.mxu0 %v1221_v36  ;;  %v1323_v21 = vld [vmem:[#allocation2 + $0xc80] sm:$0xff]  ;;  %v1325_v36 = vld [vmem:[#allocation2 + $0xc90] sm:$0xff] }
 0x222   :  { %2083 = vmatprep.subr.bf16.mxu1 %v1228_v57  ;;  %2411 = vmatprep.subr.bf16.mxu0 %v1230_v58  ;;  %v1332_v57 = vld [vmem:[#allocation2 + $0xcc8] sm:$0xff]  ;;  %v1334_v58 = vld [vmem:[#allocation2 + $0xcd8] sm:$0xff] }
 0x225   :  { %2084 = vmatpush1.bf16.msra.mxu1 %v1227_v59  ;;  %2412 = vmatpush1.bf16.msra.mxu0 %v1229_v61  ;;  %v1331_v59 = vld [vmem:[#allocation2 + $0xcc0] sm:$0xff]  ;;  %v1333_v61 = vld [vmem:[#allocation2 + $0xcd0] sm:$0xff] }
 0x226   :  { %2085 = vmatprep.subr.bf16.mxu1 %v1236_v62  ;;  %2413 = vmatprep.subr.bf16.mxu0 %v1238_v63  ;;  %v1340_v62 = vld [vmem:[#allocation2 + $0xd08] sm:$0xff]  ;;  %v1342_v63 = vld [vmem:[#allocation2 + $0xd18] sm:$0xff] }
 0x229   :  { %2086 = vmatpush1.bf16.msra.mxu1 %v1235_v42  ;;  %2414 = vmatpush1.bf16.msra.mxu0 %v1237_v45  ;;  %v1339_v42 = vld [vmem:[#allocation2 + $0xd00] sm:$0xff]  ;;  %v1341_v45 = vld [vmem:[#allocation2 + $0xd10] sm:$0xff] }
 0x22a   :  { %2087 = vmatprep.subr.bf16.mxu1 %v1244_v0  ;;  %2415 = vmatprep.subr.bf16.mxu0 %v1246_v2  ;;  %v1348_v0 = vld [vmem:[#allocation2 + $0xd48] sm:$0xff]  ;;  %v1350_v2 = vld [vmem:[#allocation2 + $0xd58] sm:$0xff] }
 0x22d   :  { %2088 = vmatpush1.bf16.msra.mxu1 %v1243_v3  ;;  %2416 = vmatpush1.bf16.msra.mxu0 %v1245_v5  ;;  %v1347_v3 = vld [vmem:[#allocation2 + $0xd40] sm:$0xff]  ;;  %v1349_v5 = vld [vmem:[#allocation2 + $0xd50] sm:$0xff] }
 0x22e   :  { %2089 = vmatprep.subr.bf16.mxu1 %v1252_v6  ;;  %2417 = vmatprep.subr.bf16.mxu0 %v1254_v7  ;;  %v1356_v6 = vld [vmem:[#allocation2 + $0xd88] sm:$0xff]  ;;  %v1358_v7 = vld [vmem:[#allocation2 + $0xd98] sm:$0xff] }
 0x231   :  { %2090 = vmatpush1.bf16.msra.mxu1 %v1251_v10  ;;  %2418 = vmatpush1.bf16.msra.mxu0 %v1253_v60  ;;  %v1355_v10 = vld [vmem:[#allocation2 + $0xd80] sm:$0xff]  ;;  %v1357_v60 = vld [vmem:[#allocation2 + $0xd90] sm:$0xff] }
 0x232   :  { %2091 = vmatprep.subr.bf16.mxu1 %v1260_v26  ;;  %2419 = vmatprep.subr.bf16.mxu0 %v1262_v27  ;;  %v1364_v26 = vld [vmem:[#allocation2 + $0xdc8] sm:$0xff]  ;;  %v1366_v27 = vld [vmem:[#allocation2 + $0xdd8] sm:$0xff] }
 0x235   :  { %2092 = vmatpush1.bf16.msra.mxu1 %v1259_v4  ;;  %2420 = vmatpush1.bf16.msra.mxu0 %v1261_v8  ;;  %v1363_v4 = vld [vmem:[#allocation2 + $0xdc0] sm:$0xff]  ;;  %v1365_v8 = vld [vmem:[#allocation2 + $0xdd0] sm:$0xff] }
 0x236   :  { %2093 = vmatprep.subr.bf16.mxu1 %v1268_v9  ;;  %2421 = vmatprep.subr.bf16.mxu0 %v1270_v1  ;;  %v1372_v9 = vld [vmem:[#allocation2 + $0xe08] sm:$0xff]  ;;  %v1374_v1 = vld [vmem:[#allocation2 + $0xe18] sm:$0xff] }
 0x239   :  { %2094 = vmatpush1.bf16.msra.mxu1 %v1267_v12  ;;  %2422 = vmatpush1.bf16.msra.mxu0 %v1269_v13  ;;  %v1371_v12 = vld [vmem:[#allocation2 + $0xe00] sm:$0xff]  ;;  %v1373_v13 = vld [vmem:[#allocation2 + $0xe10] sm:$0xff] }
 0x23a   :  { %2095 = vmatprep.subr.bf16.mxu1 %v1276_v15  ;;  %2423 = vmatprep.subr.bf16.mxu0 %v1278_v17  ;;  %v1380_v15 = vld [vmem:[#allocation2 + $0xe48] sm:$0xff]  ;;  %v1382_v17 = vld [vmem:[#allocation2 + $0xe58] sm:$0xff] }
 0x23d   :  { %2096 = vmatpush1.bf16.msra.mxu1 %v1275_v18  ;;  %2424 = vmatpush1.bf16.msra.mxu0 %v1277_v19  ;;  %v1379_v18 = vld [vmem:[#allocation2 + $0xe40] sm:$0xff]  ;;  %v1381_v19 = vld [vmem:[#allocation2 + $0xe50] sm:$0xff] }
 0x23e   :  { %2097 = vmatprep.subr.bf16.mxu1 %v1284_v24  ;;  %2425 = vmatprep.subr.bf16.mxu0 %v1286_v25  ;;  %v1388_v24 = vld [vmem:[#allocation2 + $0xe88] sm:$0xff]  ;;  %v1390_v25 = vld [vmem:[#allocation2 + $0xe98] sm:$0xff] }
 0x241   :  { %2098 = vmatpush1.bf16.msra.mxu1 %v1283_v28  ;;  %2426 = vmatpush1.bf16.msra.mxu0 %v1285_v29  ;;  %v1387_v28 = vld [vmem:[#allocation2 + $0xe80] sm:$0xff]  ;;  %v1389_v29 = vld [vmem:[#allocation2 + $0xe90] sm:$0xff] }
 0x242   :  { %2099 = vmatprep.subr.bf16.mxu1 %v1292_v30  ;;  %2427 = vmatprep.subr.bf16.mxu0 %v1294_v32  ;;  %v1396_v30 = vld [vmem:[#allocation2 + $0xec8] sm:$0xff]  ;;  %v1398_v32 = vld [vmem:[#allocation2 + $0xed8] sm:$0xff] }
 0x245   :  { %2100 = vmatpush1.bf16.msra.mxu1 %v1291_v34  ;;  %2428 = vmatpush1.bf16.msra.mxu0 %v1293_v35  ;;  %v1397_v34 = vld [vmem:[#allocation2 + $0xed0] sm:$0xff]  ;;  %v1404_v35 = vld [vmem:[#allocation2 + $0xf08] sm:$0xff] }
 0x246   :  { %2101 = vmatprep.subr.bf16.mxu1 %v1300_v11  ;;  %2429 = vmatprep.subr.bf16.mxu0 %v1302_v38  ;;  %v1406_v11 = vld [vmem:[#allocation2 + $0xf18] sm:$0xff]  ;;  %v1403_v38 = vld [vmem:[#allocation2 + $0xf00] sm:$0xff] }
 0x249   :  { %2102 = vmatpush1.bf16.msra.mxu1 %v1299_v40  ;;  %2430 = vmatpush1.bf16.msra.mxu0 %v1301_v43  ;;  %v1405_v40 = vld [vmem:[#allocation2 + $0xf10] sm:$0xff]  ;;  %v1412_v43 = vld [vmem:[#allocation2 + $0xf48] sm:$0xff] }
 0x24a   :  { %2112 = vmatprep.subr.bf16.mxu1 %v1308_v44  ;;  %2440 = vmatprep.subr.bf16.mxu0 %v1310_v49  ;;  %v1414_v44 = vld [vmem:[#allocation2 + $0xf58] sm:$0xff]  ;;  %v1411_v49 = vld [vmem:[#allocation2 + $0xf40] sm:$0xff] }
 0x24c   :  { %2104 = vmatmul.mubr.bf16.vlgmr.msra.gmra.mrb[0].mxu1 %v4530_v50  ;;  %2432 = vmatmul.mubr.bf16.vlgmr.msra.gmra.mrb[4].mxu0 %v4530_v50 }
 0x24d   :  { %2113 = vmatpush1.bf16.msra.mxu1 %v1307_v20  ;;  %2441 = vmatpush1.bf16.msra.mxu0 %v1309_v41  ;;  %v1420_v20 = vld [vmem:[#allocation2 + $0xf88] sm:$0xff]  ;;  %v1422_v41 = vld [vmem:[#allocation2 + $0xf98] sm:$0xff] }
 0x24e   :  { %2114 = vmatprep.subr.bf16.mxu1 %v1316_v51  ;;  %2442 = vmatprep.subr.bf16.mxu0 %v1318_v52  ;;  %v4538_v51 = vld [vmem:[#allocation4 + $0x10] sm:$0xff]  ;;  %v1419_v52 = vld [vmem:[#allocation2 + $0xf80] sm:$0xff] }
 0x24f   :  { %2144 = vmatprep.mubr.bf16.mxu1 %v4532_v53  ;;  %2472 = vmatprep.mubr.bf16.mxu0 %v4532_v53 }
 0x251   :  { %2115 = vmatpush1.bf16.msra.mxu1 %v1315_v22  ;;  %2443 = vmatpush1.bf16.msra.mxu0 %v1317_v54  ;;  %v1421_v22 = vld [vmem:[#allocation2 + $0xf90] sm:$0xff]  ;;  %v1428_v54 = vld [vmem:[#allocation2 + $0xfc8] sm:$0xff] }
 0x252   :  { %2116 = vmatprep.subr.bf16.mxu1 %v1324_v55  ;;  %2444 = vmatprep.subr.bf16.mxu0 %v1326_v56  ;;  %v1430_v55 = vld [vmem:[#allocation2 + $0xfd8] sm:$0xff]  ;;  %v4542_v56 = vrot.slane %v4538_v51, %v4464_v48 }
 0x255   :  { %2117 = vmatpush1.bf16.msra.mxu1 %v1323_v21  ;;  %2445 = vmatpush1.bf16.msra.mxu0 %v1325_v36  ;;  %v1427_v21 = vld [vmem:[#allocation2 + $0xfc0] sm:$0xff]  ;;  %v1429_v36 = vld [vmem:[#allocation2 + $0xfd0] sm:$0xff] }
 0x256   :  { %2118 = vmatprep.subr.bf16.mxu1 %v1332_v57  ;;  %2446 = vmatprep.subr.bf16.mxu0 %v1334_v58  ;;  %v1436_v57 = vld [vmem:[#allocation2 + $0x1008] sm:$0xff]  ;;  %v1438_v58 = vld [vmem:[#allocation2 + $0x1018] sm:$0xff] }
 0x259   :  { %2119 = vmatpush1.bf16.msra.mxu1 %v1331_v59  ;;  %2447 = vmatpush1.bf16.msra.mxu0 %v1333_v61  ;;  %v872_v59 = vcombine.high %v4542_v56, %v4542_v56  ;;  %v4548_v61 = vpack.c.bf16 %v4524_v39, %v4524_v39  ;;  %v1443_v39 = vld [vmem:[#allocation2 + $0x1040] sm:$0xff] }
 0x25a   :  { %2120 = vmatprep.subr.bf16.mxu1 %v1340_v62  ;;  %2448 = vmatprep.subr.bf16.mxu0 %v1342_v63  ;;  %v1435_v62 = vld [vmem:[#allocation2 + $0x1000] sm:$0xff]  ;;  %v1437_v63 = vld [vmem:[#allocation2 + $0x1010] sm:$0xff] }
 0x25d   :  { %2121 = vmatpush1.bf16.msra.mxu1 %v1339_v42  ;;  %2449 = vmatpush1.bf16.msra.mxu0 %v1341_v45  ;;  %v1444_v42 = vld [vmem:[#allocation2 + $0x1048] sm:$0xff]  ;;  %v1446_v45 = vld [vmem:[#allocation2 + $0x1058] sm:$0xff] }
 0x25e   :  { %2122 = vmatprep.subr.bf16.mxu1 %v1348_v0  ;;  %2450 = vmatprep.subr.bf16.mxu0 %v1350_v2  ;;  %v4550_v0 = vpack.c.bf16 %v872_v59, %v872_v59  ;;  %v1445_v2 = vld [vmem:[#allocation2 + $0x1050] sm:$0xff]  ;;  %v1540_v59 = vld [vmem:[#allocation2 + $0x1348] sm:$0xff] }
 0x261   :  { %2123 = vmatpush1.bf16.msra.mxu1 %v1347_v3  ;;  %2451 = vmatpush1.bf16.msra.mxu0 %v1349_v5  ;;  %v1452_v3 = vld [vmem:[#allocation2 + $0x1088] sm:$0xff]  ;;  %v1454_v5 = vld [vmem:[#allocation2 + $0x1098] sm:$0xff] }
 0x262   :  { %2124 = vmatprep.subr.bf16.mxu1 %v1356_v6  ;;  %2452 = vmatprep.subr.bf16.mxu0 %v1358_v7  ;;  %v1451_v6 = vld [vmem:[#allocation2 + $0x1080] sm:$0xff]  ;;  %v1453_v7 = vld [vmem:[#allocation2 + $0x1090] sm:$0xff] }
 0x265   :  { %2125 = vmatpush1.bf16.msra.mxu1 %v1355_v10  ;;  %2453 = vmatpush1.bf16.msra.mxu0 %v1357_v60  ;;  %v1460_v10 = vld [vmem:[#allocation2 + $0x10c8] sm:$0xff]  ;;  %v1462_v60 = vld [vmem:[#allocation2 + $0x10d8] sm:$0xff] }
 0x266   :  { %2126 = vmatprep.subr.bf16.mxu1 %v1364_v26  ;;  %2454 = vmatprep.subr.bf16.mxu0 %v1366_v27  ;;  %v1459_v26 = vld [vmem:[#allocation2 + $0x10c0] sm:$0xff]  ;;  %v1461_v27 = vld [vmem:[#allocation2 + $0x10d0] sm:$0xff] }
 0x269   :  { %2127 = vmatpush1.bf16.msra.mxu1 %v1363_v4  ;;  %2455 = vmatpush1.bf16.msra.mxu0 %v1365_v8  ;;  %v1468_v4 = vld [vmem:[#allocation2 + $0x1108] sm:$0xff]  ;;  %v1470_v8 = vld [vmem:[#allocation2 + $0x1118] sm:$0xff] }
 0x26a   :  { %2128 = vmatprep.subr.bf16.mxu1 %v1372_v9  ;;  %2456 = vmatprep.subr.bf16.mxu0 %v1374_v1  ;;  %v1467_v9 = vld [vmem:[#allocation2 + $0x1100] sm:$0xff]  ;;  %v1469_v1 = vld [vmem:[#allocation2 + $0x1110] sm:$0xff] }
 0x26d   :  { %2129 = vmatpush1.bf16.msra.mxu1 %v1371_v12  ;;  %2457 = vmatpush1.bf16.msra.mxu0 %v1373_v13  ;;  %v1476_v12 = vld [vmem:[#allocation2 + $0x1148] sm:$0xff]  ;;  %v1478_v13 = vld [vmem:[#allocation2 + $0x1158] sm:$0xff] }
 0x26e   :  { %2130 = vmatprep.subr.bf16.mxu1 %v1380_v15  ;;  %2458 = vmatprep.subr.bf16.mxu0 %v1382_v17  ;;  %v1475_v15 = vld [vmem:[#allocation2 + $0x1140] sm:$0xff]  ;;  %v1477_v17 = vld [vmem:[#allocation2 + $0x1150] sm:$0xff] }
 0x271   :  { %2131 = vmatpush1.bf16.msra.mxu1 %v1379_v18  ;;  %2459 = vmatpush1.bf16.msra.mxu0 %v1381_v19  ;;  %v1484_v18 = vld [vmem:[#allocation2 + $0x1188] sm:$0xff]  ;;  %v1486_v19 = vld [vmem:[#allocation2 + $0x1198] sm:$0xff] }
 0x272   :  { %2132 = vmatprep.subr.bf16.mxu1 %v1388_v24  ;;  %2460 = vmatprep.subr.bf16.mxu0 %v1390_v25  ;;  %v1483_v24 = vld [vmem:[#allocation2 + $0x1180] sm:$0xff]  ;;  %v1485_v25 = vld [vmem:[#allocation2 + $0x1190] sm:$0xff] }
 0x275   :  { %2133 = vmatpush1.bf16.msra.mxu1 %v1387_v28  ;;  %2461 = vmatpush1.bf16.msra.mxu0 %v1389_v29  ;;  %v1492_v28 = vld [vmem:[#allocation2 + $0x11c8] sm:$0xff]  ;;  %v1494_v29 = vld [vmem:[#allocation2 + $0x11d8] sm:$0xff] }
 0x276   :  { %2134 = vmatprep.subr.bf16.mxu1 %v1396_v30  ;;  %2462 = vmatprep.subr.bf16.mxu0 %v1398_v32  ;;  %v1491_v30 = vld [vmem:[#allocation2 + $0x11c0] sm:$0xff]  ;;  %v1493_v32 = vld [vmem:[#allocation2 + $0x11d0] sm:$0xff] }
 0x279   :  { %2135 = vmatpush1.bf16.msra.mxu1 %v1395_v33  ;;  %2463 = vmatpush1.bf16.msra.mxu0 %v1397_v34  ;;  %v1500_v33 = vld [vmem:[#allocation2 + $0x1208] sm:$0xff]  ;;  %v1502_v34 = vld [vmem:[#allocation2 + $0x1218] sm:$0xff] }
 0x27a   :  { %2136 = vmatprep.subr.bf16.mxu1 %v1404_v35  ;;  %2464 = vmatprep.subr.bf16.mxu0 %v1406_v11  ;;  %v1499_v35 = vld [vmem:[#allocation2 + $0x1200] sm:$0xff]  ;;  %v1501_v11 = vld [vmem:[#allocation2 + $0x1210] sm:$0xff] }
 0x27d   :  { %2137 = vmatpush1.bf16.msra.mxu1 %v1403_v38  ;;  %2465 = vmatpush1.bf16.msra.mxu0 %v1405_v40  ;;  %v1508_v38 = vld [vmem:[#allocation2 + $0x1248] sm:$0xff]  ;;  %v1510_v40 = vld [vmem:[#allocation2 + $0x1258] sm:$0xff] }
 0x27e   :  { %2138 = vmatprep.subr.bf16.mxu1 %v1412_v43  ;;  %2466 = vmatprep.subr.bf16.mxu0 %v1414_v44  ;;  %v1507_v43 = vld [vmem:[#allocation2 + $0x1240] sm:$0xff]  ;;  %v1509_v44 = vld [vmem:[#allocation2 + $0x1250] sm:$0xff] }
 0x281   :  { %2139 = vmatpush1.bf16.msra.mxu1 %v1411_v49  ;;  %2467 = vmatpush1.bf16.msra.mxu0 %v1413_v14  ;;  %v1516_v49 = vld [vmem:[#allocation2 + $0x1288] sm:$0xff]  ;;  %v1518_v14 = vld [vmem:[#allocation2 + $0x1298] sm:$0xff] }
 0x282   :  { %2140 = vmatprep.subr.bf16.mxu1 %v1420_v20  ;;  %2468 = vmatprep.subr.bf16.mxu0 %v1422_v41  ;;  %v1515_v20 = vld [vmem:[#allocation2 + $0x1280] sm:$0xff]  ;;  %v1517_v41 = vld [vmem:[#allocation2 + $0x1290] sm:$0xff] }
 0x285   :  { %2141 = vmatpush1.bf16.msra.mxu1 %v1419_v52  ;;  %2469 = vmatpush1.bf16.msra.mxu0 %v1421_v22  ;;  %v1524_v52 = vld [vmem:[#allocation2 + $0x12c8] sm:$0xff]  ;;  %v1526_v22 = vld [vmem:[#allocation2 + $0x12d8] sm:$0xff] }
 0x286   :  { %2142 = vmatprep.subr.bf16.mxu1 %v1428_v54  ;;  %2470 = vmatprep.subr.bf16.mxu0 %v1430_v55  ;;  %v1523_v54 = vld [vmem:[#allocation2 + $0x12c0] sm:$0xff]  ;;  %v1525_v55 = vld [vmem:[#allocation2 + $0x12d0] sm:$0xff] }
 0x289   :  { %2143 = vmatpush1.bf16.msra.mxu1 %v1427_v21  ;;  %2471 = vmatpush1.bf16.msra.mxu0 %v1429_v36  ;;  %v1532_v21 = vld [vmem:[#allocation2 + $0x1308] sm:$0xff]  ;;  %v1534_v36 = vld [vmem:[#allocation2 + $0x1318] sm:$0xff] }
 0x28a   :  { %2153 = vmatprep.subr.bf16.mxu1 %v1436_v57  ;;  %2481 = vmatprep.subr.bf16.mxu0 %v1438_v58  ;;  %v1531_v57 = vld [vmem:[#allocation2 + $0x1300] sm:$0xff]  ;;  %v1533_v58 = vld [vmem:[#allocation2 + $0x1310] sm:$0xff] }
 0x28c   :  { %2145 = vmatmul.mubr.bf16.vlgmr.msra.gmra.mrb[0].mxu1 %v4548_v61  ;;  %2473 = vmatmul.mubr.bf16.vlgmr.msra.gmra.mrb[4].mxu0 %v4548_v61 }
 0x28d   :  { %2154 = vmatpush1.bf16.msra.mxu1 %v1435_v62  ;;  %2482 = vmatpush1.bf16.msra.mxu0 %v1437_v63  ;;  %v1542_v62 = vld [vmem:[#allocation2 + $0x1358] sm:$0xff]  ;;  %v1539_v63 = vld [vmem:[#allocation2 + $0x1340] sm:$0xff] }
 0x28e   :  { %2155 = vmatprep.subr.bf16.mxu1 %v1444_v42  ;;  %2483 = vmatprep.subr.bf16.mxu0 %v1446_v45  ;;  %v1541_v42 = vld [vmem:[#allocation2 + $0x1350] sm:$0xff]  ;;  %v1548_v45 = vld [vmem:[#allocation2 + $0x1388] sm:$0xff] }
 0x28f   :  { %2185 = vmatprep.mubr.bf16.mxu1 %v4550_v0  ;;  %2513 = vmatprep.mubr.bf16.mxu0 %v4550_v0 }
 0x291   :  { %2156 = vmatpush1.bf16.msra.mxu1 %v1443_v39  ;;  %2484 = vmatpush1.bf16.msra.mxu0 %v1445_v2  ;;  %v1550_v39 = vld [vmem:[#allocation2 + $0x1398] sm:$0xff]  ;;  %v857_v2 = vcombine.high %v4538_v51, %v4538_v51 }
 0x292   :  { %2157 = vmatprep.subr.bf16.mxu1 %v1452_v3  ;;  %2485 = vmatprep.subr.bf16.mxu0 %v1454_v5  ;;  %v1547_v3 = vld [vmem:[#allocation2 + $0x1380] sm:$0xff]  ;;  %v1549_v5 = vld [vmem:[#allocation2 + $0x1390] sm:$0xff] }
 0x295   :  { %2158 = vmatpush1.bf16.msra.mxu1 %v1451_v6  ;;  %2486 = vmatpush1.bf16.msra.mxu0 %v1453_v7  ;;  %v1556_v6 = vld [vmem:[#allocation2 + $0x13c8] sm:$0xff]  ;;  %v1558_v7 = vld [vmem:[#allocation2 + $0x13d8] sm:$0xff] }
 0x296   :  { %2159 = vmatprep.subr.bf16.mxu1 %v1460_v10  ;;  %2487 = vmatprep.subr.bf16.mxu0 %v1462_v60  ;;  %v4559_v10 = vrot.slane %v857_v2, %v4464_v48  ;;  %v1555_v60 = vld [vmem:[#allocation2 + $0x13c0] sm:$0xff] }
 0x297   :  { %v1643_v2 = vld [vmem:[#allocation2 + $0x1680] sm:$0xff] }
 0x298   :  { %v873_v51 = vcombine.high %v4559_v10, %v4559_v10 }
 0x299   :  { %2160 = vmatpush1.bf16.msra.mxu1 %v1459_v26  ;;  %2488 = vmatpush1.bf16.msra.mxu0 %v1461_v27  ;;  %v1557_v26 = vld [vmem:[#allocation2 + $0x13d0] sm:$0xff]  ;;  %v1564_v27 = vld [vmem:[#allocation2 + $0x1408] sm:$0xff] }
 0x29a   :  { %2161 = vmatprep.subr.bf16.mxu1 %v1468_v4  ;;  %2489 = vmatprep.subr.bf16.mxu0 %v1470_v8  ;;  %v1566_v4 = vld [vmem:[#allocation2 + $0x1418] sm:$0xff]  ;;  %v4565_v8 = vpack.c.bf16 %v4542_v56, %v4542_v56  ;;  %v1571_v56 = vld [vmem:[#allocation2 + $0x1440] sm:$0xff] }
 0x29d   :  { %2162 = vmatpush1.bf16.msra.mxu1 %v1467_v9  ;;  %2490 = vmatpush1.bf16.msra.mxu0 %v1469_v1  ;;  %v1563_v9 = vld [vmem:[#allocation2 + $0x1400] sm:$0xff]  ;;  %v1565_v1 = vld [vmem:[#allocation2 + $0x1410] sm:$0xff] }
 0x29e   :  { %2163 = vmatprep.subr.bf16.mxu1 %v1476_v12  ;;  %2491 = vmatprep.subr.bf16.mxu0 %v1478_v13  ;;  %v1572_v12 = vld [vmem:[#allocation2 + $0x1448] sm:$0xff]  ;;  %v1574_v13 = vld [vmem:[#allocation2 + $0x1458] sm:$0xff] }
 0x2a1   :  { %2164 = vmatpush1.bf16.msra.mxu1 %v1475_v15  ;;  %2492 = vmatpush1.bf16.msra.mxu0 %v1477_v17  ;;  %v4567_v15 = vpack.c.bf16 %v873_v51, %v873_v51  ;;  %v1573_v17 = vld [vmem:[#allocation2 + $0x1450] sm:$0xff] }
 0x2a2   :  { %2165 = vmatprep.subr.bf16.mxu1 %v1484_v18  ;;  %2493 = vmatprep.subr.bf16.mxu0 %v1486_v19  ;;  %v1580_v18 = vld [vmem:[#allocation2 + $0x1488] sm:$0xff]  ;;  %v1582_v19 = vld [vmem:[#allocation2 + $0x1498] sm:$0xff]  ;;  %v1661_v51 = vld [vmem:[#allocation2 + $0x1710] sm:$0xff] }
 0x2a5   :  { %2166 = vmatpush1.bf16.msra.mxu1 %v1483_v24  ;;  %2494 = vmatpush1.bf16.msra.mxu0 %v1485_v25  ;;  %v1579_v24 = vld [vmem:[#allocation2 + $0x1480] sm:$0xff]  ;;  %v1581_v25 = vld [vmem:[#allocation2 + $0x1490] sm:$0xff] }
 0x2a6   :  { %2167 = vmatprep.subr.bf16.mxu1 %v1492_v28  ;;  %2495 = vmatprep.subr.bf16.mxu0 %v1494_v29  ;;  %v1588_v28 = vld [vmem:[#allocation2 + $0x14c8] sm:$0xff]  ;;  %v1590_v29 = vld [vmem:[#allocation2 + $0x14d8] sm:$0xff] }
 0x2a9   :  { %2168 = vmatpush1.bf16.msra.mxu1 %v1491_v30  ;;  %2496 = vmatpush1.bf16.msra.mxu0 %v1493_v32  ;;  %v1587_v30 = vld [vmem:[#allocation2 + $0x14c0] sm:$0xff]  ;;  %v1589_v32 = vld [vmem:[#allocation2 + $0x14d0] sm:$0xff] }
 0x2aa   :  { %2169 = vmatprep.subr.bf16.mxu1 %v1500_v33  ;;  %2497 = vmatprep.subr.bf16.mxu0 %v1502_v34  ;;  %v1596_v33 = vld [vmem:[#allocation2 + $0x1508] sm:$0xff]  ;;  %v1598_v34 = vld [vmem:[#allocation2 + $0x1518] sm:$0xff] }
 0x2ad   :  { %2170 = vmatpush1.bf16.msra.mxu1 %v1499_v35  ;;  %2498 = vmatpush1.bf16.msra.mxu0 %v1501_v11  ;;  %v1595_v35 = vld [vmem:[#allocation2 + $0x1500] sm:$0xff]  ;;  %v1597_v11 = vld [vmem:[#allocation2 + $0x1510] sm:$0xff] }
 0x2ae   :  { %2171 = vmatprep.subr.bf16.mxu1 %v1508_v38  ;;  %2499 = vmatprep.subr.bf16.mxu0 %v1510_v40  ;;  %v1604_v38 = vld [vmem:[#allocation2 + $0x1548] sm:$0xff]  ;;  %v1606_v40 = vld [vmem:[#allocation2 + $0x1558] sm:$0xff] }
 0x2b1   :  { %2172 = vmatpush1.bf16.msra.mxu1 %v1507_v43  ;;  %2500 = vmatpush1.bf16.msra.mxu0 %v1509_v44  ;;  %v1603_v43 = vld [vmem:[#allocation2 + $0x1540] sm:$0xff]  ;;  %v1605_v44 = vld [vmem:[#allocation2 + $0x1550] sm:$0xff] }
 0x2b2   :  { %2173 = vmatprep.subr.bf16.mxu1 %v1516_v49  ;;  %2501 = vmatprep.subr.bf16.mxu0 %v1518_v14  ;;  %v1612_v49 = vld [vmem:[#allocation2 + $0x1588] sm:$0xff]  ;;  %v1614_v14 = vld [vmem:[#allocation2 + $0x1598] sm:$0xff] }
 0x2b5   :  { %2174 = vmatpush1.bf16.msra.mxu1 %v1515_v20  ;;  %2502 = vmatpush1.bf16.msra.mxu0 %v1517_v41  ;;  %v1611_v20 = vld [vmem:[#allocation2 + $0x1580] sm:$0xff]  ;;  %v1613_v41 = vld [vmem:[#allocation2 + $0x1590] sm:$0xff] }
 0x2b6   :  { %2175 = vmatprep.subr.bf16.mxu1 %v1524_v52  ;;  %2503 = vmatprep.subr.bf16.mxu0 %v1526_v22  ;;  %v1620_v52 = vld [vmem:[#allocation2 + $0x15c8] sm:$0xff]  ;;  %v1622_v22 = vld [vmem:[#allocation2 + $0x15d8] sm:$0xff] }
 0x2b9   :  { %2176 = vmatpush1.bf16.msra.mxu1 %v1523_v54  ;;  %2504 = vmatpush1.bf16.msra.mxu0 %v1525_v55  ;;  %v1619_v54 = vld [vmem:[#allocation2 + $0x15c0] sm:$0xff]  ;;  %v1621_v55 = vld [vmem:[#allocation2 + $0x15d0] sm:$0xff] }
 0x2ba   :  { %2177 = vmatprep.subr.bf16.mxu1 %v1532_v21  ;;  %2505 = vmatprep.subr.bf16.mxu0 %v1534_v36  ;;  %v1628_v21 = vld [vmem:[#allocation2 + $0x1608] sm:$0xff]  ;;  %v1630_v36 = vld [vmem:[#allocation2 + $0x1618] sm:$0xff] }
 0x2bd   :  { %2178 = vmatpush1.bf16.msra.mxu1 %v1531_v57  ;;  %2506 = vmatpush1.bf16.msra.mxu0 %v1533_v58  ;;  %v1627_v57 = vld [vmem:[#allocation2 + $0x1600] sm:$0xff]  ;;  %v1629_v58 = vld [vmem:[#allocation2 + $0x1610] sm:$0xff] }
 0x2be   :  { %2179 = vmatprep.subr.bf16.mxu1 %v1540_v59  ;;  %2507 = vmatprep.subr.bf16.mxu0 %v1542_v62  ;;  %v1636_v59 = vld [vmem:[#allocation2 + $0x1648] sm:$0xff]  ;;  %v1638_v62 = vld [vmem:[#allocation2 + $0x1658] sm:$0xff] }
 0x2c1   :  { %2180 = vmatpush1.bf16.msra.mxu1 %v1539_v63  ;;  %2508 = vmatpush1.bf16.msra.mxu0 %v1541_v42  ;;  %v1635_v63 = vld [vmem:[#allocation2 + $0x1640] sm:$0xff]  ;;  %v1637_v42 = vld [vmem:[#allocation2 + $0x1650] sm:$0xff] }
 0x2c2   :  { %2181 = vmatprep.subr.bf16.mxu1 %v1548_v45  ;;  %2509 = vmatprep.subr.bf16.mxu0 %v1550_v39  ;;  %v1644_v45 = vld [vmem:[#allocation2 + $0x1688] sm:$0xff]  ;;  %v1646_v39 = vld [vmem:[#allocation2 + $0x1698] sm:$0xff] }
 0x2c5   :  { %2182 = vmatpush1.bf16.msra.mxu1 %v1547_v3  ;;  %2510 = vmatpush1.bf16.msra.mxu0 %v1549_v5  ;;  %v1645_v3 = vld [vmem:[#allocation2 + $0x1690] sm:$0xff]  ;;  %v1652_v5 = vld [vmem:[#allocation2 + $0x16c8] sm:$0xff] }
 0x2c6   :  { %2183 = vmatprep.subr.bf16.mxu1 %v1556_v6  ;;  %2511 = vmatprep.subr.bf16.mxu0 %v1558_v7  ;;  %v1654_v6 = vld [vmem:[#allocation2 + $0x16d8] sm:$0xff]  ;;  %v1651_v7 = vld [vmem:[#allocation2 + $0x16c0] sm:$0xff] }
 0x2c9   :  { %2184 = vmatpush1.bf16.msra.mxu1 %v1555_v60  ;;  %2512 = vmatpush1.bf16.msra.mxu0 %v1557_v26  ;;  %v1653_v60 = vld [vmem:[#allocation2 + $0x16d0] sm:$0xff]  ;;  %v1660_v26 = vld [vmem:[#allocation2 + $0x1708] sm:$0xff] }
 0x2ca   :  { %2194 = vmatprep.subr.bf16.mxu1 %v1564_v27  ;;  %2522 = vmatprep.subr.bf16.mxu0 %v1566_v4  ;;  %v1662_v27 = vld [vmem:[#allocation2 + $0x1718] sm:$0xff]  ;;  %v1659_v4 = vld [vmem:[#allocation2 + $0x1700] sm:$0xff] }
 0x2cc   :  { %2186 = vmatmul.mubr.bf16.vlgmr.msra.gmra.mrb[0].mxu1 %v4565_v8  ;;  %2514 = vmatmul.mubr.bf16.vlgmr.msra.gmra.mrb[4].mxu0 %v4565_v8 }
 0x2cd   :  { %2195 = vmatpush1.bf16.msra.mxu1 %v1563_v9  ;;  %2523 = vmatpush1.bf16.msra.mxu0 %v1565_v1  ;;  %v1668_v9 = vld [vmem:[#allocation2 + $0x1748] sm:$0xff]  ;;  %v1670_v1 = vld [vmem:[#allocation2 + $0x1758] sm:$0xff] }
 0x2ce   :  { %2196 = vmatprep.subr.bf16.mxu1 %v1572_v12  ;;  %2524 = vmatprep.subr.bf16.mxu0 %v1574_v13  ;;  %v1667_v12 = vld [vmem:[#allocation2 + $0x1740] sm:$0xff]  ;;  %v1669_v13 = vld [vmem:[#allocation2 + $0x1750] sm:$0xff] }
 0x2cf   :  { %2226 = vmatprep.mubr.bf16.mxu1 %v4567_v15  ;;  %2554 = vmatprep.mubr.bf16.mxu0 %v4567_v15 }
 0x2d1   :  { %2197 = vmatpush1.bf16.msra.mxu1 %v1571_v56  ;;  %2525 = vmatpush1.bf16.msra.mxu0 %v1573_v17  ;;  %v1676_v56 = vld [vmem:[#allocation2 + $0x1788] sm:$0xff]  ;;  %v1678_v17 = vld [vmem:[#allocation2 + $0x1798] sm:$0xff] }
 0x2d2   :  { %2198 = vmatprep.subr.bf16.mxu1 %v1580_v18  ;;  %2526 = vmatprep.subr.bf16.mxu0 %v1582_v19  ;;  %v4573_v18 = vld [vmem:[#allocation4 + $0x18] sm:$0xff]  ;;  %v1675_v19 = vld [vmem:[#allocation2 + $0x1780] sm:$0xff] }
 0x2d5   :  { %2199 = vmatpush1.bf16.msra.mxu1 %v1579_v24  ;;  %2527 = vmatpush1.bf16.msra.mxu0 %v1581_v25  ;;  %v1677_v24 = vld [vmem:[#allocation2 + $0x1790] sm:$0xff]  ;;  %v1684_v25 = vld [vmem:[#allocation2 + $0x17c8] sm:$0xff] }
 0x2d6   :  { %2200 = vmatprep.subr.bf16.mxu1 %v1588_v28  ;;  %2528 = vmatprep.subr.bf16.mxu0 %v1590_v29  ;;  %v1686_v28 = vld [vmem:[#allocation2 + $0x17d8] sm:$0xff]  ;;  %v4577_v29 = vrot.slane %v4573_v18, %v4464_v48 }
 0x2d9   :  { %2201 = vmatpush1.bf16.msra.mxu1 %v1587_v30  ;;  %2529 = vmatpush1.bf16.msra.mxu0 %v1589_v32  ;;  %v1683_v30 = vld [vmem:[#allocation2 + $0x17c0] sm:$0xff]  ;;  %v1685_v32 = vld [vmem:[#allocation2 + $0x17d0] sm:$0xff] }
 0x2da   :  { %2202 = vmatprep.subr.bf16.mxu1 %v1596_v33  ;;  %2530 = vmatprep.subr.bf16.mxu0 %v1598_v34  ;;  %v1692_v33 = vld [vmem:[#allocation2 + $0x1808] sm:$0xff]  ;;  %v1694_v34 = vld [vmem:[#allocation2 + $0x1818] sm:$0xff] }
 0x2dd   :  { %2203 = vmatpush1.bf16.msra.mxu1 %v1595_v35  ;;  %2531 = vmatpush1.bf16.msra.mxu0 %v1597_v11  ;;  %v889_v35 = vcombine.high %v4577_v29, %v4577_v29  ;;  %v4583_v11 = vpack.c.bf16 %v4559_v10, %v4559_v10  ;;  %v1699_v10 = vld [vmem:[#allocation2 + $0x1840] sm:$0xff] }
 0x2de   :  { %2204 = vmatprep.subr.bf16.mxu1 %v1604_v38  ;;  %2532 = vmatprep.subr.bf16.mxu0 %v1606_v40  ;;  %v1691_v38 = vld [vmem:[#allocation2 + $0x1800] sm:$0xff]  ;;  %v1693_v40 = vld [vmem:[#allocation2 + $0x1810] sm:$0xff] }
 0x2e1   :  { %2205 = vmatpush1.bf16.msra.mxu1 %v1603_v43  ;;  %2533 = vmatpush1.bf16.msra.mxu0 %v1605_v44  ;;  %v1700_v43 = vld [vmem:[#allocation2 + $0x1848] sm:$0xff]  ;;  %v1702_v44 = vld [vmem:[#allocation2 + $0x1858] sm:$0xff] }
 0x2e2   :  { %2206 = vmatprep.subr.bf16.mxu1 %v1612_v49  ;;  %2534 = vmatprep.subr.bf16.mxu0 %v1614_v14  ;;  %v4585_v49 = vpack.c.bf16 %v889_v35, %v889_v35  ;;  %v1701_v14 = vld [vmem:[#allocation2 + $0x1850] sm:$0xff]  ;;  %v1788_v35 = vld [vmem:[#allocation2 + $0x1b08] sm:$0xff] }
 0x2e5   :  { %2207 = vmatpush1.bf16.msra.mxu1 %v1611_v20  ;;  %2535 = vmatpush1.bf16.msra.mxu0 %v1613_v41  ;;  %v1708_v20 = vld [vmem:[#allocation2 + $0x1888] sm:$0xff]  ;;  %v1710_v41 = vld [vmem:[#allocation2 + $0x1898] sm:$0xff] }
 0x2e6   :  { %2208 = vmatprep.subr.bf16.mxu1 %v1620_v52  ;;  %2536 = vmatprep.subr.bf16.mxu0 %v1622_v22  ;;  %v1707_v52 = vld [vmem:[#allocation2 + $0x1880] sm:$0xff]  ;;  %v1709_v22 = vld [vmem:[#allocation2 + $0x1890] sm:$0xff] }
 0x2e9   :  { %2209 = vmatpush1.bf16.msra.mxu1 %v1619_v54  ;;  %2537 = vmatpush1.bf16.msra.mxu0 %v1621_v55  ;;  %v1716_v54 = vld [vmem:[#allocation2 + $0x18c8] sm:$0xff]  ;;  %v1718_v55 = vld [vmem:[#allocation2 + $0x18d8] sm:$0xff] }
 0x2ea   :  { %2210 = vmatprep.subr.bf16.mxu1 %v1628_v21  ;;  %2538 = vmatprep.subr.bf16.mxu0 %v1630_v36  ;;  %v1715_v21 = vld [vmem:[#allocation2 + $0x18c0] sm:$0xff]  ;;  %v1717_v36 = vld [vmem:[#allocation2 + $0x18d0] sm:$0xff] }
 0x2ed   :  { %2211 = vmatpush1.bf16.msra.mxu1 %v1627_v57  ;;  %2539 = vmatpush1.bf16.msra.mxu0 %v1629_v58  ;;  %v1724_v57 = vld [vmem:[#allocation2 + $0x1908] sm:$0xff]  ;;  %v1726_v58 = vld [vmem:[#allocation2 + $0x1918] sm:$0xff] }
 0x2ee   :  { %2212 = vmatprep.subr.bf16.mxu1 %v1636_v59  ;;  %2540 = vmatprep.subr.bf16.mxu0 %v1638_v62  ;;  %v1723_v59 = vld [vmem:[#allocation2 + $0x1900] sm:$0xff]  ;;  %v1725_v62 = vld [vmem:[#allocation2 + $0x1910] sm:$0xff] }
 0x2f1   :  { %2213 = vmatpush1.bf16.msra.mxu1 %v1635_v63  ;;  %2541 = vmatpush1.bf16.msra.mxu0 %v1637_v42  ;;  %v1732_v63 = vld [vmem:[#allocation2 + $0x1948] sm:$0xff]  ;;  %v1734_v42 = vld [vmem:[#allocation2 + $0x1958] sm:$0xff] }
 0x2f2   :  { %2214 = vmatprep.subr.bf16.mxu1 %v1644_v45  ;;  %2542 = vmatprep.subr.bf16.mxu0 %v1646_v39  ;;  %v1731_v45 = vld [vmem:[#allocation2 + $0x1940] sm:$0xff]  ;;  %v1733_v39 = vld [vmem:[#allocation2 + $0x1950] sm:$0xff] }
 0x2f5   :  { %2215 = vmatpush1.bf16.msra.mxu1 %v1643_v2  ;;  %2543 = vmatpush1.bf16.msra.mxu0 %v1645_v3  ;;  %v1740_v2 = vld [vmem:[#allocation2 + $0x1988] sm:$0xff]  ;;  %v1742_v3 = vld [vmem:[#allocation2 + $0x1998] sm:$0xff] }
 0x2f6   :  { %2216 = vmatprep.subr.bf16.mxu1 %v1652_v5  ;;  %2544 = vmatprep.subr.bf16.mxu0 %v1654_v6  ;;  %v1739_v5 = vld [vmem:[#allocation2 + $0x1980] sm:$0xff]  ;;  %v1741_v6 = vld [vmem:[#allocation2 + $0x1990] sm:$0xff] }
 0x2f9   :  { %2217 = vmatpush1.bf16.msra.mxu1 %v1651_v7  ;;  %2545 = vmatpush1.bf16.msra.mxu0 %v1653_v60  ;;  %v1748_v7 = vld [vmem:[#allocation2 + $0x19c8] sm:$0xff]  ;;  %v1750_v60 = vld [vmem:[#allocation2 + $0x19d8] sm:$0xff] }
 0x2fa   :  { %2218 = vmatprep.subr.bf16.mxu1 %v1660_v26  ;;  %2546 = vmatprep.subr.bf16.mxu0 %v1662_v27  ;;  %v1747_v26 = vld [vmem:[#allocation2 + $0x19c0] sm:$0xff]  ;;  %v1749_v27 = vld [vmem:[#allocation2 + $0x19d0] sm:$0xff] }
 0x2fd   :  { %2219 = vmatpush1.bf16.msra.mxu1 %v1659_v4  ;;  %2547 = vmatpush1.bf16.msra.mxu0 %v1661_v51  ;;  %v1756_v4 = vld [vmem:[#allocation2 + $0x1a08] sm:$0xff]  ;;  %v1758_v51 = vld [vmem:[#allocation2 + $0x1a18] sm:$0xff] }
 0x2fe   :  { %2220 = vmatprep.subr.bf16.mxu1 %v1668_v9  ;;  %2548 = vmatprep.subr.bf16.mxu0 %v1670_v1  ;;  %v1755_v9 = vld [vmem:[#allocation2 + $0x1a00] sm:$0xff]  ;;  %v1757_v1 = vld [vmem:[#allocation2 + $0x1a10] sm:$0xff] }
 0x301   :  { %2221 = vmatpush1.bf16.msra.mxu1 %v1667_v12  ;;  %2549 = vmatpush1.bf16.msra.mxu0 %v1669_v13  ;;  %v1764_v12 = vld [vmem:[#allocation2 + $0x1a48] sm:$0xff]  ;;  %v1766_v13 = vld [vmem:[#allocation2 + $0x1a58] sm:$0xff] }
 0x302   :  { %2222 = vmatprep.subr.bf16.mxu1 %v1676_v56  ;;  %2550 = vmatprep.subr.bf16.mxu0 %v1678_v17  ;;  %v1763_v56 = vld [vmem:[#allocation2 + $0x1a40] sm:$0xff]  ;;  %v1765_v17 = vld [vmem:[#allocation2 + $0x1a50] sm:$0xff] }
 0x305   :  { %2223 = vmatpush1.bf16.msra.mxu1 %v1675_v19  ;;  %2551 = vmatpush1.bf16.msra.mxu0 %v1677_v24  ;;  %v1772_v19 = vld [vmem:[#allocation2 + $0x1a88] sm:$0xff]  ;;  %v1774_v24 = vld [vmem:[#allocation2 + $0x1a98] sm:$0xff] }
 0x306   :  { %2224 = vmatprep.subr.bf16.mxu1 %v1684_v25  ;;  %2552 = vmatprep.subr.bf16.mxu0 %v1686_v28  ;;  %v1771_v25 = vld [vmem:[#allocation2 + $0x1a80] sm:$0xff]  ;;  %v1773_v28 = vld [vmem:[#allocation2 + $0x1a90] sm:$0xff] }
 0x309   :  { %2225 = vmatpush1.bf16.msra.mxu1 %v1683_v30  ;;  %2553 = vmatpush1.bf16.msra.mxu0 %v1685_v32  ;;  %v1780_v30 = vld [vmem:[#allocation2 + $0x1ac8] sm:$0xff]  ;;  %v1782_v32 = vld [vmem:[#allocation2 + $0x1ad8] sm:$0xff] }
 0x30a   :  { %2235 = vmatprep.subr.bf16.mxu1 %v1692_v33  ;;  %2563 = vmatprep.subr.bf16.mxu0 %v1694_v34  ;;  %v1779_v33 = vld [vmem:[#allocation2 + $0x1ac0] sm:$0xff]  ;;  %v1781_v34 = vld [vmem:[#allocation2 + $0x1ad0] sm:$0xff] }
 0x30c   :  { %2227 = vmatmul.mubr.bf16.vlgmr.msra.gmra.mrb[0].mxu1 %v4583_v11  ;;  %2555 = vmatmul.mubr.bf16.vlgmr.msra.gmra.mrb[4].mxu0 %v4583_v11 }
 0x30d   :  { %2236 = vmatpush1.bf16.msra.mxu1 %v1691_v38  ;;  %2564 = vmatpush1.bf16.msra.mxu0 %v1693_v40  ;;  %v1790_v38 = vld [vmem:[#allocation2 + $0x1b18] sm:$0xff]  ;;  %v1787_v40 = vld [vmem:[#allocation2 + $0x1b00] sm:$0xff] }
 0x30e   :  { %2237 = vmatprep.subr.bf16.mxu1 %v1700_v43  ;;  %2565 = vmatprep.subr.bf16.mxu0 %v1702_v44  ;;  %v1789_v43 = vld [vmem:[#allocation2 + $0x1b10] sm:$0xff]  ;;  %v1796_v44 = vld [vmem:[#allocation2 + $0x1b48] sm:$0xff] }
 0x30f   :  { %2267 = vmatprep.mubr.bf16.mxu1 %v4585_v49  ;;  %2595 = vmatprep.mubr.bf16.mxu0 %v4585_v49 }
 0x311   :  { %2238 = vmatpush1.bf16.msra.mxu1 %v1699_v10  ;;  %2566 = vmatpush1.bf16.msra.mxu0 %v1701_v14  ;;  %v1798_v10 = vld [vmem:[#allocation2 + $0x1b58] sm:$0xff]  ;;  %v1795_v14 = vld [vmem:[#allocation2 + $0x1b40] sm:$0xff] }
 0x312   :  { %2239 = vmatprep.subr.bf16.mxu1 %v1708_v20  ;;  %2567 = vmatprep.subr.bf16.mxu0 %v1710_v41  ;;  %v1797_v20 = vld [vmem:[#allocation2 + $0x1b50] sm:$0xff]  ;;  %v1804_v41 = vld [vmem:[#allocation2 + $0x1b88] sm:$0xff] }
 0x315   :  { %2240 = vmatpush1.bf16.msra.mxu1 %v1707_v52  ;;  %2568 = vmatpush1.bf16.msra.mxu0 %v1709_v22  ;;  %v1806_v52 = vld [vmem:[#allocation2 + $0x1b98] sm:$0xff]  ;;  %v874_v22 = vcombine.high %v4573_v18, %v4573_v18 }
 0x316   :  { %2241 = vmatprep.subr.bf16.mxu1 %v1716_v54  ;;  %2569 = vmatprep.subr.bf16.mxu0 %v1718_v55  ;;  %v1803_v54 = vld [vmem:[#allocation2 + $0x1b80] sm:$0xff]  ;;  %v1805_v55 = vld [vmem:[#allocation2 + $0x1b90] sm:$0xff] }
 0x319   :  { %2242 = vmatpush1.bf16.msra.mxu1 %v1715_v21  ;;  %2570 = vmatpush1.bf16.msra.mxu0 %v1717_v36  ;;  %v1812_v21 = vld [vmem:[#allocation2 + $0x1bc8] sm:$0xff]  ;;  %v1814_v36 = vld [vmem:[#allocation2 + $0x1bd8] sm:$0xff] }
 0x31a   :  { %2243 = vmatprep.subr.bf16.mxu1 %v1724_v57  ;;  %2571 = vmatprep.subr.bf16.mxu0 %v1726_v58  ;;  %v4594_v57 = vrot.slane %v874_v22, %v4464_v48  ;;  %v1811_v58 = vld [vmem:[#allocation2 + $0x1bc0] sm:$0xff]  ;;  %v1893_v22 = vld [vmem:[#allocation2 + $0x1e50] sm:$0xff] }
 0x31b   :  { %v1819_v48 = vld [vmem:[#allocation2 + $0x1c00] sm:$0xff] }
 0x31c   :  { %v890_v18 = vcombine.high %v4594_v57, %v4594_v57 }
 0x31d   :  { %2244 = vmatpush1.bf16.msra.mxu1 %v1723_v59  ;;  %2572 = vmatpush1.bf16.msra.mxu0 %v1725_v62  ;;  %v1813_v59 = vld [vmem:[#allocation2 + $0x1bd0] sm:$0xff]  ;;  %v1820_v62 = vld [vmem:[#allocation2 + $0x1c08] sm:$0xff] }
 0x31e   :  { %2245 = vmatprep.subr.bf16.mxu1 %v1732_v63  ;;  %2573 = vmatprep.subr.bf16.mxu0 %v1734_v42  ;;  %v1822_v63 = vld [vmem:[#allocation2 + $0x1c18] sm:$0xff]  ;;  %v4600_v42 = vpack.c.bf16 %v4577_v29, %v4577_v29  ;;  %v1827_v29 = vld [vmem:[#allocation2 + $0x1c40] sm:$0xff] }
 0x321   :  { %2246 = vmatpush1.bf16.msra.mxu1 %v1731_v45  ;;  %2574 = vmatpush1.bf16.msra.mxu0 %v1733_v39  ;;  %v1821_v45 = vld [vmem:[#allocation2 + $0x1c10] sm:$0xff]  ;;  %v1828_v39 = vld [vmem:[#allocation2 + $0x1c48] sm:$0xff] }
 0x322   :  { %2247 = vmatprep.subr.bf16.mxu1 %v1740_v2  ;;  %2575 = vmatprep.subr.bf16.mxu0 %v1742_v3  ;;  %v1830_v2 = vld [vmem:[#allocation2 + $0x1c58] sm:$0xff]  ;;  %v4602_v3 = vpack.c.bf16 %v890_v18, %v890_v18  ;;  %v1916_v18 = vld [vmem:[#allocation2 + $0x1f08] sm:$0xff] }
 0x325   :  { %2248 = vmatpush1.bf16.msra.mxu1 %v1739_v5  ;;  %2576 = vmatpush1.bf16.msra.mxu0 %v1741_v6  ;;  %v1829_v5 = vld [vmem:[#allocation2 + $0x1c50] sm:$0xff]  ;;  %v1836_v6 = vld [vmem:[#allocation2 + $0x1c88] sm:$0xff] }
 0x326   :  { %2249 = vmatprep.subr.bf16.mxu1 %v1748_v7  ;;  %2577 = vmatprep.subr.bf16.mxu0 %v1750_v60  ;;  %v1838_v7 = vld [vmem:[#allocation2 + $0x1c98] sm:$0xff]  ;;  %v1835_v60 = vld [vmem:[#allocation2 + $0x1c80] sm:$0xff] }
 0x329   :  { %2250 = vmatpush1.bf16.msra.mxu1 %v1747_v26  ;;  %2578 = vmatpush1.bf16.msra.mxu0 %v1749_v27  ;;  %v1837_v26 = vld [vmem:[#allocation2 + $0x1c90] sm:$0xff]  ;;  %v1844_v27 = vld [vmem:[#allocation2 + $0x1cc8] sm:$0xff] }
 0x32a   :  { %2251 = vmatprep.subr.bf16.mxu1 %v1756_v4  ;;  %2579 = vmatprep.subr.bf16.mxu0 %v1758_v51  ;;  %v1846_v4 = vld [vmem:[#allocation2 + $0x1cd8] sm:$0xff]  ;;  %v1843_v51 = vld [vmem:[#allocation2 + $0x1cc0] sm:$0xff] }
 0x32d   :  { %2252 = vmatpush1.bf16.msra.mxu1 %v1755_v9  ;;  %2580 = vmatpush1.bf16.msra.mxu0 %v1757_v1  ;;  %v1845_v9 = vld [vmem:[#allocation2 + $0x1cd0] sm:$0xff]  ;;  %v1852_v1 = vld [vmem:[#allocation2 + $0x1d08] sm:$0xff] }
 0x32e   :  { %2253 = vmatprep.subr.bf16.mxu1 %v1764_v12  ;;  %2581 = vmatprep.subr.bf16.mxu0 %v1766_v13  ;;  %v1854_v12 = vld [vmem:[#allocation2 + $0x1d18] sm:$0xff]  ;;  %v1851_v13 = vld [vmem:[#allocation2 + $0x1d00] sm:$0xff] }
 0x331   :  { %2254 = vmatpush1.bf16.msra.mxu1 %v1763_v56  ;;  %2582 = vmatpush1.bf16.msra.mxu0 %v1765_v17  ;;  %v1853_v56 = vld [vmem:[#allocation2 + $0x1d10] sm:$0xff]  ;;  %v1860_v17 = vld [vmem:[#allocation2 + $0x1d48] sm:$0xff] }
 0x332   :  { %2255 = vmatprep.subr.bf16.mxu1 %v1772_v19  ;;  %2583 = vmatprep.subr.bf16.mxu0 %v1774_v24  ;;  %v1862_v19 = vld [vmem:[#allocation2 + $0x1d58] sm:$0xff]  ;;  %v1859_v24 = vld [vmem:[#allocation2 + $0x1d40] sm:$0xff] }
 0x335   :  { %2256 = vmatpush1.bf16.msra.mxu1 %v1771_v25  ;;  %2584 = vmatpush1.bf16.msra.mxu0 %v1773_v28  ;;  %v1861_v25 = vld [vmem:[#allocation2 + $0x1d50] sm:$0xff]  ;;  %v1868_v28 = vld [vmem:[#allocation2 + $0x1d88] sm:$0xff] }
 0x336   :  { %2257 = vmatprep.subr.bf16.mxu1 %v1780_v30  ;;  %2585 = vmatprep.subr.bf16.mxu0 %v1782_v32  ;;  %v1870_v30 = vld [vmem:[#allocation2 + $0x1d98] sm:$0xff]  ;;  %v1867_v32 = vld [vmem:[#allocation2 + $0x1d80] sm:$0xff] }
 0x339   :  { %2258 = vmatpush1.bf16.msra.mxu1 %v1779_v33  ;;  %2586 = vmatpush1.bf16.msra.mxu0 %v1781_v34  ;;  %v1869_v33 = vld [vmem:[#allocation2 + $0x1d90] sm:$0xff]  ;;  %v1876_v34 = vld [vmem:[#allocation2 + $0x1dc8] sm:$0xff] }
 0x33a   :  { %2259 = vmatprep.subr.bf16.mxu1 %v1788_v35  ;;  %2587 = vmatprep.subr.bf16.mxu0 %v1790_v38  ;;  %v1878_v35 = vld [vmem:[#allocation2 + $0x1dd8] sm:$0xff]  ;;  %v1875_v38 = vld [vmem:[#allocation2 + $0x1dc0] sm:$0xff] }
 0x33d   :  { %2260 = vmatpush1.bf16.msra.mxu1 %v1787_v40  ;;  %2588 = vmatpush1.bf16.msra.mxu0 %v1789_v43  ;;  %v1877_v40 = vld [vmem:[#allocation2 + $0x1dd0] sm:$0xff]  ;;  %v1884_v43 = vld [vmem:[#allocation2 + $0x1e08] sm:$0xff] }
 0x33e   :  { %2261 = vmatprep.subr.bf16.mxu1 %v1796_v44  ;;  %2589 = vmatprep.subr.bf16.mxu0 %v1798_v10  ;;  %v1886_v44 = vld [vmem:[#allocation2 + $0x1e18] sm:$0xff]  ;;  %v1883_v10 = vld [vmem:[#allocation2 + $0x1e00] sm:$0xff] }
 0x341   :  { %2262 = vmatpush1.bf16.msra.mxu1 %v1795_v14  ;;  %2590 = vmatpush1.bf16.msra.mxu0 %v1797_v20  ;;  %v1885_v14 = vld [vmem:[#allocation2 + $0x1e10] sm:$0xff]  ;;  %v1892_v20 = vld [vmem:[#allocation2 + $0x1e48] sm:$0xff] }
 0x342   :  { %2263 = vmatprep.subr.bf16.mxu1 %v1804_v41  ;;  %2591 = vmatprep.subr.bf16.mxu0 %v1806_v52  ;;  %v1894_v41 = vld [vmem:[#allocation2 + $0x1e58] sm:$0xff]  ;;  %v1891_v52 = vld [vmem:[#allocation2 + $0x1e40] sm:$0xff] }
 0x345   :  { %2264 = vmatpush1.bf16.msra.mxu1 %v1803_v54  ;;  %2592 = vmatpush1.bf16.msra.mxu0 %v1805_v55  ;;  %v1900_v54 = vld [vmem:[#allocation2 + $0x1e88] sm:$0xff]  ;;  %v1902_v55 = vld [vmem:[#allocation2 + $0x1e98] sm:$0xff] }
 0x346   :  { %2265 = vmatprep.subr.bf16.mxu1 %v1812_v21  ;;  %2593 = vmatprep.subr.bf16.mxu0 %v1814_v36  ;;  %v1899_v21 = vld [vmem:[#allocation2 + $0x1e80] sm:$0xff]  ;;  %v1901_v36 = vld [vmem:[#allocation2 + $0x1e90] sm:$0xff] }
 0x349   :  { %2266 = vmatpush1.bf16.msra.mxu1 %v1811_v58  ;;  %2594 = vmatpush1.bf16.msra.mxu0 %v1813_v59  ;;  %v1908_v58 = vld [vmem:[#allocation2 + $0x1ec8] sm:$0xff]  ;;  %v1910_v59 = vld [vmem:[#allocation2 + $0x1ed8] sm:$0xff] }
 0x34a   :  { %2276 = vmatprep.subr.bf16.mxu1 %v1820_v62  ;;  %2604 = vmatprep.subr.bf16.mxu0 %v1822_v63  ;;  %v1907_v62 = vld [vmem:[#allocation2 + $0x1ec0] sm:$0xff]  ;;  %v1909_v63 = vld [vmem:[#allocation2 + $0x1ed0] sm:$0xff] }
 0x34c   :  { %2268 = vmatmul.mubr.bf16.vlgmr.msra.gmra.mrb[0].mxu1 %v4600_v42  ;;  %2596 = vmatmul.mubr.bf16.vlgmr.msra.gmra.mrb[4].mxu0 %v4600_v42 }
 0x34d   :  { %2277 = vmatpush1.bf16.msra.mxu1 %v1819_v48  ;;  %2605 = vmatpush1.bf16.msra.mxu0 %v1821_v45  ;;  %v1918_v48 = vld [vmem:[#allocation2 + $0x1f18] sm:$0xff]  ;;  %v1915_v45 = vld [vmem:[#allocation2 + $0x1f00] sm:$0xff] }
 0x34e   :  { %2278 = vmatprep.subr.bf16.mxu1 %v1828_v39  ;;  %2606 = vmatprep.subr.bf16.mxu0 %v1830_v2  ;;  %v1917_v39 = vld [vmem:[#allocation2 + $0x1f10] sm:$0xff]  ;;  %v1924_v2 = vld [vmem:[#allocation2 + $0x1f48] sm:$0xff] }
 0x34f   :  { %2308 = vmatprep.mubr.bf16.mxu1 %v4602_v3  ;;  %2636 = vmatprep.mubr.bf16.mxu0 %v4602_v3 }
 0x351   :  { %2279 = vmatpush1.bf16.msra.mxu1 %v1827_v29  ;;  %2607 = vmatpush1.bf16.msra.mxu0 %v1829_v5  ;;  %v1926_v29 = vld [vmem:[#allocation2 + $0x1f58] sm:$0xff]  ;;  %v1923_v5 = vld [vmem:[#allocation2 + $0x1f40] sm:$0xff] }
 0x352   :  { %2280 = vmatprep.subr.bf16.mxu1 %v1836_v6  ;;  %2608 = vmatprep.subr.bf16.mxu0 %v1838_v7  ;;  %v1925_v6 = vld [vmem:[#allocation2 + $0x1f50] sm:$0xff]  ;;  %v1932_v7 = vld [vmem:[#allocation2 + $0x1f88] sm:$0xff] }
 0x355   :  { %2281 = vmatpush1.bf16.msra.mxu1 %v1835_v60  ;;  %2609 = vmatpush1.bf16.msra.mxu0 %v1837_v26  ;;  %v1934_v60 = vld [vmem:[#allocation2 + $0x1f98] sm:$0xff]  ;;  %v1931_v26 = vld [vmem:[#allocation2 + $0x1f80] sm:$0xff] }
 0x356   :  { %2282 = vmatprep.subr.bf16.mxu1 %v1844_v27  ;;  %2610 = vmatprep.subr.bf16.mxu0 %v1846_v4  ;;  %v1933_v27 = vld [vmem:[#allocation2 + $0x1f90] sm:$0xff]  ;;  %v1940_v4 = vld [vmem:[#allocation2 + $0x1fc8] sm:$0xff] }
 0x359   :  { %2283 = vmatpush1.bf16.msra.mxu1 %v1843_v51  ;;  %2611 = vmatpush1.bf16.msra.mxu0 %v1845_v9  ;;  %v1942_v51 = vld [vmem:[#allocation2 + $0x1fd8] sm:$0xff]  ;;  %v1939_v9 = vld [vmem:[#allocation2 + $0x1fc0] sm:$0xff] }
 0x35a   :  { %2284 = vmatprep.subr.bf16.mxu1 %v1852_v1  ;;  %2612 = vmatprep.subr.bf16.mxu0 %v1854_v12  ;;  %v1941_v1 = vld [vmem:[#allocation2 + $0x1fd0] sm:$0xff]  ;;  %v928_v12 = vld [vmem:[#allocation2 + $0x28] sm:$0xff] }
 0x35d   :  { %2285 = vmatpush1.bf16.msra.mxu1 %v1851_v13  ;;  %2613 = vmatpush1.bf16.msra.mxu0 %v1853_v56  ;;  %v930_v13 = vld [vmem:[#allocation2 + $0x38] sm:$0xff]  ;;  %v4610_v56 = vpack.c.bf16 %v4594_v57, %v4594_v57  ;;  %v944_v57 = vld [vmem:[#allocation2 + $0xa8] sm:$0xff] }
 0x35e   :  { %2286 = vmatprep.subr.bf16.mxu1 %v1860_v17  ;;  %2614 = vmatprep.subr.bf16.mxu0 %v1862_v19  ;;  %v927_v17 = vld [vmem:[#allocation2 + $0x20] sm:$0xff]  ;;  %v929_v19 = vld [vmem:[#allocation2 + $0x30] sm:$0xff] }
 0x361   :  { %2287 = vmatpush1.bf16.msra.mxu1 %v1859_v24  ;;  %2615 = vmatpush1.bf16.msra.mxu0 %v1861_v25  ;;  %v936_v24 = vld [vmem:[#allocation2 + $0x68] sm:$0xff]  ;;  %v938_v25 = vld [vmem:[#allocation2 + $0x78] sm:$0xff] }
 0x362   :  { %2288 = vmatprep.subr.bf16.mxu1 %v1868_v28  ;;  %2616 = vmatprep.subr.bf16.mxu0 %v1870_v30  ;;  %v935_v28 = vld [vmem:[#allocation2 + $0x60] sm:$0xff]  ;;  %v937_v30 = vld [vmem:[#allocation2 + $0x70] sm:$0xff] }
 0x365   :  { %2289 = vmatpush1.bf16.msra.mxu1 %v1867_v32  ;;  %2617 = vmatpush1.bf16.msra.mxu0 %v1869_v33  ;;  %v946_v32 = vld [vmem:[#allocation2 + $0xb8] sm:$0xff]  ;;  %v943_v33 = vld [vmem:[#allocation2 + $0xa0] sm:$0xff] }
 0x366   :  { %2290 = vmatprep.subr.bf16.mxu1 %v1876_v34  ;;  %2618 = vmatprep.subr.bf16.mxu0 %v1878_v35  ;;  %v945_v34 = vld [vmem:[#allocation2 + $0xb0] sm:$0xff]  ;;  %v952_v35 = vld [vmem:[#allocation2 + $0xe8] sm:$0xff] }
 0x369   :  { %2291 = vmatpush1.bf16.msra.mxu1 %v1875_v38  ;;  %2619 = vmatpush1.bf16.msra.mxu0 %v1877_v40  ;;  %v954_v38 = vld [vmem:[#allocation2 + $0xf8] sm:$0xff]  ;;  %v951_v40 = vld [vmem:[#allocation2 + $0xe0] sm:$0xff] }
 0x36a   :  { %2292 = vmatprep.subr.bf16.mxu1 %v1884_v43  ;;  %2620 = vmatprep.subr.bf16.mxu0 %v1886_v44  ;;  %v953_v43 = vld [vmem:[#allocation2 + $0xf0] sm:$0xff]  ;;  %v960_v44 = vld [vmem:[#allocation2 + $0x128] sm:$0xff] }
 0x36d   :  { %2293 = vmatpush1.bf16.msra.mxu1 %v1883_v10  ;;  %2621 = vmatpush1.bf16.msra.mxu0 %v1885_v14  ;;  %v962_v10 = vld [vmem:[#allocation2 + $0x138] sm:$0xff]  ;;  %v961_v14 = vld [vmem:[#allocation2 + $0x130] sm:$0xff] }
 0x36e   :  { %2294 = vmatprep.subr.bf16.mxu1 %v1892_v20  ;;  %2622 = vmatprep.subr.bf16.mxu0 %v1894_v41  ;;  %v968_v20 = vld [vmem:[#allocation2 + $0x168] sm:$0xff]  ;;  %v970_v41 = vld [vmem:[#allocation2 + $0x178] sm:$0xff] }
 0x371   :  { %2295 = vmatpush1.bf16.msra.mxu1 %v1891_v52  ;;  %2623 = vmatpush1.bf16.msra.mxu0 %v1893_v22  ;;  %v967_v52 = vld [vmem:[#allocation2 + $0x160] sm:$0xff]  ;;  %v969_v22 = vld [vmem:[#allocation2 + $0x170] sm:$0xff] }
 0x372   :  { %2296 = vmatprep.subr.bf16.mxu1 %v1900_v54  ;;  %2624 = vmatprep.subr.bf16.mxu0 %v1902_v55  ;;  %v976_v54 = vld [vmem:[#allocation2 + $0x1a8] sm:$0xff]  ;;  %v978_v55 = vld [vmem:[#allocation2 + $0x1b8] sm:$0xff] }
 0x375   :  { %2297 = vmatpush1.bf16.msra.mxu1 %v1899_v21  ;;  %2625 = vmatpush1.bf16.msra.mxu0 %v1901_v36  ;;  %v975_v21 = vld [vmem:[#allocation2 + $0x1a0] sm:$0xff]  ;;  %v977_v36 = vld [vmem:[#allocation2 + $0x1b0] sm:$0xff] }
 0x376   :  { %2298 = vmatprep.subr.bf16.mxu1 %v1908_v58  ;;  %2626 = vmatprep.subr.bf16.mxu0 %v1910_v59  ;;  %v984_v58 = vld [vmem:[#allocation2 + $0x1e8] sm:$0xff]  ;;  %v986_v59 = vld [vmem:[#allocation2 + $0x1f8] sm:$0xff] }
 0x379   :  { %2299 = vmatpush1.bf16.msra.mxu1 %v1907_v62  ;;  %2627 = vmatpush1.bf16.msra.mxu0 %v1909_v63  ;;  %v983_v62 = vld [vmem:[#allocation2 + $0x1e0] sm:$0xff]  ;;  %v985_v63 = vld [vmem:[#allocation2 + $0x1f0] sm:$0xff] }
 0x37a   :  { %2300 = vmatprep.subr.bf16.mxu1 %v1916_v18  ;;  %2628 = vmatprep.subr.bf16.mxu0 %v1918_v48  ;;  %v992_v18 = vld [vmem:[#allocation2 + $0x228] sm:$0xff]  ;;  %v994_v48 = vld [vmem:[#allocation2 + $0x238] sm:$0xff] }
 0x37d   :  { %2301 = vmatpush1.bf16.msra.mxu1 %v1915_v45  ;;  %2629 = vmatpush1.bf16.msra.mxu0 %v1917_v39  ;;  %v991_v45 = vld [vmem:[#allocation2 + $0x220] sm:$0xff]  ;;  %v993_v39 = vld [vmem:[#allocation2 + $0x230] sm:$0xff] }
 0x37e   :  { %2302 = vmatprep.subr.bf16.mxu1 %v1924_v2  ;;  %2630 = vmatprep.subr.bf16.mxu0 %v1926_v29  ;;  %v1000_v2 = vld [vmem:[#allocation2 + $0x268] sm:$0xff]  ;;  %v1002_v29 = vld [vmem:[#allocation2 + $0x278] sm:$0xff] }
 0x381   :  { %2303 = vmatpush1.bf16.msra.mxu1 %v1923_v5  ;;  %2631 = vmatpush1.bf16.msra.mxu0 %v1925_v6  ;;  %v999_v5 = vld [vmem:[#allocation2 + $0x260] sm:$0xff]  ;;  %v1001_v6 = vld [vmem:[#allocation2 + $0x270] sm:$0xff] }
 0x382   :  { %2304 = vmatprep.subr.bf16.mxu1 %v1932_v7  ;;  %2632 = vmatprep.subr.bf16.mxu0 %v1934_v60  ;;  %v1008_v7 = vld [vmem:[#allocation2 + $0x2a8] sm:$0xff]  ;;  %v1010_v60 = vld [vmem:[#allocation2 + $0x2b8] sm:$0xff] }
 0x385   :  { %2305 = vmatpush1.bf16.msra.mxu1 %v1931_v26  ;;  %2633 = vmatpush1.bf16.msra.mxu0 %v1933_v27  ;;  %v1007_v26 = vld [vmem:[#allocation2 + $0x2a0] sm:$0xff]  ;;  %v1009_v27 = vld [vmem:[#allocation2 + $0x2b0] sm:$0xff] }
 0x386   :  { %2306 = vmatprep.subr.bf16.mxu1 %v1940_v4  ;;  %2634 = vmatprep.subr.bf16.mxu0 %v1942_v51  ;;  %v1016_v4 = vld [vmem:[#allocation2 + $0x2e8] sm:$0xff]  ;;  %v1018_v51 = vld [vmem:[#allocation2 + $0x2f8] sm:$0xff] }
 0x389   :  { %2307 = vmatpush1.bf16.msra.mxu1 %v1939_v9  ;;  %2635 = vmatpush1.bf16.msra.mxu0 %v1941_v1  ;;  %v1015_v9 = vld [vmem:[#allocation2 + $0x2e0] sm:$0xff]  ;;  %v1017_v1 = vld [vmem:[#allocation2 + $0x2f0] sm:$0xff] }
 0x38a   :  { %2645 = vmatprep.subr.bf16.mxu1 %v928_v12  ;;  %2973 = vmatprep.subr.bf16.mxu0 %v930_v13  ;;  %v1024_v12 = vld [vmem:[#allocation2 + $0x328] sm:$0xff]  ;;  %v1026_v13 = vld [vmem:[#allocation2 + $0x338] sm:$0xff] }
 0x38c   :  { %2309 = vmatmul.mubr.bf16.vlgmr.msra.gmra.mrb[0].mxu1 %v4610_v56  ;;  %2637 = vmatmul.mubr.bf16.vlgmr.msra.gmra.mrb[4].mxu0 %v4610_v56 }
 0x38d   :  { %2646 = vmatpush1.bf16.msra.mxu1 %v927_v17  ;;  %2974 = vmatpush1.bf16.msra.mxu0 %v929_v19  ;;  %v1023_v17 = vld [vmem:[#allocation2 + $0x320] sm:$0xff]  ;;  %v1025_v19 = vld [vmem:[#allocation2 + $0x330] sm:$0xff] }
 0x38e   :  { %2647 = vmatprep.subr.bf16.mxu1 %v936_v24  ;;  %2975 = vmatprep.subr.bf16.mxu0 %v938_v25  ;;  %v1032_v24 = vld [vmem:[#allocation2 + $0x368] sm:$0xff]  ;;  %v1034_v25 = vld [vmem:[#allocation2 + $0x378] sm:$0xff] }
 0x38f   :  { %2677 = vmatprep.mubr.bf16.mxu1 %v4482_v47  ;;  %3005 = vmatprep.mubr.bf16.mxu0 %v4482_v47  ;;  %v959_v47 = vld [vmem:[#allocation2 + $0x120] sm:$0xff] }
 0x391   :  { %2648 = vmatpush1.bf16.msra.mxu1 %v935_v28  ;;  %2976 = vmatpush1.bf16.msra.mxu0 %v937_v30  ;;  %v1031_v28 = vld [vmem:[#allocation2 + $0x360] sm:$0xff]  ;;  %v1033_v30 = vld [vmem:[#allocation2 + $0x370] sm:$0xff] }
 0x392   :  { %2649 = vmatprep.subr.bf16.mxu1 %v944_v57  ;;  %2977 = vmatprep.subr.bf16.mxu0 %v946_v32  ;;  %v1040_v57 = vld [vmem:[#allocation2 + $0x3a8] sm:$0xff]  ;;  %v1042_v32 = vld [vmem:[#allocation2 + $0x3b8] sm:$0xff] }
 0x395   :  { %2650 = vmatpush1.bf16.msra.mxu1 %v943_v33  ;;  %2978 = vmatpush1.bf16.msra.mxu0 %v945_v34  ;;  %v1039_v33 = vld [vmem:[#allocation2 + $0x3a0] sm:$0xff]  ;;  %v1041_v34 = vld [vmem:[#allocation2 + $0x3b0] sm:$0xff] }
 0x396   :  { %2651 = vmatprep.subr.bf16.mxu1 %v952_v35  ;;  %2979 = vmatprep.subr.bf16.mxu0 %v954_v38  ;;  %v1048_v35 = vld [vmem:[#allocation2 + $0x3e8] sm:$0xff]  ;;  %v1050_v38 = vld [vmem:[#allocation2 + $0x3f8] sm:$0xff] }
 0x399   :  { %2652 = vmatpush1.bf16.msra.mxu1 %v951_v40  ;;  %2980 = vmatpush1.bf16.msra.mxu0 %v953_v43  ;;  %v1047_v40 = vld [vmem:[#allocation2 + $0x3e0] sm:$0xff]  ;;  %v1049_v43 = vld [vmem:[#allocation2 + $0x3f0] sm:$0xff] }
 0x39a   :  { %2653 = vmatprep.subr.bf16.mxu1 %v960_v44  ;;  %2981 = vmatprep.subr.bf16.mxu0 %v962_v10  ;;  %v1056_v44 = vld [vmem:[#allocation2 + $0x428] sm:$0xff]  ;;  %v1058_v10 = vld [vmem:[#allocation2 + $0x438] sm:$0xff] }
 0x39d   :  { %2654 = vmatpush1.bf16.msra.mxu1 %v959_v47  ;;  %2982 = vmatpush1.bf16.msra.mxu0 %v961_v14  ;;  %v1055_v47 = vld [vmem:[#allocation2 + $0x420] sm:$0xff]  ;;  %v1057_v14 = vld [vmem:[#allocation2 + $0x430] sm:$0xff] }
 0x39e   :  { %2655 = vmatprep.subr.bf16.mxu1 %v968_v20  ;;  %2983 = vmatprep.subr.bf16.mxu0 %v970_v41  ;;  %v1064_v20 = vld [vmem:[#allocation2 + $0x468] sm:$0xff]  ;;  %v1066_v41 = vld [vmem:[#allocation2 + $0x478] sm:$0xff] }
 0x3a1   :  { %2656 = vmatpush1.bf16.msra.mxu1 %v967_v52  ;;  %2984 = vmatpush1.bf16.msra.mxu0 %v969_v22  ;;  %v1063_v52 = vld [vmem:[#allocation2 + $0x460] sm:$0xff]  ;;  %v1065_v22 = vld [vmem:[#allocation2 + $0x470] sm:$0xff] }
 0x3a2   :  { %2657 = vmatprep.subr.bf16.mxu1 %v976_v54  ;;  %2985 = vmatprep.subr.bf16.mxu0 %v978_v55  ;;  %v1072_v54 = vld [vmem:[#allocation2 + $0x4a8] sm:$0xff]  ;;  %v1074_v55 = vld [vmem:[#allocation2 + $0x4b8] sm:$0xff] }
 0x3a5   :  { %2658 = vmatpush1.bf16.msra.mxu1 %v975_v21  ;;  %2986 = vmatpush1.bf16.msra.mxu0 %v977_v36  ;;  %v1071_v21 = vld [vmem:[#allocation2 + $0x4a0] sm:$0xff]  ;;  %v1073_v36 = vld [vmem:[#allocation2 + $0x4b0] sm:$0xff] }
 0x3a6   :  { %2659 = vmatprep.subr.bf16.mxu1 %v984_v58  ;;  %2987 = vmatprep.subr.bf16.mxu0 %v986_v59  ;;  %v1080_v58 = vld [vmem:[#allocation2 + $0x4e8] sm:$0xff]  ;;  %v1079_v59 = vld [vmem:[#allocation2 + $0x4e0] sm:$0xff] }
 0x3a9   :  { %2660 = vmatpush1.bf16.msra.mxu1 %v983_v62  ;;  %2988 = vmatpush1.bf16.msra.mxu0 %v985_v63  ;;  %v1081_v62 = vld [vmem:[#allocation2 + $0x4f0] sm:$0xff]  ;;  %v1088_v63 = vld [vmem:[#allocation2 + $0x528] sm:$0xff] }
 0x3aa   :  { %2661 = vmatprep.subr.bf16.mxu1 %v992_v18  ;;  %2989 = vmatprep.subr.bf16.mxu0 %v994_v48  ;;  %v1090_v18 = vld [vmem:[#allocation2 + $0x538] sm:$0xff]  ;;  %v1089_v48 = vld [vmem:[#allocation2 + $0x530] sm:$0xff] }
 0x3ad   :  { %2662 = vmatpush1.bf16.msra.mxu1 %v991_v45  ;;  %2990 = vmatpush1.bf16.msra.mxu0 %v993_v39  ;;  %v1096_v45 = vld [vmem:[#allocation2 + $0x568] sm:$0xff]  ;;  %v1098_v39 = vld [vmem:[#allocation2 + $0x578] sm:$0xff] }
 0x3ae   :  { %2663 = vmatprep.subr.bf16.mxu1 %v1000_v2  ;;  %2991 = vmatprep.subr.bf16.mxu0 %v1002_v29  ;;  %v1095_v2 = vld [vmem:[#allocation2 + $0x560] sm:$0xff]  ;;  %v1097_v29 = vld [vmem:[#allocation2 + $0x570] sm:$0xff] }
 0x3b1   :  { %2664 = vmatpush1.bf16.msra.mxu1 %v999_v5  ;;  %2992 = vmatpush1.bf16.msra.mxu0 %v1001_v6  ;;  %v1104_v5 = vld [vmem:[#allocation2 + $0x5a8] sm:$0xff]  ;;  %v1106_v6 = vld [vmem:[#allocation2 + $0x5b8] sm:$0xff] }
 0x3b2   :  { %2665 = vmatprep.subr.bf16.mxu1 %v1008_v7  ;;  %2993 = vmatprep.subr.bf16.mxu0 %v1010_v60  ;;  %v1103_v7 = vld [vmem:[#allocation2 + $0x5a0] sm:$0xff]  ;;  %v1105_v60 = vld [vmem:[#allocation2 + $0x5b0] sm:$0xff] }
 0x3b5   :  { %2666 = vmatpush1.bf16.msra.mxu1 %v1007_v26  ;;  %2994 = vmatpush1.bf16.msra.mxu0 %v1009_v27  ;;  %v1112_v26 = vld [vmem:[#allocation2 + $0x5e8] sm:$0xff]  ;;  %v1114_v27 = vld [vmem:[#allocation2 + $0x5f8] sm:$0xff] }
 0x3b6   :  { %2667 = vmatprep.subr.bf16.mxu1 %v1016_v4  ;;  %2995 = vmatprep.subr.bf16.mxu0 %v1018_v51  ;;  %v1111_v4 = vld [vmem:[#allocation2 + $0x5e0] sm:$0xff]  ;;  %v1113_v51 = vld [vmem:[#allocation2 + $0x5f0] sm:$0xff] }
 0x3b9   :  { %2668 = vmatpush1.bf16.msra.mxu1 %v1015_v9  ;;  %2996 = vmatpush1.bf16.msra.mxu0 %v1017_v1  ;;  %v1120_v9 = vld [vmem:[#allocation2 + $0x628] sm:$0xff]  ;;  %v1122_v1 = vld [vmem:[#allocation2 + $0x638] sm:$0xff] }
 0x3ba   :  { %2669 = vmatprep.subr.bf16.mxu1 %v1024_v12  ;;  %2997 = vmatprep.subr.bf16.mxu0 %v1026_v13  ;;  %v1119_v12 = vld [vmem:[#allocation2 + $0x620] sm:$0xff]  ;;  %v1121_v13 = vld [vmem:[#allocation2 + $0x630] sm:$0xff] }
 0x3bd   :  { %2670 = vmatpush1.bf16.msra.mxu1 %v1023_v17  ;;  %2998 = vmatpush1.bf16.msra.mxu0 %v1025_v19  ;;  %v1128_v17 = vld [vmem:[#allocation2 + $0x668] sm:$0xff]  ;;  %v1130_v19 = vld [vmem:[#allocation2 + $0x678] sm:$0xff] }
 0x3be   :  { %2671 = vmatprep.subr.bf16.mxu1 %v1032_v24  ;;  %2999 = vmatprep.subr.bf16.mxu0 %v1034_v25  ;;  %v1127_v24 = vld [vmem:[#allocation2 + $0x660] sm:$0xff]  ;;  %v1129_v25 = vld [vmem:[#allocation2 + $0x670] sm:$0xff] }
 0x3c1   :  { %2672 = vmatpush1.bf16.msra.mxu1 %v1031_v28  ;;  %3000 = vmatpush1.bf16.msra.mxu0 %v1033_v30  ;;  %v1136_v28 = vld [vmem:[#allocation2 + $0x6a8] sm:$0xff]  ;;  %v1138_v30 = vld [vmem:[#allocation2 + $0x6b8] sm:$0xff] }
 0x3c2   :  { %2673 = vmatprep.subr.bf16.mxu1 %v1040_v57  ;;  %3001 = vmatprep.subr.bf16.mxu0 %v1042_v32  ;;  %v1135_v57 = vld [vmem:[#allocation2 + $0x6a0] sm:$0xff]  ;;  %v1137_v32 = vld [vmem:[#allocation2 + $0x6b0] sm:$0xff] }
 0x3c5   :  { %2674 = vmatpush1.bf16.msra.mxu1 %v1039_v33  ;;  %3002 = vmatpush1.bf16.msra.mxu0 %v1041_v34  ;;  %v1144_v33 = vld [vmem:[#allocation2 + $0x6e8] sm:$0xff]  ;;  %v1146_v34 = vld [vmem:[#allocation2 + $0x6f8] sm:$0xff] }
 0x3c6   :  { %2675 = vmatprep.subr.bf16.mxu1 %v1048_v35  ;;  %3003 = vmatprep.subr.bf16.mxu0 %v1050_v38  ;;  %v1143_v35 = vld [vmem:[#allocation2 + $0x6e0] sm:$0xff]  ;;  %v1145_v38 = vld [vmem:[#allocation2 + $0x6f0] sm:$0xff] }
 0x3c9   :  { %2676 = vmatpush1.bf16.msra.mxu1 %v1047_v40  ;;  %3004 = vmatpush1.bf16.msra.mxu0 %v1049_v43  ;;  %v1152_v40 = vld [vmem:[#allocation2 + $0x728] sm:$0xff]  ;;  %v1154_v43 = vld [vmem:[#allocation2 + $0x738] sm:$0xff] }
 0x3ca   :  { %2686 = vmatprep.subr.bf16.mxu1 %v1056_v44  ;;  %3014 = vmatprep.subr.bf16.mxu0 %v1058_v10  ;;  %v1151_v44 = vld [vmem:[#allocation2 + $0x720] sm:$0xff]  ;;  %v1153_v10 = vld [vmem:[#allocation2 + $0x730] sm:$0xff] }
 0x3cc   :  { %2678 = vmatmul.mubr.bf16.vlgmr.msra.gmra.mrb[4].mxu1 %v4495_v16  ;;  %3006 = vmatmul.mubr.bf16.vlgmr.msra.gmra.mrb[8].mxu0 %v4495_v16  ;;  %v1082_v16 = vld [vmem:[#allocation2 + $0x4f8] sm:$0xff] }
 0x3cd   :  { %2687 = vmatpush1.bf16.msra.mxu1 %v1055_v47  ;;  %3015 = vmatpush1.bf16.msra.mxu0 %v1057_v14  ;;  %v1160_v47 = vld [vmem:[#allocation2 + $0x768] sm:$0xff]  ;;  %v1162_v14 = vld [vmem:[#allocation2 + $0x778] sm:$0xff] }
 0x3ce   :  { %2688 = vmatprep.subr.bf16.mxu1 %v1064_v20  ;;  %3016 = vmatprep.subr.bf16.mxu0 %v1066_v41  ;;  %v1159_v20 = vld [vmem:[#allocation2 + $0x760] sm:$0xff]  ;;  %v1161_v41 = vld [vmem:[#allocation2 + $0x770] sm:$0xff] }
 0x3cf   :  { %2718 = vmatprep.mubr.bf16.mxu1 %v4497_v23  ;;  %3046 = vmatprep.mubr.bf16.mxu0 %v4497_v23  ;;  %v1087_v23 = vld [vmem:[#allocation2 + $0x520] sm:$0xff] }
 0x3d1   :  { %2689 = vmatpush1.bf16.msra.mxu1 %v1063_v52  ;;  %3017 = vmatpush1.bf16.msra.mxu0 %v1065_v22  ;;  %v1168_v52 = vld [vmem:[#allocation2 + $0x7a8] sm:$0xff]  ;;  %v1170_v22 = vld [vmem:[#allocation2 + $0x7b8] sm:$0xff] }
 0x3d2   :  { %2690 = vmatprep.subr.bf16.mxu1 %v1072_v54  ;;  %3018 = vmatprep.subr.bf16.mxu0 %v1074_v55  ;;  %v1167_v54 = vld [vmem:[#allocation2 + $0x7a0] sm:$0xff]  ;;  %v1169_v55 = vld [vmem:[#allocation2 + $0x7b0] sm:$0xff] }
 0x3d5   :  { %2691 = vmatpush1.bf16.msra.mxu1 %v1071_v21  ;;  %3019 = vmatpush1.bf16.msra.mxu0 %v1073_v36  ;;  %v1176_v21 = vld [vmem:[#allocation2 + $0x7e8] sm:$0xff]  ;;  %v1178_v36 = vld [vmem:[#allocation2 + $0x7f8] sm:$0xff] }
 0x3d6   :  { %2692 = vmatprep.subr.bf16.mxu1 %v1080_v58  ;;  %3020 = vmatprep.subr.bf16.mxu0 %v1082_v16  ;;  %v1175_v58 = vld [vmem:[#allocation2 + $0x7e0] sm:$0xff]  ;;  %v1177_v16 = vld [vmem:[#allocation2 + $0x7f0] sm:$0xff] }
 0x3d9   :  { %2693 = vmatpush1.bf16.msra.mxu1 %v1079_v59  ;;  %3021 = vmatpush1.bf16.msra.mxu0 %v1081_v62  ;;  %v1184_v59 = vld [vmem:[#allocation2 + $0x828] sm:$0xff]  ;;  %v1186_v62 = vld [vmem:[#allocation2 + $0x838] sm:$0xff] }
 0x3da   :  { %2694 = vmatprep.subr.bf16.mxu1 %v1088_v63  ;;  %3022 = vmatprep.subr.bf16.mxu0 %v1090_v18  ;;  %v1183_v63 = vld [vmem:[#allocation2 + $0x820] sm:$0xff]  ;;  %v1185_v18 = vld [vmem:[#allocation2 + $0x830] sm:$0xff] }
 0x3dd   :  { %2695 = vmatpush1.bf16.msra.mxu1 %v1087_v23  ;;  %3023 = vmatpush1.bf16.msra.mxu0 %v1089_v48  ;;  %v1192_v23 = vld [vmem:[#allocation2 + $0x868] sm:$0xff]  ;;  %v1194_v48 = vld [vmem:[#allocation2 + $0x878] sm:$0xff] }
 0x3de   :  { %2696 = vmatprep.subr.bf16.mxu1 %v1096_v45  ;;  %3024 = vmatprep.subr.bf16.mxu0 %v1098_v39  ;;  %v1191_v45 = vld [vmem:[#allocation2 + $0x860] sm:$0xff]  ;;  %v1193_v39 = vld [vmem:[#allocation2 + $0x870] sm:$0xff] }
 0x3e1   :  { %2697 = vmatpush1.bf16.msra.mxu1 %v1095_v2  ;;  %3025 = vmatpush1.bf16.msra.mxu0 %v1097_v29  ;;  %v1200_v2 = vld [vmem:[#allocation2 + $0x8a8] sm:$0xff]  ;;  %v1202_v29 = vld [vmem:[#allocation2 + $0x8b8] sm:$0xff] }
 0x3e2   :  { %2698 = vmatprep.subr.bf16.mxu1 %v1104_v5  ;;  %3026 = vmatprep.subr.bf16.mxu0 %v1106_v6  ;;  %v1199_v5 = vld [vmem:[#allocation2 + $0x8a0] sm:$0xff]  ;;  %v1201_v6 = vld [vmem:[#allocation2 + $0x8b0] sm:$0xff] }
 0x3e5   :  { %2699 = vmatpush1.bf16.msra.mxu1 %v1103_v7  ;;  %3027 = vmatpush1.bf16.msra.mxu0 %v1105_v60  ;;  %v1208_v7 = vld [vmem:[#allocation2 + $0x8e8] sm:$0xff]  ;;  %v1207_v60 = vld [vmem:[#allocation2 + $0x8e0] sm:$0xff] }
 0x3e6   :  { %2700 = vmatprep.subr.bf16.mxu1 %v1112_v26  ;;  %3028 = vmatprep.subr.bf16.mxu0 %v1114_v27  ;;  %v1209_v26 = vld [vmem:[#allocation2 + $0x8f0] sm:$0xff]  ;;  %v1216_v27 = vld [vmem:[#allocation2 + $0x928] sm:$0xff] }
 0x3e9   :  { %2701 = vmatpush1.bf16.msra.mxu1 %v1111_v4  ;;  %3029 = vmatpush1.bf16.msra.mxu0 %v1113_v51  ;;  %v1218_v4 = vld [vmem:[#allocation2 + $0x938] sm:$0xff]  ;;  %v1217_v51 = vld [vmem:[#allocation2 + $0x930] sm:$0xff] }
 0x3ea   :  { %2702 = vmatprep.subr.bf16.mxu1 %v1120_v9  ;;  %3030 = vmatprep.subr.bf16.mxu0 %v1122_v1  ;;  %v1224_v9 = vld [vmem:[#allocation2 + $0x968] sm:$0xff]  ;;  %v1226_v1 = vld [vmem:[#allocation2 + $0x978] sm:$0xff] }
 0x3ed   :  { %2703 = vmatpush1.bf16.msra.mxu1 %v1119_v12  ;;  %3031 = vmatpush1.bf16.msra.mxu0 %v1121_v13  ;;  %v1223_v12 = vld [vmem:[#allocation2 + $0x960] sm:$0xff]  ;;  %v1225_v13 = vld [vmem:[#allocation2 + $0x970] sm:$0xff] }
 0x3ee   :  { %2704 = vmatprep.subr.bf16.mxu1 %v1128_v17  ;;  %3032 = vmatprep.subr.bf16.mxu0 %v1130_v19  ;;  %v1232_v17 = vld [vmem:[#allocation2 + $0x9a8] sm:$0xff]  ;;  %v1234_v19 = vld [vmem:[#allocation2 + $0x9b8] sm:$0xff] }
 0x3f1   :  { %2705 = vmatpush1.bf16.msra.mxu1 %v1127_v24  ;;  %3033 = vmatpush1.bf16.msra.mxu0 %v1129_v25  ;;  %v1231_v24 = vld [vmem:[#allocation2 + $0x9a0] sm:$0xff]  ;;  %v1233_v25 = vld [vmem:[#allocation2 + $0x9b0] sm:$0xff] }
 0x3f2   :  { %2706 = vmatprep.subr.bf16.mxu1 %v1136_v28  ;;  %3034 = vmatprep.subr.bf16.mxu0 %v1138_v30  ;;  %v1240_v28 = vld [vmem:[#allocation2 + $0x9e8] sm:$0xff]  ;;  %v1242_v30 = vld [vmem:[#allocation2 + $0x9f8] sm:$0xff] }
 0x3f5   :  { %2707 = vmatpush1.bf16.msra.mxu1 %v1135_v57  ;;  %3035 = vmatpush1.bf16.msra.mxu0 %v1137_v32  ;;  %v1239_v57 = vld [vmem:[#allocation2 + $0x9e0] sm:$0xff]  ;;  %v1241_v32 = vld [vmem:[#allocation2 + $0x9f0] sm:$0xff] }
 0x3f6   :  { %2708 = vmatprep.subr.bf16.mxu1 %v1144_v33  ;;  %3036 = vmatprep.subr.bf16.mxu0 %v1146_v34  ;;  %v1248_v33 = vld [vmem:[#allocation2 + $0xa28] sm:$0xff]  ;;  %v1250_v34 = vld [vmem:[#allocation2 + $0xa38] sm:$0xff] }
 0x3f9   :  { %2709 = vmatpush1.bf16.msra.mxu1 %v1143_v35  ;;  %3037 = vmatpush1.bf16.msra.mxu0 %v1145_v38  ;;  %v1247_v35 = vld [vmem:[#allocation2 + $0xa20] sm:$0xff]  ;;  %v1249_v38 = vld [vmem:[#allocation2 + $0xa30] sm:$0xff] }
 0x3fa   :  { %2710 = vmatprep.subr.bf16.mxu1 %v1152_v40  ;;  %3038 = vmatprep.subr.bf16.mxu0 %v1154_v43  ;;  %v1256_v40 = vld [vmem:[#allocation2 + $0xa68] sm:$0xff]  ;;  %v1258_v43 = vld [vmem:[#allocation2 + $0xa78] sm:$0xff] }
 0x3fd   :  { %2711 = vmatpush1.bf16.msra.mxu1 %v1151_v44  ;;  %3039 = vmatpush1.bf16.msra.mxu0 %v1153_v10  ;;  %v1255_v44 = vld [vmem:[#allocation2 + $0xa60] sm:$0xff]  ;;  %v1257_v10 = vld [vmem:[#allocation2 + $0xa70] sm:$0xff] }
 0x3fe   :  { %2712 = vmatprep.subr.bf16.mxu1 %v1160_v47  ;;  %3040 = vmatprep.subr.bf16.mxu0 %v1162_v14  ;;  %v1264_v47 = vld [vmem:[#allocation2 + $0xaa8] sm:$0xff]  ;;  %v1266_v14 = vld [vmem:[#allocation2 + $0xab8] sm:$0xff] }
 0x401   :  { %2713 = vmatpush1.bf16.msra.mxu1 %v1159_v20  ;;  %3041 = vmatpush1.bf16.msra.mxu0 %v1161_v41  ;;  %v1263_v20 = vld [vmem:[#allocation2 + $0xaa0] sm:$0xff]  ;;  %v1265_v41 = vld [vmem:[#allocation2 + $0xab0] sm:$0xff] }
 0x402   :  { %2714 = vmatprep.subr.bf16.mxu1 %v1168_v52  ;;  %3042 = vmatprep.subr.bf16.mxu0 %v1170_v22  ;;  %v1272_v52 = vld [vmem:[#allocation2 + $0xae8] sm:$0xff]  ;;  %v1274_v22 = vld [vmem:[#allocation2 + $0xaf8] sm:$0xff] }
 0x405   :  { %2715 = vmatpush1.bf16.msra.mxu1 %v1167_v54  ;;  %3043 = vmatpush1.bf16.msra.mxu0 %v1169_v55  ;;  %v1271_v54 = vld [vmem:[#allocation2 + $0xae0] sm:$0xff]  ;;  %v1273_v55 = vld [vmem:[#allocation2 + $0xaf0] sm:$0xff] }
 0x406   :  { %2716 = vmatprep.subr.bf16.mxu1 %v1176_v21  ;;  %3044 = vmatprep.subr.bf16.mxu0 %v1178_v36  ;;  %v1280_v21 = vld [vmem:[#allocation2 + $0xb28] sm:$0xff]  ;;  %v1282_v36 = vld [vmem:[#allocation2 + $0xb38] sm:$0xff] }
 0x409   :  { %2717 = vmatpush1.bf16.msra.mxu1 %v1175_v58  ;;  %3045 = vmatpush1.bf16.msra.mxu0 %v1177_v16  ;;  %v1279_v58 = vld [vmem:[#allocation2 + $0xb20] sm:$0xff]  ;;  %v1281_v16 = vld [vmem:[#allocation2 + $0xb30] sm:$0xff] }
 0x40a   :  { %2727 = vmatprep.subr.bf16.mxu1 %v1184_v59  ;;  %3055 = vmatprep.subr.bf16.mxu0 %v1186_v62  ;;  %v1288_v59 = vld [vmem:[#allocation2 + $0xb68] sm:$0xff]  ;;  %v1290_v62 = vld [vmem:[#allocation2 + $0xb78] sm:$0xff] }
 0x40c   :  { %2719 = vmatmul.mubr.bf16.vlgmr.msra.gmra.mrb[4].mxu1 %v4513_v31  ;;  %3047 = vmatmul.mubr.bf16.vlgmr.msra.gmra.mrb[8].mxu0 %v4513_v31  ;;  %v1210_v31 = vld [vmem:[#allocation2 + $0x8f8] sm:$0xff] }
 0x40d   :  { %2728 = vmatpush1.bf16.msra.mxu1 %v1183_v63  ;;  %3056 = vmatpush1.bf16.msra.mxu0 %v1185_v18  ;;  %v1287_v63 = vld [vmem:[#allocation2 + $0xb60] sm:$0xff]  ;;  %v1289_v18 = vld [vmem:[#allocation2 + $0xb70] sm:$0xff] }
 0x40e   :  { %2729 = vmatprep.subr.bf16.mxu1 %v1192_v23  ;;  %3057 = vmatprep.subr.bf16.mxu0 %v1194_v48  ;;  %v1296_v23 = vld [vmem:[#allocation2 + $0xba8] sm:$0xff]  ;;  %v1298_v48 = vld [vmem:[#allocation2 + $0xbb8] sm:$0xff] }
 0x40f   :  { %2759 = vmatprep.mubr.bf16.mxu1 %v4515_v37  ;;  %3087 = vmatprep.mubr.bf16.mxu0 %v4515_v37  ;;  %v1215_v37 = vld [vmem:[#allocation2 + $0x920] sm:$0xff] }
 0x411   :  { %2730 = vmatpush1.bf16.msra.mxu1 %v1191_v45  ;;  %3058 = vmatpush1.bf16.msra.mxu0 %v1193_v39  ;;  %v1295_v45 = vld [vmem:[#allocation2 + $0xba0] sm:$0xff]  ;;  %v1297_v39 = vld [vmem:[#allocation2 + $0xbb0] sm:$0xff] }
 0x412   :  { %2731 = vmatprep.subr.bf16.mxu1 %v1200_v2  ;;  %3059 = vmatprep.subr.bf16.mxu0 %v1202_v29  ;;  %v1304_v2 = vld [vmem:[#allocation2 + $0xbe8] sm:$0xff]  ;;  %v1306_v29 = vld [vmem:[#allocation2 + $0xbf8] sm:$0xff] }
 0x415   :  { %2732 = vmatpush1.bf16.msra.mxu1 %v1199_v5  ;;  %3060 = vmatpush1.bf16.msra.mxu0 %v1201_v6  ;;  %v1303_v5 = vld [vmem:[#allocation2 + $0xbe0] sm:$0xff]  ;;  %v1305_v6 = vld [vmem:[#allocation2 + $0xbf0] sm:$0xff] }
 0x416   :  { %2733 = vmatprep.subr.bf16.mxu1 %v1208_v7  ;;  %3061 = vmatprep.subr.bf16.mxu0 %v1210_v31  ;;  %v1312_v7 = vld [vmem:[#allocation2 + $0xc28] sm:$0xff]  ;;  %v1314_v31 = vld [vmem:[#allocation2 + $0xc38] sm:$0xff] }
 0x419   :  { %2734 = vmatpush1.bf16.msra.mxu1 %v1207_v60  ;;  %3062 = vmatpush1.bf16.msra.mxu0 %v1209_v26  ;;  %v1311_v60 = vld [vmem:[#allocation2 + $0xc20] sm:$0xff]  ;;  %v1313_v26 = vld [vmem:[#allocation2 + $0xc30] sm:$0xff] }
 0x41a   :  { %2735 = vmatprep.subr.bf16.mxu1 %v1216_v27  ;;  %3063 = vmatprep.subr.bf16.mxu0 %v1218_v4  ;;  %v1320_v27 = vld [vmem:[#allocation2 + $0xc68] sm:$0xff]  ;;  %v1322_v4 = vld [vmem:[#allocation2 + $0xc78] sm:$0xff] }
 0x41d   :  { %2736 = vmatpush1.bf16.msra.mxu1 %v1215_v37  ;;  %3064 = vmatpush1.bf16.msra.mxu0 %v1217_v51  ;;  %v1319_v37 = vld [vmem:[#allocation2 + $0xc60] sm:$0xff]  ;;  %v1321_v51 = vld [vmem:[#allocation2 + $0xc70] sm:$0xff] }
 0x41e   :  { %2737 = vmatprep.subr.bf16.mxu1 %v1224_v9  ;;  %3065 = vmatprep.subr.bf16.mxu0 %v1226_v1  ;;  %v1328_v9 = vld [vmem:[#allocation2 + $0xca8] sm:$0xff]  ;;  %v1330_v1 = vld [vmem:[#allocation2 + $0xcb8] sm:$0xff] }
 0x421   :  { %2738 = vmatpush1.bf16.msra.mxu1 %v1223_v12  ;;  %3066 = vmatpush1.bf16.msra.mxu0 %v1225_v13  ;;  %v1327_v12 = vld [vmem:[#allocation2 + $0xca0] sm:$0xff]  ;;  %v1329_v13 = vld [vmem:[#allocation2 + $0xcb0] sm:$0xff] }
 0x422   :  { %2739 = vmatprep.subr.bf16.mxu1 %v1232_v17  ;;  %3067 = vmatprep.subr.bf16.mxu0 %v1234_v19  ;;  %v1336_v17 = vld [vmem:[#allocation2 + $0xce8] sm:$0xff]  ;;  %v1335_v19 = vld [vmem:[#allocation2 + $0xce0] sm:$0xff] }
 0x425   :  { %2740 = vmatpush1.bf16.msra.mxu1 %v1231_v24  ;;  %3068 = vmatpush1.bf16.msra.mxu0 %v1233_v25  ;;  %v1337_v24 = vld [vmem:[#allocation2 + $0xcf0] sm:$0xff]  ;;  %v1344_v25 = vld [vmem:[#allocation2 + $0xd28] sm:$0xff] }
 0x426   :  { %2741 = vmatprep.subr.bf16.mxu1 %v1240_v28  ;;  %3069 = vmatprep.subr.bf16.mxu0 %v1242_v30  ;;  %v1346_v28 = vld [vmem:[#allocation2 + $0xd38] sm:$0xff]  ;;  %v1951_v30 = vsub.s32 0, %v4461_v46 }
 0x429   :  { %2742 = vmatpush1.bf16.msra.mxu1 %v1239_v57  ;;  %3070 = vmatpush1.bf16.msra.mxu0 %v1241_v32  ;;  %v1947_v57 = vld [vmem:[#allocation11] sm:$0xff]  ;;  %v1955_v32 = vsub.s32 1, %v4461_v46 }
 0x42a   :  { %2743 = vmatprep.subr.bf16.mxu1 %v1248_v33  ;;  %3071 = vmatprep.subr.bf16.mxu0 %v1250_v34  ;;  %v1963_v33 = vsub.s32 3, %v4461_v46  ;;  %v1343_v34 = vld [vmem:[#allocation2 + $0xd20] sm:$0xff] }
 0x42d   :  { %2744 = vmatpush1.bf16.msra.mxu1 %v1247_v35  ;;  %3072 = vmatpush1.bf16.msra.mxu0 %v1249_v38  ;;  %v1345_v35 = vld [vmem:[#allocation2 + $0xd30] sm:$0xff]  ;;  %v1352_v38 = vld [vmem:[#allocation2 + $0xd68] sm:$0xff] }
 0x42e   :  { %2745 = vmatprep.subr.bf16.mxu1 %v1256_v40  ;;  %3073 = vmatprep.subr.bf16.mxu0 %v1258_v43  ;;  %v1354_v40 = vld [vmem:[#allocation2 + $0xd78] sm:$0xff]  ;;  %v1952_v43 = vrot.slane %v1947_v57, %v1951_v30  ;;  %v1401_v30 = vld [vmem:[#allocation2 + $0xef0] sm:$0xff] }
 0x431   :  { %2746 = vmatpush1.bf16.msra.mxu1 %v1255_v44  ;;  %3074 = vmatpush1.bf16.msra.mxu0 %v1257_v10  ;;  %v1956_v10 = vrot.slane %v1947_v57, %v1955_v32  ;;  %v1407_v32 = vld [vmem:[#allocation2 + $0xf20] sm:$0xff] }
 0x432   :  { %2747 = vmatprep.subr.bf16.mxu1 %v1264_v47  ;;  %3075 = vmatprep.subr.bf16.mxu0 %v1266_v14  ;;  %v1964_v47 = vrot.slane %v1947_v57, %v1963_v33  ;;  %v1351_v14 = vld [vmem:[#allocation2 + $0xd60] sm:$0xff]  ;;  %v1409_v33 = vld [vmem:[#allocation2 + $0xf30] sm:$0xff] }
 0x435   :  { %2748 = vmatpush1.bf16.msra.mxu1 %v1263_v20  ;;  %3076 = vmatpush1.bf16.msra.mxu0 %v1265_v41  ;;  %v1353_v20 = vld [vmem:[#allocation2 + $0xd70] sm:$0xff] }
 0x436   :  { %2749 = vmatprep.subr.bf16.mxu1 %v1272_v52  ;;  %3077 = vmatprep.subr.bf16.mxu0 %v1274_v22  ;;  %v1360_v22 = vld [vmem:[#allocation2 + $0xda8] sm:$0xff] }
 0x439   :  { %2750 = vmatpush1.bf16.msra.mxu1 %v1271_v54  ;;  %3078 = vmatpush1.bf16.msra.mxu0 %v1273_v55  ;;  %v1362_v54 = vld [vmem:[#allocation2 + $0xdb8] sm:$0xff] }
 0x43a   :  { %2751 = vmatprep.subr.bf16.mxu1 %v1280_v21  ;;  %3079 = vmatprep.subr.bf16.mxu0 %v1282_v36 }
 0x43d   :  { %2752 = vmatpush1.bf16.msra.mxu1 %v1279_v58  ;;  %3080 = vmatpush1.bf16.msra.mxu0 %v1281_v16 }
 0x43e   :  { %2753 = vmatprep.subr.bf16.mxu1 %v1288_v59  ;;  %3081 = vmatprep.subr.bf16.mxu0 %v1290_v62 }
 0x441   :  { %2754 = vmatpush1.bf16.msra.mxu1 %v1287_v63  ;;  %3082 = vmatpush1.bf16.msra.mxu0 %v1289_v18 }
 0x442   :  { %2755 = vmatprep.subr.bf16.mxu1 %v1296_v23  ;;  %3083 = vmatprep.subr.bf16.mxu0 %v1298_v48 }
 0x445   :  { %2756 = vmatpush1.bf16.msra.mxu1 %v1295_v45  ;;  %3084 = vmatpush1.bf16.msra.mxu0 %v1297_v39  ;;  %v1359_v39 = vld [vmem:[#allocation2 + $0xda0] sm:$0xff] }
 0x446   :  { %2757 = vmatprep.subr.bf16.mxu1 %v1304_v2  ;;  %3085 = vmatprep.subr.bf16.mxu0 %v1306_v29  ;;  %v1361_v2 = vld [vmem:[#allocation2 + $0xdb0] sm:$0xff] }
 0x449   :  { %2758 = vmatpush1.bf16.msra.mxu1 %v1303_v5  ;;  %3086 = vmatpush1.bf16.msra.mxu0 %v1305_v6  ;;  %v1368_v6 = vld [vmem:[#allocation2 + $0xde8] sm:$0xff] }
 0x44a   :  { %2768 = vmatprep.subr.bf16.mxu1 %v1312_v7  ;;  %3096 = vmatprep.subr.bf16.mxu0 %v1314_v31  ;;  %v1370_v7 = vld [vmem:[#allocation2 + $0xdf8] sm:$0xff]  ;;  %v1367_v31 = vld [vmem:[#allocation2 + $0xde0] sm:$0xff] }
 0x44c   :  { %2760 = vmatmul.mubr.bf16.vlgmr.msra.gmra.mrb[4].mxu1 %v4530_v50  ;;  %3088 = vmatmul.mubr.bf16.vlgmr.msra.gmra.mrb[8].mxu0 %v4530_v50  ;;  %v1338_v50 = vld [vmem:[#allocation2 + $0xcf8] sm:$0xff] }
 0x44d   :  { %2769 = vmatpush1.bf16.msra.mxu1 %v1311_v60  ;;  %3097 = vmatpush1.bf16.msra.mxu0 %v1313_v26  ;;  %v1369_v60 = vld [vmem:[#allocation2 + $0xdf0] sm:$0xff]  ;;  %v1376_v26 = vld [vmem:[#allocation2 + $0xe28] sm:$0xff] }
 0x44e   :  { %2770 = vmatprep.subr.bf16.mxu1 %v1320_v27  ;;  %3098 = vmatprep.subr.bf16.mxu0 %v1322_v4  ;;  %v1378_v27 = vld [vmem:[#allocation2 + $0xe38] sm:$0xff]  ;;  %v1375_v4 = vld [vmem:[#allocation2 + $0xe20] sm:$0xff] }
 0x44f   :  { %2800 = vmatprep.mubr.bf16.mxu1 %v4532_v53  ;;  %3128 = vmatprep.mubr.bf16.mxu0 %v4532_v53  ;;  %v1959_v53 = vsub.s32 2, %v4461_v46 }
 0x451   :  { %2771 = vmatpush1.bf16.msra.mxu1 %v1319_v37  ;;  %3099 = vmatpush1.bf16.msra.mxu0 %v1321_v51  ;;  %v1960_v44 = vrot.slane %v1947_v57, %v1959_v53  ;;  %v1377_v37 = vld [vmem:[#allocation2 + $0xe30] sm:$0xff]  ;;  %v1384_v51 = vld [vmem:[#allocation2 + $0xe68] sm:$0xff]  ;;  %v1410_v57 = vld [vmem:[#allocation2 + $0xf38] sm:$0xff] }
 0x452   :  { %2772 = vmatprep.subr.bf16.mxu1 %v1328_v9  ;;  %3100 = vmatprep.subr.bf16.mxu0 %v1330_v1  ;;  %v1386_v9 = vld [vmem:[#allocation2 + $0xe78] sm:$0xff]  ;;  %v1383_v1 = vld [vmem:[#allocation2 + $0xe60] sm:$0xff]  ;;  %v1408_v53 = vld [vmem:[#allocation2 + $0xf28] sm:$0xff] }
 0x455   :  { %2773 = vmatpush1.bf16.msra.mxu1 %v1327_v12  ;;  %3101 = vmatpush1.bf16.msra.mxu0 %v1329_v13  ;;  %v1385_v12 = vld [vmem:[#allocation2 + $0xe70] sm:$0xff]  ;;  %v1392_v13 = vld [vmem:[#allocation2 + $0xea8] sm:$0xff] }
 0x456   :  { %2774 = vmatprep.subr.bf16.mxu1 %v1336_v17  ;;  %3102 = vmatprep.subr.bf16.mxu0 %v1338_v50  ;;  %v1394_v17 = vld [vmem:[#allocation2 + $0xeb8] sm:$0xff]  ;;  %v1391_v50 = vld [vmem:[#allocation2 + $0xea0] sm:$0xff] }
 0x459   :  { %2775 = vmatpush1.bf16.msra.mxu1 %v1335_v19  ;;  %3103 = vmatpush1.bf16.msra.mxu0 %v1337_v24  ;;  %v1393_v19 = vld [vmem:[#allocation2 + $0xeb0] sm:$0xff]  ;;  %v1400_v24 = vld [vmem:[#allocation2 + $0xee8] sm:$0xff] }
 0x45a   :  { %2776 = vmatprep.subr.bf16.mxu1 %v1344_v25  ;;  %3104 = vmatprep.subr.bf16.mxu0 %v1346_v28  ;;  %v1402_v25 = vld [vmem:[#allocation2 + $0xef8] sm:$0xff]  ;;  %v1399_v28 = vld [vmem:[#allocation2 + $0xee0] sm:$0xff] }
 0x45d   :  { %2777 = vmatpush1.bf16.msra.mxu1 %v1343_v34  ;;  %3105 = vmatpush1.bf16.msra.mxu0 %v1345_v35  ;;  %v1416_v34 = vld [vmem:[#allocation2 + $0xf68] sm:$0xff]  ;;  %v1418_v35 = vld [vmem:[#allocation2 + $0xf78] sm:$0xff] }
 0x45e   :  { %2778 = vmatprep.subr.bf16.mxu1 %v1352_v38  ;;  %3106 = vmatprep.subr.bf16.mxu0 %v1354_v40  ;;  %v1415_v38 = vld [vmem:[#allocation2 + $0xf60] sm:$0xff]  ;;  %v1417_v40 = vld [vmem:[#allocation2 + $0xf70] sm:$0xff] }
 0x45f   :  { %v2310_v41 = vpop.f32.mrb[0].mxu1  ;;  %v2638_v52 = vpop.f32.mrb[4].mxu0 }
 0x460   :  { %v4632_v55 = vadd.f32 %v2310_v41, %v1952_v43  ;;  %v4634_v21 = vadd.f32 %v2638_v52, %v1960_v44  ;;  %v2312_v36 = vpop.f32.mrb[1].mxu1  ;;  %v2640_v58 = vpop.f32.mrb[5].mxu0  ;;  %v1424_v43 = vld [vmem:[#allocation2 + $0xfa8] sm:$0xff]  ;;  %v1426_v44 = vld [vmem:[#allocation2 + $0xfb8] sm:$0xff]  ;;  %v1431_v41 = vld [vmem:[#allocation2 + $0xfe0] sm:$0xff] }
 0x461   :  { %v4636_v16 = vadd.f32 %v2312_v36, %v1956_v10  ;;  %v4638_v59 = vadd.f32 %v2640_v58, %v1964_v47  ;;  %v2314_v62 = vpop.f32.mrb[2].mxu1  ;;  %v2642_v63 = vpop.f32.mrb[6].mxu0  ;;  %2779 = vmatpush1.bf16.msra.mxu1 %v1351_v14  ;;  %3107 = vmatpush1.bf16.msra.mxu0 %v1353_v20  ;;  %v1423_v10 = vld [vmem:[#allocation2 + $0xfa0] sm:$0xff]  ;;  %v1425_v47 = vld [vmem:[#allocation2 + $0xfb0] sm:$0xff]  ;;  %v1432_v14 = vld [vmem:[#allocation2 + $0xfe8] sm:$0xff] }
 0x462   :  { %v3301_v18 = vmax.f32 %v4632_v55, 0.0  ;;  %v3303_v23 = vmax.f32 %v4634_v21, 0.0  ;;  %v2315_v48 = vpop.f32.mrb[3].mxu1  ;;  %v2643_v45 = vpop.f32.mrb[7].mxu0  ;;  %2780 = vmatprep.subr.bf16.mxu1 %v1360_v22  ;;  %3108 = vmatprep.subr.bf16.mxu0 %v1362_v54  ;;  %v1434_v20 = vld [vmem:[#allocation2 + $0xff8] sm:$0xff]  ;;  %v1433_v52 = vld [vmem:[#allocation2 + $0xff0] sm:$0xff] }
 0x463   :  { %v3302_v29 = vmax.f32 %v4636_v16, 0.0  ;;  %v3304_v5 = vmax.f32 %v4638_v59, 0.0  ;;  %v1440_v22 = vld [vmem:[#allocation2 + $0x1028] sm:$0xff]  ;;  %v1442_v54 = vld [vmem:[#allocation2 + $0x1038] sm:$0xff]  ;;  %v1439_v36 = vld [vmem:[#allocation2 + $0x1020] sm:$0xff] }
 0x464   :  { %v1441_v58 = vld [vmem:[#allocation2 + $0x1030] sm:$0xff]  ;;  %v1448_v62 = vld [vmem:[#allocation2 + $0x1068] sm:$0xff]  ;;  %v1450_v63 = vld [vmem:[#allocation2 + $0x1078] sm:$0xff] }
 0x465   :  { %2781 = vmatpush1.bf16.msra.mxu1 %v1359_v39  ;;  %3109 = vmatpush1.bf16.msra.mxu0 %v1361_v2  ;;  %v1447_v48 = vld [vmem:[#allocation2 + $0x1060] sm:$0xff]  ;;  %v1449_v45 = vld [vmem:[#allocation2 + $0x1070] sm:$0xff]  ;;  %v1456_v39 = vld [vmem:[#allocation2 + $0x10a8] sm:$0xff] }
 0x466   :  { %2782 = vmatprep.subr.bf16.mxu1 %v1368_v6  ;;  %3110 = vmatprep.subr.bf16.mxu0 %v1370_v7  ;;  %v1458_v2 = vld [vmem:[#allocation2 + $0x10b8] sm:$0xff]  ;;  %v1455_v6 = vld [vmem:[#allocation2 + $0x10a0] sm:$0xff]  ;;  %v1457_v7 = vld [vmem:[#allocation2 + $0x10b0] sm:$0xff] }
 0x469   :  { %2783 = vmatpush1.bf16.msra.mxu1 %v1367_v31  ;;  %3111 = vmatpush1.bf16.msra.mxu0 %v1369_v60  ;;  %v1464_v31 = vld [vmem:[#allocation2 + $0x10e8] sm:$0xff]  ;;  %v1463_v60 = vld [vmem:[#allocation2 + $0x10e0] sm:$0xff] }
 0x46a   :  { %2784 = vmatprep.subr.bf16.mxu1 %v1376_v26  ;;  %3112 = vmatprep.subr.bf16.mxu0 %v1378_v27  ;;  %v1465_v26 = vld [vmem:[#allocation2 + $0x10f0] sm:$0xff]  ;;  %v1472_v27 = vld [vmem:[#allocation2 + $0x1128] sm:$0xff] }
 0x46d   :  { %2785 = vmatpush1.bf16.msra.mxu1 %v1375_v4  ;;  %3113 = vmatpush1.bf16.msra.mxu0 %v1377_v37  ;;  %v1474_v4 = vld [vmem:[#allocation2 + $0x1138] sm:$0xff]  ;;  %v1473_v37 = vld [vmem:[#allocation2 + $0x1130] sm:$0xff] }
 0x46e   :  { %2786 = vmatprep.subr.bf16.mxu1 %v1384_v51  ;;  %3114 = vmatprep.subr.bf16.mxu0 %v1386_v9  ;;  %v1480_v51 = vld [vmem:[#allocation2 + $0x1168] sm:$0xff]  ;;  %v1482_v9 = vld [vmem:[#allocation2 + $0x1178] sm:$0xff] }
 0x471   :  { %2787 = vmatpush1.bf16.msra.mxu1 %v1383_v1  ;;  %3115 = vmatpush1.bf16.msra.mxu0 %v1385_v12  ;;  %v1479_v1 = vld [vmem:[#allocation2 + $0x1160] sm:$0xff]  ;;  %v1481_v12 = vld [vmem:[#allocation2 + $0x1170] sm:$0xff] }
 0x472   :  { %2788 = vmatprep.subr.bf16.mxu1 %v1392_v13  ;;  %3116 = vmatprep.subr.bf16.mxu0 %v1394_v17  ;;  %v1488_v13 = vld [vmem:[#allocation2 + $0x11a8] sm:$0xff]  ;;  %v1490_v17 = vld [vmem:[#allocation2 + $0x11b8] sm:$0xff] }
 0x475   :  { %2789 = vmatpush1.bf16.msra.mxu1 %v1391_v50  ;;  %3117 = vmatpush1.bf16.msra.mxu0 %v1393_v19  ;;  %v1487_v50 = vld [vmem:[#allocation2 + $0x11a0] sm:$0xff]  ;;  %v1489_v19 = vld [vmem:[#allocation2 + $0x11b0] sm:$0xff] }
 0x476   :  { %2790 = vmatprep.subr.bf16.mxu1 %v1400_v24  ;;  %3118 = vmatprep.subr.bf16.mxu0 %v1402_v25  ;;  %v1496_v24 = vld [vmem:[#allocation2 + $0x11e8] sm:$0xff]  ;;  %v1498_v25 = vld [vmem:[#allocation2 + $0x11f8] sm:$0xff] }
 0x479   :  { %2791 = vmatpush1.bf16.msra.mxu1 %v1399_v28  ;;  %3119 = vmatpush1.bf16.msra.mxu0 %v1401_v30  ;;  %v1495_v28 = vld [vmem:[#allocation2 + $0x11e0] sm:$0xff]  ;;  %v1497_v30 = vld [vmem:[#allocation2 + $0x11f0] sm:$0xff] }
 0x47a   :  { %2792 = vmatprep.subr.bf16.mxu1 %v1408_v53  ;;  %3120 = vmatprep.subr.bf16.mxu0 %v1410_v57  ;;  %v1504_v53 = vld [vmem:[#allocation2 + $0x1228] sm:$0xff]  ;;  %v1506_v57 = vld [vmem:[#allocation2 + $0x1238] sm:$0xff] }
 0x47d   :  { %2793 = vmatpush1.bf16.msra.mxu1 %v1407_v32  ;;  %3121 = vmatpush1.bf16.msra.mxu0 %v1409_v33  ;;  %v1503_v32 = vld [vmem:[#allocation2 + $0x1220] sm:$0xff]  ;;  %v1505_v33 = vld [vmem:[#allocation2 + $0x1230] sm:$0xff] }
 0x47e   :  { %2794 = vmatprep.subr.bf16.mxu1 %v1416_v34  ;;  %3122 = vmatprep.subr.bf16.mxu0 %v1418_v35  ;;  %v1512_v34 = vld [vmem:[#allocation2 + $0x1268] sm:$0xff]  ;;  %v1514_v35 = vld [vmem:[#allocation2 + $0x1278] sm:$0xff] }
 0x481   :  { %2795 = vmatpush1.bf16.msra.mxu1 %v1415_v38  ;;  %3123 = vmatpush1.bf16.msra.mxu0 %v1417_v40  ;;  %v1511_v38 = vld [vmem:[#allocation2 + $0x1260] sm:$0xff]  ;;  %v1513_v40 = vld [vmem:[#allocation2 + $0x1270] sm:$0xff] }
 0x482   :  { %2796 = vmatprep.subr.bf16.mxu1 %v1424_v43  ;;  %3124 = vmatprep.subr.bf16.mxu0 %v1426_v44  ;;  %v1520_v43 = vld [vmem:[#allocation2 + $0x12a8] sm:$0xff]  ;;  %v1522_v44 = vld [vmem:[#allocation2 + $0x12b8] sm:$0xff] }
 0x485   :  { %2797 = vmatpush1.bf16.msra.mxu1 %v1423_v10  ;;  %3125 = vmatpush1.bf16.msra.mxu0 %v1425_v47  ;;  %v1519_v10 = vld [vmem:[#allocation2 + $0x12a0] sm:$0xff]  ;;  %v1521_v47 = vld [vmem:[#allocation2 + $0x12b0] sm:$0xff] }
 0x486   :  { %2798 = vmatprep.subr.bf16.mxu1 %v1432_v14  ;;  %3126 = vmatprep.subr.bf16.mxu0 %v1434_v20  ;;  %v1528_v14 = vld [vmem:[#allocation2 + $0x12e8] sm:$0xff]  ;;  %v1530_v20 = vld [vmem:[#allocation2 + $0x12f8] sm:$0xff] }
 0x489   :  { %2799 = vmatpush1.bf16.msra.mxu1 %v1431_v41  ;;  %3127 = vmatpush1.bf16.msra.mxu0 %v1433_v52  ;;  %v1527_v41 = vld [vmem:[#allocation2 + $0x12e0] sm:$0xff]  ;;  %v1529_v52 = vld [vmem:[#allocation2 + $0x12f0] sm:$0xff] }
 0x48a   :  { %2809 = vmatprep.subr.bf16.mxu1 %v1440_v22  ;;  %3137 = vmatprep.subr.bf16.mxu0 %v1442_v54  ;;  %v1536_v22 = vld [vmem:[#allocation2 + $0x1328] sm:$0xff]  ;;  %v1538_v54 = vld [vmem:[#allocation2 + $0x1338] sm:$0xff] }
 0x48c   :  { %2801 = vmatmul.mubr.bf16.vlgmr.msra.gmra.mrb[4].mxu1 %v4548_v61  ;;  %3129 = vmatmul.mubr.bf16.vlgmr.msra.gmra.mrb[8].mxu0 %v4548_v61  ;;  %v1466_v61 = vld [vmem:[#allocation2 + $0x10f8] sm:$0xff] }
 0x48d   :  { %2810 = vmatpush1.bf16.msra.mxu1 %v1439_v36  ;;  %3138 = vmatpush1.bf16.msra.mxu0 %v1441_v58  ;;  %v1535_v36 = vld [vmem:[#allocation2 + $0x1320] sm:$0xff]  ;;  %v1537_v58 = vld [vmem:[#allocation2 + $0x1330] sm:$0xff] }
 0x48e   :  { %2811 = vmatprep.subr.bf16.mxu1 %v1448_v62  ;;  %3139 = vmatprep.subr.bf16.mxu0 %v1450_v63  ;;  %v1544_v62 = vld [vmem:[#allocation2 + $0x1368] sm:$0xff]  ;;  %v1546_v63 = vld [vmem:[#allocation2 + $0x1378] sm:$0xff] }
 0x48f   :  { %2841 = vmatprep.mubr.bf16.mxu1 %v4550_v0  ;;  %3169 = vmatprep.mubr.bf16.mxu0 %v4550_v0  ;;  %v1471_v0 = vld [vmem:[#allocation2 + $0x1120] sm:$0xff] }
 0x491   :  { %2812 = vmatpush1.bf16.msra.mxu1 %v1447_v48  ;;  %3140 = vmatpush1.bf16.msra.mxu0 %v1449_v45  ;;  %v1543_v48 = vld [vmem:[#allocation2 + $0x1360] sm:$0xff]  ;;  %v1545_v45 = vld [vmem:[#allocation2 + $0x1370] sm:$0xff] }
 0x492   :  { %2813 = vmatprep.subr.bf16.mxu1 %v1456_v39  ;;  %3141 = vmatprep.subr.bf16.mxu0 %v1458_v2  ;;  %v1552_v39 = vld [vmem:[#allocation2 + $0x13a8] sm:$0xff]  ;;  %v1554_v2 = vld [vmem:[#allocation2 + $0x13b8] sm:$0xff] }
 0x495   :  { %2814 = vmatpush1.bf16.msra.mxu1 %v1455_v6  ;;  %3142 = vmatpush1.bf16.msra.mxu0 %v1457_v7  ;;  %v1551_v6 = vld [vmem:[#allocation2 + $0x13a0] sm:$0xff]  ;;  %v1553_v7 = vld [vmem:[#allocation2 + $0x13b0] sm:$0xff] }
 0x496   :  { %2815 = vmatprep.subr.bf16.mxu1 %v1464_v31  ;;  %3143 = vmatprep.subr.bf16.mxu0 %v1466_v61  ;;  %v1560_v31 = vld [vmem:[#allocation2 + $0x13e8] sm:$0xff]  ;;  %v1562_v61 = vld [vmem:[#allocation2 + $0x13f8] sm:$0xff] }
 0x499   :  { %2816 = vmatpush1.bf16.msra.mxu1 %v1463_v60  ;;  %3144 = vmatpush1.bf16.msra.mxu0 %v1465_v26  ;;  %v1559_v60 = vld [vmem:[#allocation2 + $0x13e0] sm:$0xff]  ;;  %v1561_v26 = vld [vmem:[#allocation2 + $0x13f0] sm:$0xff] }
 0x49a   :  { %2817 = vmatprep.subr.bf16.mxu1 %v1472_v27  ;;  %3145 = vmatprep.subr.bf16.mxu0 %v1474_v4  ;;  %v1568_v27 = vld [vmem:[#allocation2 + $0x1428] sm:$0xff]  ;;  %v1570_v4 = vld [vmem:[#allocation2 + $0x1438] sm:$0xff] }
 0x49d   :  { %2818 = vmatpush1.bf16.msra.mxu1 %v1471_v0  ;;  %3146 = vmatpush1.bf16.msra.mxu0 %v1473_v37  ;;  %v1567_v0 = vld [vmem:[#allocation2 + $0x1420] sm:$0xff]  ;;  %v1569_v37 = vld [vmem:[#allocation2 + $0x1430] sm:$0xff] }
 0x49e   :  { %2819 = vmatprep.subr.bf16.mxu1 %v1480_v51  ;;  %3147 = vmatprep.subr.bf16.mxu0 %v1482_v9  ;;  %v1576_v51 = vld [vmem:[#allocation2 + $0x1468] sm:$0xff]  ;;  %v1578_v9 = vld [vmem:[#allocation2 + $0x1478] sm:$0xff] }
 0x4a1   :  { %2820 = vmatpush1.bf16.msra.mxu1 %v1479_v1  ;;  %3148 = vmatpush1.bf16.msra.mxu0 %v1481_v12  ;;  %v1575_v1 = vld [vmem:[#allocation2 + $0x1460] sm:$0xff]  ;;  %v1577_v12 = vld [vmem:[#allocation2 + $0x1470] sm:$0xff] }
 0x4a2   :  { %2821 = vmatprep.subr.bf16.mxu1 %v1488_v13  ;;  %3149 = vmatprep.subr.bf16.mxu0 %v1490_v17  ;;  %v1584_v13 = vld [vmem:[#allocation2 + $0x14a8] sm:$0xff]  ;;  %v1586_v17 = vld [vmem:[#allocation2 + $0x14b8] sm:$0xff] }
 0x4a5   :  { %2822 = vmatpush1.bf16.msra.mxu1 %v1487_v50  ;;  %3150 = vmatpush1.bf16.msra.mxu0 %v1489_v19  ;;  %v1583_v50 = vld [vmem:[#allocation2 + $0x14a0] sm:$0xff]  ;;  %v1585_v19 = vld [vmem:[#allocation2 + $0x14b0] sm:$0xff] }
 0x4a6   :  { %2823 = vmatprep.subr.bf16.mxu1 %v1496_v24  ;;  %3151 = vmatprep.subr.bf16.mxu0 %v1498_v25  ;;  %v1592_v24 = vld [vmem:[#allocation2 + $0x14e8] sm:$0xff]  ;;  %v1591_v25 = vld [vmem:[#allocation2 + $0x14e0] sm:$0xff] }
 0x4a9   :  { %2824 = vmatpush1.bf16.msra.mxu1 %v1495_v28  ;;  %3152 = vmatpush1.bf16.msra.mxu0 %v1497_v30  ;;  %v1593_v28 = vld [vmem:[#allocation2 + $0x14f0] sm:$0xff]  ;;  %v1600_v30 = vld [vmem:[#allocation2 + $0x1528] sm:$0xff] }
 0x4aa   :  { %2825 = vmatprep.subr.bf16.mxu1 %v1504_v53  ;;  %3153 = vmatprep.subr.bf16.mxu0 %v1506_v57  ;;  %v1602_v53 = vld [vmem:[#allocation2 + $0x1538] sm:$0xff]  ;;  %v1601_v57 = vld [vmem:[#allocation2 + $0x1530] sm:$0xff] }
 0x4ad   :  { %2826 = vmatpush1.bf16.msra.mxu1 %v1503_v32  ;;  %3154 = vmatpush1.bf16.msra.mxu0 %v1505_v33  ;;  %v1608_v32 = vld [vmem:[#allocation2 + $0x1568] sm:$0xff]  ;;  %v1610_v33 = vld [vmem:[#allocation2 + $0x1578] sm:$0xff] }
 0x4ae   :  { %2827 = vmatprep.subr.bf16.mxu1 %v1512_v34  ;;  %3155 = vmatprep.subr.bf16.mxu0 %v1514_v35  ;;  %v1607_v34 = vld [vmem:[#allocation2 + $0x1560] sm:$0xff]  ;;  %v1609_v35 = vld [vmem:[#allocation2 + $0x1570] sm:$0xff] }
 0x4b1   :  { %2828 = vmatpush1.bf16.msra.mxu1 %v1511_v38  ;;  %3156 = vmatpush1.bf16.msra.mxu0 %v1513_v40  ;;  %v1616_v38 = vld [vmem:[#allocation2 + $0x15a8] sm:$0xff]  ;;  %v1618_v40 = vld [vmem:[#allocation2 + $0x15b8] sm:$0xff] }
 0x4b2   :  { %2829 = vmatprep.subr.bf16.mxu1 %v1520_v43  ;;  %3157 = vmatprep.subr.bf16.mxu0 %v1522_v44  ;;  %v1615_v43 = vld [vmem:[#allocation2 + $0x15a0] sm:$0xff]  ;;  %v1617_v44 = vld [vmem:[#allocation2 + $0x15b0] sm:$0xff] }
 0x4b5   :  { %2830 = vmatpush1.bf16.msra.mxu1 %v1519_v10  ;;  %3158 = vmatpush1.bf16.msra.mxu0 %v1521_v47  ;;  %v1624_v10 = vld [vmem:[#allocation2 + $0x15e8] sm:$0xff]  ;;  %v1626_v47 = vld [vmem:[#allocation2 + $0x15f8] sm:$0xff] }
 0x4b6   :  { %2831 = vmatprep.subr.bf16.mxu1 %v1528_v14  ;;  %3159 = vmatprep.subr.bf16.mxu0 %v1530_v20  ;;  %v1623_v14 = vld [vmem:[#allocation2 + $0x15e0] sm:$0xff]  ;;  %v1625_v20 = vld [vmem:[#allocation2 + $0x15f0] sm:$0xff] }
 0x4b9   :  { %2832 = vmatpush1.bf16.msra.mxu1 %v1527_v41  ;;  %3160 = vmatpush1.bf16.msra.mxu0 %v1529_v52  ;;  %v1632_v41 = vld [vmem:[#allocation2 + $0x1628] sm:$0xff]  ;;  %v1634_v52 = vld [vmem:[#allocation2 + $0x1638] sm:$0xff] }
 0x4ba   :  { %2833 = vmatprep.subr.bf16.mxu1 %v1536_v22  ;;  %3161 = vmatprep.subr.bf16.mxu0 %v1538_v54  ;;  %v1631_v22 = vld [vmem:[#allocation2 + $0x1620] sm:$0xff]  ;;  %v1633_v54 = vld [vmem:[#allocation2 + $0x1630] sm:$0xff] }
 0x4bd   :  { %2834 = vmatpush1.bf16.msra.mxu1 %v1535_v36  ;;  %3162 = vmatpush1.bf16.msra.mxu0 %v1537_v58  ;;  %v1640_v36 = vld [vmem:[#allocation2 + $0x1668] sm:$0xff]  ;;  %v1642_v58 = vld [vmem:[#allocation2 + $0x1678] sm:$0xff] }
 0x4be   :  { %2835 = vmatprep.subr.bf16.mxu1 %v1544_v62  ;;  %3163 = vmatprep.subr.bf16.mxu0 %v1546_v63  ;;  %v1639_v62 = vld [vmem:[#allocation2 + $0x1660] sm:$0xff]  ;;  %v1641_v63 = vld [vmem:[#allocation2 + $0x1670] sm:$0xff] }
 0x4c1   :  { %2836 = vmatpush1.bf16.msra.mxu1 %v1543_v48  ;;  %3164 = vmatpush1.bf16.msra.mxu0 %v1545_v45  ;;  %v1648_v48 = vld [vmem:[#allocation2 + $0x16a8] sm:$0xff]  ;;  %v1650_v45 = vld [vmem:[#allocation2 + $0x16b8] sm:$0xff] }
 0x4c2   :  { %2837 = vmatprep.subr.bf16.mxu1 %v1552_v39  ;;  %3165 = vmatprep.subr.bf16.mxu0 %v1554_v2  ;;  %v1647_v39 = vld [vmem:[#allocation2 + $0x16a0] sm:$0xff]  ;;  %v1649_v2 = vld [vmem:[#allocation2 + $0x16b0] sm:$0xff] }
 0x4c5   :  { %2838 = vmatpush1.bf16.msra.mxu1 %v1551_v6  ;;  %3166 = vmatpush1.bf16.msra.mxu0 %v1553_v7  ;;  %v1656_v6 = vld [vmem:[#allocation2 + $0x16e8] sm:$0xff]  ;;  %v1658_v7 = vld [vmem:[#allocation2 + $0x16f8] sm:$0xff] }
 0x4c6   :  { %2839 = vmatprep.subr.bf16.mxu1 %v1560_v31  ;;  %3167 = vmatprep.subr.bf16.mxu0 %v1562_v61  ;;  %v1655_v31 = vld [vmem:[#allocation2 + $0x16e0] sm:$0xff]  ;;  %v1657_v61 = vld [vmem:[#allocation2 + $0x16f0] sm:$0xff] }
 0x4c9   :  { %2840 = vmatpush1.bf16.msra.mxu1 %v1559_v60  ;;  %3168 = vmatpush1.bf16.msra.mxu0 %v1561_v26  ;;  %v1664_v60 = vld [vmem:[#allocation2 + $0x1728] sm:$0xff]  ;;  %v1666_v26 = vld [vmem:[#allocation2 + $0x1738] sm:$0xff] }
 0x4ca   :  { %2850 = vmatprep.subr.bf16.mxu1 %v1568_v27  ;;  %3178 = vmatprep.subr.bf16.mxu0 %v1570_v4  ;;  %v1663_v27 = vld [vmem:[#allocation2 + $0x1720] sm:$0xff]  ;;  %v1665_v4 = vld [vmem:[#allocation2 + $0x1730] sm:$0xff] }
 0x4cc   :  { %2842 = vmatmul.mubr.bf16.vlgmr.msra.gmra.mrb[4].mxu1 %v4565_v8  ;;  %3170 = vmatmul.mubr.bf16.vlgmr.msra.gmra.mrb[8].mxu0 %v4565_v8  ;;  %v1594_v8 = vld [vmem:[#allocation2 + $0x14f8] sm:$0xff] }
 0x4cd   :  { %2851 = vmatpush1.bf16.msra.mxu1 %v1567_v0  ;;  %3179 = vmatpush1.bf16.msra.mxu0 %v1569_v37  ;;  %v1672_v0 = vld [vmem:[#allocation2 + $0x1768] sm:$0xff]  ;;  %v1674_v37 = vld [vmem:[#allocation2 + $0x1778] sm:$0xff] }
 0x4ce   :  { %2852 = vmatprep.subr.bf16.mxu1 %v1576_v51  ;;  %3180 = vmatprep.subr.bf16.mxu0 %v1578_v9  ;;  %v1671_v51 = vld [vmem:[#allocation2 + $0x1760] sm:$0xff]  ;;  %v1673_v9 = vld [vmem:[#allocation2 + $0x1770] sm:$0xff] }
 0x4cf   :  { %2882 = vmatprep.mubr.bf16.mxu1 %v4567_v15  ;;  %3210 = vmatprep.mubr.bf16.mxu0 %v4567_v15  ;;  %v1599_v15 = vld [vmem:[#allocation2 + $0x1520] sm:$0xff] }
 0x4d1   :  { %2853 = vmatpush1.bf16.msra.mxu1 %v1575_v1  ;;  %3181 = vmatpush1.bf16.msra.mxu0 %v1577_v12  ;;  %v1680_v1 = vld [vmem:[#allocation2 + $0x17a8] sm:$0xff]  ;;  %v1682_v12 = vld [vmem:[#allocation2 + $0x17b8] sm:$0xff] }
 0x4d2   :  { %2854 = vmatprep.subr.bf16.mxu1 %v1584_v13  ;;  %3182 = vmatprep.subr.bf16.mxu0 %v1586_v17  ;;  %v1679_v13 = vld [vmem:[#allocation2 + $0x17a0] sm:$0xff]  ;;  %v1681_v17 = vld [vmem:[#allocation2 + $0x17b0] sm:$0xff] }
 0x4d5   :  { %2855 = vmatpush1.bf16.msra.mxu1 %v1583_v50  ;;  %3183 = vmatpush1.bf16.msra.mxu0 %v1585_v19  ;;  %v1688_v50 = vld [vmem:[#allocation2 + $0x17e8] sm:$0xff]  ;;  %v1690_v19 = vld [vmem:[#allocation2 + $0x17f8] sm:$0xff] }
 0x4d6   :  { %2856 = vmatprep.subr.bf16.mxu1 %v1592_v24  ;;  %3184 = vmatprep.subr.bf16.mxu0 %v1594_v8  ;;  %v1687_v24 = vld [vmem:[#allocation2 + $0x17e0] sm:$0xff]  ;;  %v1689_v8 = vld [vmem:[#allocation2 + $0x17f0] sm:$0xff] }
 0x4d9   :  { %2857 = vmatpush1.bf16.msra.mxu1 %v1591_v25  ;;  %3185 = vmatpush1.bf16.msra.mxu0 %v1593_v28  ;;  %v1696_v25 = vld [vmem:[#allocation2 + $0x1828] sm:$0xff]  ;;  %v1698_v28 = vld [vmem:[#allocation2 + $0x1838] sm:$0xff] }
 0x4da   :  { %2858 = vmatprep.subr.bf16.mxu1 %v1600_v30  ;;  %3186 = vmatprep.subr.bf16.mxu0 %v1602_v53  ;;  %v1695_v30 = vld [vmem:[#allocation2 + $0x1820] sm:$0xff]  ;;  %v1697_v53 = vld [vmem:[#allocation2 + $0x1830] sm:$0xff] }
 0x4dd   :  { %2859 = vmatpush1.bf16.msra.mxu1 %v1599_v15  ;;  %3187 = vmatpush1.bf16.msra.mxu0 %v1601_v57  ;;  %v1704_v15 = vld [vmem:[#allocation2 + $0x1868] sm:$0xff]  ;;  %v1706_v57 = vld [vmem:[#allocation2 + $0x1878] sm:$0xff] }
 0x4de   :  { %2860 = vmatprep.subr.bf16.mxu1 %v1608_v32  ;;  %3188 = vmatprep.subr.bf16.mxu0 %v1610_v33  ;;  %v1703_v32 = vld [vmem:[#allocation2 + $0x1860] sm:$0xff]  ;;  %v1705_v33 = vld [vmem:[#allocation2 + $0x1870] sm:$0xff] }
 0x4e1   :  { %2861 = vmatpush1.bf16.msra.mxu1 %v1607_v34  ;;  %3189 = vmatpush1.bf16.msra.mxu0 %v1609_v35  ;;  %v1712_v34 = vld [vmem:[#allocation2 + $0x18a8] sm:$0xff]  ;;  %v1714_v35 = vld [vmem:[#allocation2 + $0x18b8] sm:$0xff] }
 0x4e2   :  { %2862 = vmatprep.subr.bf16.mxu1 %v1616_v38  ;;  %3190 = vmatprep.subr.bf16.mxu0 %v1618_v40  ;;  %v1711_v38 = vld [vmem:[#allocation2 + $0x18a0] sm:$0xff]  ;;  %v1713_v40 = vld [vmem:[#allocation2 + $0x18b0] sm:$0xff] }
 0x4e5   :  { %2863 = vmatpush1.bf16.msra.mxu1 %v1615_v43  ;;  %3191 = vmatpush1.bf16.msra.mxu0 %v1617_v44  ;;  %v1720_v43 = vld [vmem:[#allocation2 + $0x18e8] sm:$0xff]  ;;  %v1719_v44 = vld [vmem:[#allocation2 + $0x18e0] sm:$0xff] }
 0x4e6   :  { %2864 = vmatprep.subr.bf16.mxu1 %v1624_v10  ;;  %3192 = vmatprep.subr.bf16.mxu0 %v1626_v47  ;;  %v1721_v10 = vld [vmem:[#allocation2 + $0x18f0] sm:$0xff]  ;;  %v1728_v47 = vld [vmem:[#allocation2 + $0x1928] sm:$0xff] }
 0x4e9   :  { %2865 = vmatpush1.bf16.msra.mxu1 %v1623_v14  ;;  %3193 = vmatpush1.bf16.msra.mxu0 %v1625_v20  ;;  %v1730_v14 = vld [vmem:[#allocation2 + $0x1938] sm:$0xff]  ;;  %v1729_v20 = vld [vmem:[#allocation2 + $0x1930] sm:$0xff] }
 0x4ea   :  { %2866 = vmatprep.subr.bf16.mxu1 %v1632_v41  ;;  %3194 = vmatprep.subr.bf16.mxu0 %v1634_v52  ;;  %v1736_v41 = vld [vmem:[#allocation2 + $0x1968] sm:$0xff]  ;;  %v1738_v52 = vld [vmem:[#allocation2 + $0x1978] sm:$0xff] }
 0x4ed   :  { %2867 = vmatpush1.bf16.msra.mxu1 %v1631_v22  ;;  %3195 = vmatpush1.bf16.msra.mxu0 %v1633_v54  ;;  %v1735_v22 = vld [vmem:[#allocation2 + $0x1960] sm:$0xff]  ;;  %v1737_v54 = vld [vmem:[#allocation2 + $0x1970] sm:$0xff] }
 0x4ee   :  { %2868 = vmatprep.subr.bf16.mxu1 %v1640_v36  ;;  %3196 = vmatprep.subr.bf16.mxu0 %v1642_v58  ;;  %v1744_v36 = vld [vmem:[#allocation2 + $0x19a8] sm:$0xff]  ;;  %v1746_v58 = vld [vmem:[#allocation2 + $0x19b8] sm:$0xff] }
 0x4f1   :  { %2869 = vmatpush1.bf16.msra.mxu1 %v1639_v62  ;;  %3197 = vmatpush1.bf16.msra.mxu0 %v1641_v63  ;;  %v1743_v62 = vld [vmem:[#allocation2 + $0x19a0] sm:$0xff]  ;;  %v1745_v63 = vld [vmem:[#allocation2 + $0x19b0] sm:$0xff] }
 0x4f2   :  { %2870 = vmatprep.subr.bf16.mxu1 %v1648_v48  ;;  %3198 = vmatprep.subr.bf16.mxu0 %v1650_v45  ;;  %v1752_v48 = vld [vmem:[#allocation2 + $0x19e8] sm:$0xff]  ;;  %v1754_v45 = vld [vmem:[#allocation2 + $0x19f8] sm:$0xff] }
 0x4f5   :  { %2871 = vmatpush1.bf16.msra.mxu1 %v1647_v39  ;;  %3199 = vmatpush1.bf16.msra.mxu0 %v1649_v2  ;;  %v1751_v39 = vld [vmem:[#allocation2 + $0x19e0] sm:$0xff]  ;;  %v1753_v2 = vld [vmem:[#allocation2 + $0x19f0] sm:$0xff] }
 0x4f6   :  { %2872 = vmatprep.subr.bf16.mxu1 %v1656_v6  ;;  %3200 = vmatprep.subr.bf16.mxu0 %v1658_v7  ;;  %v1760_v6 = vld [vmem:[#allocation2 + $0x1a28] sm:$0xff]  ;;  %v1762_v7 = vld [vmem:[#allocation2 + $0x1a38] sm:$0xff] }
 0x4f9   :  { %2873 = vmatpush1.bf16.msra.mxu1 %v1655_v31  ;;  %3201 = vmatpush1.bf16.msra.mxu0 %v1657_v61  ;;  %v1759_v31 = vld [vmem:[#allocation2 + $0x1a20] sm:$0xff]  ;;  %v1761_v61 = vld [vmem:[#allocation2 + $0x1a30] sm:$0xff] }
 0x4fa   :  { %2874 = vmatprep.subr.bf16.mxu1 %v1664_v60  ;;  %3202 = vmatprep.subr.bf16.mxu0 %v1666_v26  ;;  %v1768_v60 = vld [vmem:[#allocation2 + $0x1a68] sm:$0xff]  ;;  %v1770_v26 = vld [vmem:[#allocation2 + $0x1a78] sm:$0xff] }
 0x4fd   :  { %2875 = vmatpush1.bf16.msra.mxu1 %v1663_v27  ;;  %3203 = vmatpush1.bf16.msra.mxu0 %v1665_v4  ;;  %v1767_v27 = vld [vmem:[#allocation2 + $0x1a60] sm:$0xff]  ;;  %v1769_v4 = vld [vmem:[#allocation2 + $0x1a70] sm:$0xff] }
 0x4fe   :  { %2876 = vmatprep.subr.bf16.mxu1 %v1672_v0  ;;  %3204 = vmatprep.subr.bf16.mxu0 %v1674_v37  ;;  %v1776_v0 = vld [vmem:[#allocation2 + $0x1aa8] sm:$0xff]  ;;  %v1778_v37 = vld [vmem:[#allocation2 + $0x1ab8] sm:$0xff] }
 0x501   :  { %2877 = vmatpush1.bf16.msra.mxu1 %v1671_v51  ;;  %3205 = vmatpush1.bf16.msra.mxu0 %v1673_v9  ;;  %v1775_v51 = vld [vmem:[#allocation2 + $0x1aa0] sm:$0xff]  ;;  %v1777_v9 = vld [vmem:[#allocation2 + $0x1ab0] sm:$0xff] }
 0x502   :  { %2878 = vmatprep.subr.bf16.mxu1 %v1680_v1  ;;  %3206 = vmatprep.subr.bf16.mxu0 %v1682_v12  ;;  %v1784_v1 = vld [vmem:[#allocation2 + $0x1ae8] sm:$0xff]  ;;  %v1786_v12 = vld [vmem:[#allocation2 + $0x1af8] sm:$0xff] }
 0x505   :  { %2879 = vmatpush1.bf16.msra.mxu1 %v1679_v13  ;;  %3207 = vmatpush1.bf16.msra.mxu0 %v1681_v17  ;;  %v1783_v13 = vld [vmem:[#allocation2 + $0x1ae0] sm:$0xff]  ;;  %v1785_v17 = vld [vmem:[#allocation2 + $0x1af0] sm:$0xff] }
 0x506   :  { %2880 = vmatprep.subr.bf16.mxu1 %v1688_v50  ;;  %3208 = vmatprep.subr.bf16.mxu0 %v1690_v19  ;;  %v1792_v50 = vld [vmem:[#allocation2 + $0x1b28] sm:$0xff]  ;;  %v1794_v19 = vld [vmem:[#allocation2 + $0x1b38] sm:$0xff] }
 0x509   :  { %2881 = vmatpush1.bf16.msra.mxu1 %v1687_v24  ;;  %3209 = vmatpush1.bf16.msra.mxu0 %v1689_v8  ;;  %v1791_v24 = vld [vmem:[#allocation2 + $0x1b20] sm:$0xff]  ;;  %v1793_v8 = vld [vmem:[#allocation2 + $0x1b30] sm:$0xff] }
 0x50a   :  { %2891 = vmatprep.subr.bf16.mxu1 %v1696_v25  ;;  %3219 = vmatprep.subr.bf16.mxu0 %v1698_v28  ;;  %v1800_v25 = vld [vmem:[#allocation2 + $0x1b68] sm:$0xff]  ;;  %v1802_v28 = vld [vmem:[#allocation2 + $0x1b78] sm:$0xff] }
 0x50c   :  { %2883 = vmatmul.mubr.bf16.vlgmr.msra.gmra.mrb[4].mxu1 %v4583_v11  ;;  %3211 = vmatmul.mubr.bf16.vlgmr.msra.gmra.mrb[8].mxu0 %v4583_v11  ;;  %v1722_v11 = vld [vmem:[#allocation2 + $0x18f8] sm:$0xff] }
 0x50d   :  { %2892 = vmatpush1.bf16.msra.mxu1 %v1695_v30  ;;  %3220 = vmatpush1.bf16.msra.mxu0 %v1697_v53  ;;  %v1799_v30 = vld [vmem:[#allocation2 + $0x1b60] sm:$0xff]  ;;  %v1801_v53 = vld [vmem:[#allocation2 + $0x1b70] sm:$0xff] }
 0x50e   :  { %2893 = vmatprep.subr.bf16.mxu1 %v1704_v15  ;;  %3221 = vmatprep.subr.bf16.mxu0 %v1706_v57  ;;  %v1808_v15 = vld [vmem:[#allocation2 + $0x1ba8] sm:$0xff]  ;;  %v1810_v57 = vld [vmem:[#allocation2 + $0x1bb8] sm:$0xff] }
 0x50f   :  { %2923 = vmatprep.mubr.bf16.mxu1 %v4585_v49  ;;  %3251 = vmatprep.mubr.bf16.mxu0 %v4585_v49  ;;  %v1727_v49 = vld [vmem:[#allocation2 + $0x1920] sm:$0xff] }
 0x511   :  { %2894 = vmatpush1.bf16.msra.mxu1 %v1703_v32  ;;  %3222 = vmatpush1.bf16.msra.mxu0 %v1705_v33  ;;  %v1807_v32 = vld [vmem:[#allocation2 + $0x1ba0] sm:$0xff]  ;;  %v1809_v33 = vld [vmem:[#allocation2 + $0x1bb0] sm:$0xff] }
 0x512   :  { %2895 = vmatprep.subr.bf16.mxu1 %v1712_v34  ;;  %3223 = vmatprep.subr.bf16.mxu0 %v1714_v35  ;;  %v1816_v34 = vld [vmem:[#allocation2 + $0x1be8] sm:$0xff]  ;;  %v1818_v35 = vld [vmem:[#allocation2 + $0x1bf8] sm:$0xff] }
 0x515   :  { %2896 = vmatpush1.bf16.msra.mxu1 %v1711_v38  ;;  %3224 = vmatpush1.bf16.msra.mxu0 %v1713_v40  ;;  %v1815_v38 = vld [vmem:[#allocation2 + $0x1be0] sm:$0xff]  ;;  %v1817_v40 = vld [vmem:[#allocation2 + $0x1bf0] sm:$0xff] }
 0x516   :  { %2897 = vmatprep.subr.bf16.mxu1 %v1720_v43  ;;  %3225 = vmatprep.subr.bf16.mxu0 %v1722_v11  ;;  %v1824_v43 = vld [vmem:[#allocation2 + $0x1c28] sm:$0xff]  ;;  %v1826_v11 = vld [vmem:[#allocation2 + $0x1c38] sm:$0xff] }
 0x519   :  { %2898 = vmatpush1.bf16.msra.mxu1 %v1719_v44  ;;  %3226 = vmatpush1.bf16.msra.mxu0 %v1721_v10  ;;  %v1823_v44 = vld [vmem:[#allocation2 + $0x1c20] sm:$0xff]  ;;  %v1825_v10 = vld [vmem:[#allocation2 + $0x1c30] sm:$0xff] }
 0x51a   :  { %2899 = vmatprep.subr.bf16.mxu1 %v1728_v47  ;;  %3227 = vmatprep.subr.bf16.mxu0 %v1730_v14  ;;  %v1832_v47 = vld [vmem:[#allocation2 + $0x1c68] sm:$0xff]  ;;  %v1834_v14 = vld [vmem:[#allocation2 + $0x1c78] sm:$0xff] }
 0x51d   :  { %2900 = vmatpush1.bf16.msra.mxu1 %v1727_v49  ;;  %3228 = vmatpush1.bf16.msra.mxu0 %v1729_v20  ;;  %v1831_v49 = vld [vmem:[#allocation2 + $0x1c60] sm:$0xff]  ;;  %v1833_v20 = vld [vmem:[#allocation2 + $0x1c70] sm:$0xff] }
 0x51e   :  { %2901 = vmatprep.subr.bf16.mxu1 %v1736_v41  ;;  %3229 = vmatprep.subr.bf16.mxu0 %v1738_v52  ;;  %v1840_v41 = vld [vmem:[#allocation2 + $0x1ca8] sm:$0xff]  ;;  %v1842_v52 = vld [vmem:[#allocation2 + $0x1cb8] sm:$0xff] }
 0x521   :  { %2902 = vmatpush1.bf16.msra.mxu1 %v1735_v22  ;;  %3230 = vmatpush1.bf16.msra.mxu0 %v1737_v54  ;;  %v1839_v22 = vld [vmem:[#allocation2 + $0x1ca0] sm:$0xff]  ;;  %v1841_v54 = vld [vmem:[#allocation2 + $0x1cb0] sm:$0xff] }
 0x522   :  { %2903 = vmatprep.subr.bf16.mxu1 %v1744_v36  ;;  %3231 = vmatprep.subr.bf16.mxu0 %v1746_v58  ;;  %v1848_v36 = vld [vmem:[#allocation2 + $0x1ce8] sm:$0xff]  ;;  %v1847_v58 = vld [vmem:[#allocation2 + $0x1ce0] sm:$0xff] }
 0x525   :  { %2904 = vmatpush1.bf16.msra.mxu1 %v1743_v62  ;;  %3232 = vmatpush1.bf16.msra.mxu0 %v1745_v63  ;;  %v1849_v62 = vld [vmem:[#allocation2 + $0x1cf0] sm:$0xff]  ;;  %v1856_v63 = vld [vmem:[#allocation2 + $0x1d28] sm:$0xff] }
 0x526   :  { %2905 = vmatprep.subr.bf16.mxu1 %v1752_v48  ;;  %3233 = vmatprep.subr.bf16.mxu0 %v1754_v45  ;;  %v1858_v48 = vld [vmem:[#allocation2 + $0x1d38] sm:$0xff]  ;;  %v1857_v45 = vld [vmem:[#allocation2 + $0x1d30] sm:$0xff] }
 0x529   :  { %2906 = vmatpush1.bf16.msra.mxu1 %v1751_v39  ;;  %3234 = vmatpush1.bf16.msra.mxu0 %v1753_v2  ;;  %v1864_v39 = vld [vmem:[#allocation2 + $0x1d68] sm:$0xff]  ;;  %v1866_v2 = vld [vmem:[#allocation2 + $0x1d78] sm:$0xff] }
 0x52a   :  { %2907 = vmatprep.subr.bf16.mxu1 %v1760_v6  ;;  %3235 = vmatprep.subr.bf16.mxu0 %v1762_v7  ;;  %v1863_v6 = vld [vmem:[#allocation2 + $0x1d60] sm:$0xff]  ;;  %v1865_v7 = vld [vmem:[#allocation2 + $0x1d70] sm:$0xff] }
 0x52d   :  { %2908 = vmatpush1.bf16.msra.mxu1 %v1759_v31  ;;  %3236 = vmatpush1.bf16.msra.mxu0 %v1761_v61  ;;  %v1872_v31 = vld [vmem:[#allocation2 + $0x1da8] sm:$0xff]  ;;  %v1874_v61 = vld [vmem:[#allocation2 + $0x1db8] sm:$0xff] }
 0x52e   :  { %2909 = vmatprep.subr.bf16.mxu1 %v1768_v60  ;;  %3237 = vmatprep.subr.bf16.mxu0 %v1770_v26  ;;  %v1871_v60 = vld [vmem:[#allocation2 + $0x1da0] sm:$0xff]  ;;  %v1873_v26 = vld [vmem:[#allocation2 + $0x1db0] sm:$0xff] }
 0x531   :  { %2910 = vmatpush1.bf16.msra.mxu1 %v1767_v27  ;;  %3238 = vmatpush1.bf16.msra.mxu0 %v1769_v4  ;;  %v1880_v27 = vld [vmem:[#allocation2 + $0x1de8] sm:$0xff]  ;;  %v1882_v4 = vld [vmem:[#allocation2 + $0x1df8] sm:$0xff] }
 0x532   :  { %2911 = vmatprep.subr.bf16.mxu1 %v1776_v0  ;;  %3239 = vmatprep.subr.bf16.mxu0 %v1778_v37  ;;  %v1879_v0 = vld [vmem:[#allocation2 + $0x1de0] sm:$0xff]  ;;  %v1881_v37 = vld [vmem:[#allocation2 + $0x1df0] sm:$0xff] }
 0x535   :  { %2912 = vmatpush1.bf16.msra.mxu1 %v1775_v51  ;;  %3240 = vmatpush1.bf16.msra.mxu0 %v1777_v9  ;;  %v1888_v51 = vld [vmem:[#allocation2 + $0x1e28] sm:$0xff]  ;;  %v1890_v9 = vld [vmem:[#allocation2 + $0x1e38] sm:$0xff] }
 0x536   :  { %2913 = vmatprep.subr.bf16.mxu1 %v1784_v1  ;;  %3241 = vmatprep.subr.bf16.mxu0 %v1786_v12  ;;  %v1887_v1 = vld [vmem:[#allocation2 + $0x1e20] sm:$0xff]  ;;  %v1889_v12 = vld [vmem:[#allocation2 + $0x1e30] sm:$0xff] }
 0x539   :  { %2914 = vmatpush1.bf16.msra.mxu1 %v1783_v13  ;;  %3242 = vmatpush1.bf16.msra.mxu0 %v1785_v17  ;;  %v1896_v13 = vld [vmem:[#allocation2 + $0x1e68] sm:$0xff]  ;;  %v1898_v17 = vld [vmem:[#allocation2 + $0x1e78] sm:$0xff] }
 0x53a   :  { %2915 = vmatprep.subr.bf16.mxu1 %v1792_v50  ;;  %3243 = vmatprep.subr.bf16.mxu0 %v1794_v19  ;;  %v1895_v50 = vld [vmem:[#allocation2 + $0x1e60] sm:$0xff]  ;;  %v1897_v19 = vld [vmem:[#allocation2 + $0x1e70] sm:$0xff] }
 0x53d   :  { %2916 = vmatpush1.bf16.msra.mxu1 %v1791_v24  ;;  %3244 = vmatpush1.bf16.msra.mxu0 %v1793_v8  ;;  %v1904_v24 = vld [vmem:[#allocation2 + $0x1ea8] sm:$0xff]  ;;  %v1906_v8 = vld [vmem:[#allocation2 + $0x1eb8] sm:$0xff] }
 0x53e   :  { %2917 = vmatprep.subr.bf16.mxu1 %v1800_v25  ;;  %3245 = vmatprep.subr.bf16.mxu0 %v1802_v28  ;;  %v1903_v25 = vld [vmem:[#allocation2 + $0x1ea0] sm:$0xff]  ;;  %v1905_v28 = vld [vmem:[#allocation2 + $0x1eb0] sm:$0xff] }
 0x541   :  { %2918 = vmatpush1.bf16.msra.mxu1 %v1799_v30  ;;  %3246 = vmatpush1.bf16.msra.mxu0 %v1801_v53  ;;  %v1912_v30 = vld [vmem:[#allocation2 + $0x1ee8] sm:$0xff]  ;;  %v1914_v53 = vld [vmem:[#allocation2 + $0x1ef8] sm:$0xff] }
 0x542   :  { %2919 = vmatprep.subr.bf16.mxu1 %v1808_v15  ;;  %3247 = vmatprep.subr.bf16.mxu0 %v1810_v57  ;;  %v1911_v15 = vld [vmem:[#allocation2 + $0x1ee0] sm:$0xff]  ;;  %v1913_v57 = vld [vmem:[#allocation2 + $0x1ef0] sm:$0xff] }
 0x545   :  { %2920 = vmatpush1.bf16.msra.mxu1 %v1807_v32  ;;  %3248 = vmatpush1.bf16.msra.mxu0 %v1809_v33  ;;  %v1920_v32 = vld [vmem:[#allocation2 + $0x1f28] sm:$0xff]  ;;  %v1922_v33 = vld [vmem:[#allocation2 + $0x1f38] sm:$0xff] }
 0x546   :  { %2921 = vmatprep.subr.bf16.mxu1 %v1816_v34  ;;  %3249 = vmatprep.subr.bf16.mxu0 %v1818_v35  ;;  %v1919_v34 = vld [vmem:[#allocation2 + $0x1f20] sm:$0xff]  ;;  %v1921_v35 = vld [vmem:[#allocation2 + $0x1f30] sm:$0xff] }
 0x549   :  { %2922 = vmatpush1.bf16.msra.mxu1 %v1815_v38  ;;  %3250 = vmatpush1.bf16.msra.mxu0 %v1817_v40  ;;  %v1928_v38 = vld [vmem:[#allocation2 + $0x1f68] sm:$0xff]  ;;  %v1930_v40 = vld [vmem:[#allocation2 + $0x1f78] sm:$0xff] }
 0x54a   :  { %2932 = vmatprep.subr.bf16.mxu1 %v1824_v43  ;;  %3260 = vmatprep.subr.bf16.mxu0 %v1826_v11  ;;  %v1927_v43 = vld [vmem:[#allocation2 + $0x1f60] sm:$0xff]  ;;  %v1929_v11 = vld [vmem:[#allocation2 + $0x1f70] sm:$0xff] }
 0x54c   :  { %2924 = vmatmul.mubr.bf16.vlgmr.msra.gmra.mrb[4].mxu1 %v4600_v42  ;;  %3252 = vmatmul.mubr.bf16.vlgmr.msra.gmra.mrb[8].mxu0 %v4600_v42  ;;  %v1850_v42 = vld [vmem:[#allocation2 + $0x1cf8] sm:$0xff] }
 0x54d   :  { %2933 = vmatpush1.bf16.msra.mxu1 %v1823_v44  ;;  %3261 = vmatpush1.bf16.msra.mxu0 %v1825_v10  ;;  %v1936_v44 = vld [vmem:[#allocation2 + $0x1fa8] sm:$0xff]  ;;  %v1938_v10 = vld [vmem:[#allocation2 + $0x1fb8] sm:$0xff] }
 0x54e   :  { %2934 = vmatprep.subr.bf16.mxu1 %v1832_v47  ;;  %3262 = vmatprep.subr.bf16.mxu0 %v1834_v14  ;;  %v1935_v47 = vld [vmem:[#allocation2 + $0x1fa0] sm:$0xff]  ;;  %v1937_v14 = vld [vmem:[#allocation2 + $0x1fb0] sm:$0xff] }
 0x54f   :  { %2964 = vmatprep.mubr.bf16.mxu1 %v4602_v3  ;;  %3292 = vmatprep.mubr.bf16.mxu0 %v4602_v3  ;;  %v1855_v3 = vld [vmem:[#allocation2 + $0x1d20] sm:$0xff] }
 0x551   :  { %2935 = vmatpush1.bf16.msra.mxu1 %v1831_v49  ;;  %3263 = vmatpush1.bf16.msra.mxu0 %v1833_v20  ;;  %v1944_v49 = vld [vmem:[#allocation2 + $0x1fe8] sm:$0xff]  ;;  %v1946_v20 = vld [vmem:[#allocation2 + $0x1ff8] sm:$0xff] }
 0x552   :  { %2936 = vmatprep.subr.bf16.mxu1 %v1840_v41  ;;  %3264 = vmatprep.subr.bf16.mxu0 %v1842_v52  ;;  %v1943_v41 = vld [vmem:[#allocation2 + $0x1fe0] sm:$0xff]  ;;  %v1945_v52 = vld [vmem:[#allocation2 + $0x1ff0] sm:$0xff] }
 0x555   :  { %2937 = vmatpush1.bf16.msra.mxu1 %v1839_v22  ;;  %3265 = vmatpush1.bf16.msra.mxu0 %v1841_v54  ;;  %v1967_v22 = vsub.s32 4, %v4461_v46  ;;  %v1975_v54 = vsub.s32 6, %v4461_v46 }
 0x556   :  { %2938 = vmatprep.subr.bf16.mxu1 %v1848_v36  ;;  %3266 = vmatprep.subr.bf16.mxu0 %v1850_v42  ;;  %v1971_v36 = vsub.s32 5, %v4461_v46  ;;  %v1979_v42 = vsub.s32 7, %v4461_v46 }
 0x559   :  { %2939 = vmatpush1.bf16.msra.mxu1 %v1847_v58  ;;  %3267 = vmatpush1.bf16.msra.mxu0 %v1849_v62  ;;  %v3908_v58 = vld [vmem:[#allocation11] sm:$0xff] }
 0x55a   :  { %2940 = vmatprep.subr.bf16.mxu1 %v1856_v63  ;;  %3268 = vmatprep.subr.bf16.mxu0 %v1858_v48  ;;  %v1968_v62 = vrot.slane %v3908_v58, %v1967_v22  ;;  %v1976_v63 = vrot.slane %v3908_v58, %v1975_v54  ;;  %v1972_v48 = vrot.slane %v3908_v58, %v1971_v36 }
 0x55d   :  { %2941 = vmatpush1.bf16.msra.mxu1 %v1855_v3  ;;  %3269 = vmatpush1.bf16.msra.mxu0 %v1857_v45  ;;  %v1980_v3 = vrot.slane %v3908_v58, %v1979_v42 }
 0x55e   :  { %2942 = vmatprep.subr.bf16.mxu1 %v1864_v39  ;;  %3270 = vmatprep.subr.bf16.mxu0 %v1866_v2 }
 0x561   :  { %2943 = vmatpush1.bf16.msra.mxu1 %v1863_v6  ;;  %3271 = vmatpush1.bf16.msra.mxu0 %v1865_v7 }
 0x562   :  { %2944 = vmatprep.subr.bf16.mxu1 %v1872_v31  ;;  %3272 = vmatprep.subr.bf16.mxu0 %v1874_v61 }
 0x565   :  { %2945 = vmatpush1.bf16.msra.mxu1 %v1871_v60  ;;  %3273 = vmatpush1.bf16.msra.mxu0 %v1873_v26 }
 0x566   :  { %2946 = vmatprep.subr.bf16.mxu1 %v1880_v27  ;;  %3274 = vmatprep.subr.bf16.mxu0 %v1882_v4 }
 0x569   :  { %2947 = vmatpush1.bf16.msra.mxu1 %v1879_v0  ;;  %3275 = vmatpush1.bf16.msra.mxu0 %v1881_v37 }
 0x56a   :  { %2948 = vmatprep.subr.bf16.mxu1 %v1888_v51  ;;  %3276 = vmatprep.subr.bf16.mxu0 %v1890_v9 }
 0x56d   :  { %2949 = vmatpush1.bf16.msra.mxu1 %v1887_v1  ;;  %3277 = vmatpush1.bf16.msra.mxu0 %v1889_v12 }
 0x56e   :  { %2950 = vmatprep.subr.bf16.mxu1 %v1896_v13  ;;  %3278 = vmatprep.subr.bf16.mxu0 %v1898_v17 }
 0x571   :  { %2951 = vmatpush1.bf16.msra.mxu1 %v1895_v50  ;;  %3279 = vmatpush1.bf16.msra.mxu0 %v1897_v19 }
 0x572   :  { %2952 = vmatprep.subr.bf16.mxu1 %v1904_v24  ;;  %3280 = vmatprep.subr.bf16.mxu0 %v1906_v8 }
 0x575   :  { %2953 = vmatpush1.bf16.msra.mxu1 %v1903_v25  ;;  %3281 = vmatpush1.bf16.msra.mxu0 %v1905_v28 }
 0x576   :  { %2954 = vmatprep.subr.bf16.mxu1 %v1912_v30  ;;  %3282 = vmatprep.subr.bf16.mxu0 %v1914_v53 }
 0x579   :  { %2955 = vmatpush1.bf16.msra.mxu1 %v1911_v15  ;;  %3283 = vmatpush1.bf16.msra.mxu0 %v1913_v57 }
 0x57a   :  { %2956 = vmatprep.subr.bf16.mxu1 %v1920_v32  ;;  %3284 = vmatprep.subr.bf16.mxu0 %v1922_v33 }
 0x57d   :  { %2957 = vmatpush1.bf16.msra.mxu1 %v1919_v34  ;;  %3285 = vmatpush1.bf16.msra.mxu0 %v1921_v35 }
 0x57e   :  { %2958 = vmatprep.subr.bf16.mxu1 %v1928_v38  ;;  %3286 = vmatprep.subr.bf16.mxu0 %v1930_v40 }
 0x581   :  { %2959 = vmatpush1.bf16.msra.mxu1 %v1927_v43  ;;  %3287 = vmatpush1.bf16.msra.mxu0 %v1929_v11 }
 0x582   :  { %2960 = vmatprep.subr.bf16.mxu1 %v1936_v44  ;;  %3288 = vmatprep.subr.bf16.mxu0 %v1938_v10 }
 0x585   :  { %2961 = vmatpush1.bf16.msra.mxu1 %v1935_v47  ;;  %3289 = vmatpush1.bf16.msra.mxu0 %v1937_v14 }
 0x586   :  { %2962 = vmatprep.subr.bf16.mxu1 %v1944_v49  ;;  %3290 = vmatprep.subr.bf16.mxu0 %v1946_v20 }
 0x589   :  { %2963 = vmatpush1.bf16.msra.mxu1 %v1943_v41  ;;  %3291 = vmatpush1.bf16.msra.mxu0 %v1945_v52 }
 0x58c   :  { %2965 = vmatmul.mubr.bf16.vlgmr.msra.gmra.mrb[4].mxu1 %v4610_v56  ;;  %3293 = vmatmul.mubr.bf16.vlgmr.msra.gmra.mrb[8].mxu0 %v4610_v56 }
 0x65f   :  { %v2966_v45 = vpop.f32.mrb[4].mxu1  ;;  %v3294_v39 = vpop.f32.mrb[8].mxu0 }
 0x660   :  { %v4666_v2 = vadd.f32 %v2966_v45, %v1968_v62  ;;  %v4668_v6 = vadd.f32 %v3294_v39, %v1976_v63  ;;  %v2968_v56 = vpop.f32.mrb[5].mxu1  ;;  %v3296_v7 = vpop.f32.mrb[9].mxu0 }
 0x661   :  { %v4670_v31 = vadd.f32 %v2968_v56, %v1972_v48  ;;  %v4672_v61 = vadd.f32 %v3296_v7, %v1980_v3  ;;  %v2970_v60 = vpop.f32.mrb[6].mxu1  ;;  %v3298_v26 = vpop.f32.mrb[10].mxu0 }
 0x662   :  { %v3305_v46 = vmax.f32 %v4666_v2, 0.0  ;;  %v3307_v27 = vmax.f32 %v4668_v6, 0.0  ;;  %v2971_v4 = vpop.f32.mrb[7].mxu1  ;;  %v3299_v0 = vpop.f32.mrb[11].mxu0 }
 0x663   :  { %v3306_v37 = vmax.f32 %v4670_v31, 0.0  ;;  %v3308_v51 = vmax.f32 %v4672_v61, 0.0 }
 0x664   :  { %4049 = dma.done.wait [#allocation5 + $0x1], 8192 }
 0x665   :  { %4050 = vsyncadd [#allocation5 + $0x1], 4294959104  ;;  %v3314_v9 = vpack.c.bf16 %v3302_v29, %v3302_v29  ;;  %v3316_v1 = vpack.c.bf16 %v3304_v5, %v3304_v5  ;;  %v3329_v12 = vld [vmem:[#allocation3 + $0x40] sm:$0xff]  ;;  %v3330_v19 = vld [vmem:[#allocation3 + $0x48] sm:$0xff]  ;;  %v3313_v54 = vpack.c.bf16 %v3301_v18, %v3301_v18  ;;  %v3315_v36 = vpack.c.bf16 %v3303_v23, %v3303_v23  ;;  %s4069_s5 = smov [#allocation14]  }
 0x666   :  { %v3345_v13 = vld [vmem:[#allocation3 + $0xc0] sm:$0xff]  ;;  %3657 = vmatprep.subr.bf16.mxu1 %v3329_v12  ;;  %v3346_v24 = vld [vmem:[#allocation3 + $0xc8] sm:$0xff]  ;;  %v3331_v8 = vld [vmem:[#allocation3 + $0x50] sm:$0xff]  ;;  %v3318_v48 = vpack.c.bf16 %v3306_v37, %v3306_v37  ;;  %v3320_v55 = vpack.c.bf16 %v3308_v51, %v3308_v51  ;;  %s3559_s26 = sshll.u32 %s4069_s5, 4  ;;  %s3560_s26 = int_to_ptr.vmem [resolvable:$true] %s3559_s26 }
 0x667   :  { %3424 = vmatprep.mubr.bf16.mxu1 %v3314_v9  ;;  %3464 = vmatprep.mubr.bf16.mxu0 %v3316_v1  ;;  %v3321_v17 = vld [vmem:[#allocation3] sm:$0xff]  ;;  %v3322_v16 = vld [vmem:[#allocation3 + $0x8] sm:$0xff]  ;;  %v3347_v59 = vld [vmem:[#allocation3 + $0xd0] sm:$0xff]  ;;  %s4019_s4 = scalar_lea.vmem %s3560_s26, 32  ;;  %p4024_p13 = scmp.lt.s32.totalorder %s3560_s26, %s3560_s26 }
 0x668   :  { %3679 = vmatprep.subr.bf16.mxu0 %v3345_v13  ;;  %v3337_v50 = vld [vmem:[#allocation3 + $0x80] sm:$0xff]  ;;  %3658 = vmatpush3.bf16.msra.mxu1 %v3321_v17  ;;  %v3338_v29 = vld [vmem:[#allocation3 + $0x88] sm:$0xff]  ;;  %v3323_v5 = vld [vmem:[#allocation3 + $0x10] sm:$0xff]  ;;  %p4020_p12 = scmp.ne.s32.totalorder %s3560_s26, %s4019_s4  ;;  %p4025_p0 = scmp.lt.s32.totalorder %s4019_s4, %s4019_s4 }
 0x669   :  { %3680 = vmatpush3.bf16.msra.mxu0 %v3337_v50  ;;  %3659 = vmatprep.subr.bf16.mxu1 %v3330_v19  ;;  %v3339_v25 = vld [vmem:[#allocation3 + $0x90] sm:$0xff]  ;;  %v3332_v28 = vld [vmem:[#allocation3 + $0x58] sm:$0xff]  ;;  %v3333_v57 = vld [vmem:[#allocation3 + $0x60] sm:$0xff] }
 0x66a   :  { %3681 = vmatprep.subr.bf16.mxu0 %v3346_v24  ;;  %v3348_v30 = vld [vmem:[#allocation3 + $0xd8] sm:$0xff]  ;;  %v3349_v32 = vld [vmem:[#allocation3 + $0xe0] sm:$0xff]  ;;  %v3334_v35 = vld [vmem:[#allocation3 + $0x68] sm:$0xff]  ;;  %p4026_p1 = por %p4025_p0, %p4024_p13 }
 0x66b   :  { %v3324_v53 = vld [vmem:[#allocation3 + $0x18] sm:$0xff]  ;;  %v3325_v33 = vld [vmem:[#allocation3 + $0x20] sm:$0xff]  ;;  %v3350_v38 = vld [vmem:[#allocation3 + $0xe8] sm:$0xff] }
 0x66c   :  { %3660 = vmatpush3.bf16.msra.mxu1 %v3322_v16  ;;  %v3340_v15 = vld [vmem:[#allocation3 + $0x98] sm:$0xff]  ;;  %v3341_v34 = vld [vmem:[#allocation3 + $0xa0] sm:$0xff]  ;;  %v3326_v40 = vld [vmem:[#allocation3 + $0x28] sm:$0xff]  ;;  %p4027_p2 = pnand %p4026_p1, %p4020_p12 }
 0x66d   :  { %3682 = vmatpush3.bf16.msra.mxu0 %v3338_v29  ;;  %3661 = vmatprep.subr.bf16.mxu1 %v3331_v8  ;;  %v3342_v43 = vld [vmem:[#allocation3 + $0xa8] sm:$0xff]  ;;  %v3335_v11 = vld [vmem:[#allocation3 + $0x70] sm:$0xff]  ;;  %v3336_v14 = vld [vmem:[#allocation3 + $0x78] sm:$0xff]  ;;  %v3317_v8 = vpack.c.bf16 %v3305_v46, %v3305_v46 }
 0x66e   :  { %3683 = vmatprep.subr.bf16.mxu0 %v3347_v59  ;;  %v3351_v44 = vld [vmem:[#allocation3 + $0xf0] sm:$0xff]  ;;  %v3352_v49 = vld [vmem:[#allocation3 + $0xf8] sm:$0xff]  ;;  %v3361_v52 = vld [vmem:[#allocation3 + $0x140] sm:$0xff]  ;;  %v3319_v59 = vpack.c.bf16 %v3307_v27, %v3307_v27 }
 0x66f   :  { %v3327_v10 = vld [vmem:[#allocation3 + $0x30] sm:$0xff]  ;;  %v3328_v20 = vld [vmem:[#allocation3 + $0x38] sm:$0xff]  ;;  %v3377_v22 = vld [vmem:[#allocation3 + $0x1c0] sm:$0xff] }
 0x670   :  { %3662 = vmatpush3.bf16.msra.mxu1 %v3323_v5  ;;  %v3343_v47 = vld [vmem:[#allocation3 + $0xb0] sm:$0xff]  ;;  %v3344_v41 = vld [vmem:[#allocation3 + $0xb8] sm:$0xff]  ;;  %v3353_v42 = vld [vmem:[#allocation3 + $0x100] sm:$0xff] }
 0x671   :  { %3684 = vmatpush3.bf16.msra.mxu0 %v3339_v25  ;;  %3663 = vmatprep.subr.bf16.mxu1 %v3332_v28  ;;  %v3369_v58 = vld [vmem:[#allocation3 + $0x180] sm:$0xff]  ;;  %v3362_v62 = vld [vmem:[#allocation3 + $0x148] sm:$0xff]  ;;  %v3363_v23 = vld [vmem:[#allocation3 + $0x150] sm:$0xff] }
 0x672   :  { %3685 = vmatprep.subr.bf16.mxu0 %v3348_v30  ;;  %v3378_v63 = vld [vmem:[#allocation3 + $0x1c8] sm:$0xff]  ;;  %v3379_v3 = vld [vmem:[#allocation3 + $0x1d0] sm:$0xff]  ;;  %v3364_v56 = vld [vmem:[#allocation3 + $0x158] sm:$0xff] }
 0x673   :  { %v3354_v21 = vld [vmem:[#allocation3 + $0x108] sm:$0xff]  ;;  %v3355_v45 = vld [vmem:[#allocation3 + $0x110] sm:$0xff]  ;;  %v3380_v7 = vld [vmem:[#allocation3 + $0x1d8] sm:$0xff] }
 0x674   :  { %3664 = vmatpush3.bf16.msra.mxu1 %v3324_v53  ;;  %v3370_v18 = vld [vmem:[#allocation3 + $0x188] sm:$0xff]  ;;  %v3371_v39 = vld [vmem:[#allocation3 + $0x190] sm:$0xff]  ;;  %v3356_v31 = vld [vmem:[#allocation3 + $0x118] sm:$0xff] }
 0x675   :  { %3686 = vmatpush3.bf16.msra.mxu0 %v3340_v15  ;;  %3665 = vmatprep.subr.bf16.mxu1 %v3333_v57  ;;  %v3372_v61 = vld [vmem:[#allocation3 + $0x198] sm:$0xff]  ;;  %v3365_v60 = vld [vmem:[#allocation3 + $0x160] sm:$0xff]  ;;  %v3366_v37 = vld [vmem:[#allocation3 + $0x168] sm:$0xff] }
 0x676   :  { %3687 = vmatprep.subr.bf16.mxu0 %v3349_v32  ;;  %v3381_v26 = vld [vmem:[#allocation3 + $0x1e0] sm:$0xff]  ;;  %v3382_v51 = vld [vmem:[#allocation3 + $0x1e8] sm:$0xff]  ;;  %v3367_v12 = vld [vmem:[#allocation3 + $0x170] sm:$0xff] }
 0x677   :  { %v3357_v4 = vld [vmem:[#allocation3 + $0x120] sm:$0xff]  ;;  %v3358_v9 = vld [vmem:[#allocation3 + $0x128] sm:$0xff]  ;;  %v3383_v13 = vld [vmem:[#allocation3 + $0x1f0] sm:$0xff] }
 0x678   :  { %3666 = vmatpush3.bf16.msra.mxu1 %v3325_v33  ;;  %v3373_v0 = vld [vmem:[#allocation3 + $0x1a0] sm:$0xff]  ;;  %v3374_v1 = vld [vmem:[#allocation3 + $0x1a8] sm:$0xff]  ;;  %v3359_v17 = vld [vmem:[#allocation3 + $0x130] sm:$0xff] }
 0x679   :  { %3688 = vmatpush3.bf16.msra.mxu0 %v3341_v34  ;;  %3667 = vmatprep.subr.bf16.mxu1 %v3334_v35  ;;  %v3375_v50 = vld [vmem:[#allocation3 + $0x1b0] sm:$0xff]  ;;  %v3368_v19 = vld [vmem:[#allocation3 + $0x178] sm:$0xff]  ;;  %v3646_v28 = vld [vmem:[#allocation12] ss:$0 sm:$0xff] }
 0x67a   :  { %3689 = vmatprep.subr.bf16.mxu0 %v3350_v38  ;;  %v3384_v24 = vld [vmem:[#allocation3 + $0x1f8] sm:$0xff] }
 0x67b   :  { %v3360_v16 = vld [vmem:[#allocation3 + $0x138] sm:$0xff] }
 0x67c   :  { %3668 = vmatpush3.bf16.msra.mxu1 %v3326_v40  ;;  %v3376_v29 = vld [vmem:[#allocation3 + $0x1b8] sm:$0xff] }
 0x67d   :  { %3690 = vmatpush3.bf16.msra.mxu0 %v3342_v43  ;;  %3669 = vmatprep.subr.bf16.mxu1 %v3335_v11 }
 0x67e   :  { %3691 = vmatprep.subr.bf16.mxu0 %v3351_v44 }
 0x680   :  { %3670 = vmatpush3.bf16.msra.mxu1 %v3327_v10 }
 0x681   :  { %3692 = vmatpush3.bf16.msra.mxu0 %v3343_v47  ;;  %3671 = vmatprep.subr.bf16.mxu1 %v3336_v14 }
 0x682   :  { %3693 = vmatprep.subr.bf16.mxu0 %v3352_v49 }
 0x684   :  { %3672 = vmatpush3.bf16.msra.mxu1 %v3328_v20 }
 0x685   :  { %3694 = vmatpush3.bf16.msra.mxu0 %v3344_v41  ;;  %3701 = vmatprep.subr.bf16.mxu1 %v3361_v52 }
 0x686   :  { %3723 = vmatprep.subr.bf16.mxu0 %v3377_v22 }
 0x687   :  { %3425 = vmatmul.mubr.bf16.vlgmr.msra.gmra.mrb[8].mxu1 %v3313_v54 }
 0x688   :  { %3465 = vmatmul.mubr.bf16.vlgmr.msra.gmra.mrb[12].mxu0 %v3315_v36  ;;  %3702 = vmatpush3.bf16.msra.mxu1 %v3353_v42 }
 0x689   :  { %3724 = vmatpush3.bf16.msra.mxu0 %v3369_v58  ;;  %3703 = vmatprep.subr.bf16.mxu1 %v3362_v62 }
 0x68a   :  { %3725 = vmatprep.subr.bf16.mxu0 %v3378_v63  ;;  %3504 = vmatprep.mubr.bf16.mxu1 %v3318_v48 }
 0x68b   :  { %3544 = vmatprep.mubr.bf16.mxu0 %v3320_v55 }
 0x68c   :  { %3704 = vmatpush3.bf16.msra.mxu1 %v3354_v21 }
 0x68d   :  { %3726 = vmatpush3.bf16.msra.mxu0 %v3370_v18  ;;  %3705 = vmatprep.subr.bf16.mxu1 %v3363_v23 }
 0x68e   :  { %3727 = vmatprep.subr.bf16.mxu0 %v3379_v3 }
 0x690   :  { %3706 = vmatpush3.bf16.msra.mxu1 %v3355_v45 }
 0x691   :  { %3728 = vmatpush3.bf16.msra.mxu0 %v3371_v39  ;;  %3707 = vmatprep.subr.bf16.mxu1 %v3364_v56 }
 0x692   :  { %3729 = vmatprep.subr.bf16.mxu0 %v3380_v7 }
 0x694   :  { %3708 = vmatpush3.bf16.msra.mxu1 %v3356_v31 }
 0x695   :  { %3730 = vmatpush3.bf16.msra.mxu0 %v3372_v61  ;;  %3709 = vmatprep.subr.bf16.mxu1 %v3365_v60 }
 0x696   :  { %3731 = vmatprep.subr.bf16.mxu0 %v3381_v26 }
 0x698   :  { %3710 = vmatpush3.bf16.msra.mxu1 %v3357_v4 }
 0x699   :  { %3732 = vmatpush3.bf16.msra.mxu0 %v3373_v0  ;;  %3711 = vmatprep.subr.bf16.mxu1 %v3366_v37 }
 0x69a   :  { %3733 = vmatprep.subr.bf16.mxu0 %v3382_v51 }
 0x69c   :  { %3712 = vmatpush3.bf16.msra.mxu1 %v3358_v9 }
 0x69d   :  { %3734 = vmatpush3.bf16.msra.mxu0 %v3374_v1  ;;  %3713 = vmatprep.subr.bf16.mxu1 %v3367_v12 }
 0x69e   :  { %3735 = vmatprep.subr.bf16.mxu0 %v3383_v13 }
 0x6a0   :  { %3714 = vmatpush3.bf16.msra.mxu1 %v3359_v17 }
 0x6a1   :  { %3736 = vmatpush3.bf16.msra.mxu0 %v3375_v50  ;;  %3715 = vmatprep.subr.bf16.mxu1 %v3368_v19 }
 0x6a2   :  { %3737 = vmatprep.subr.bf16.mxu0 %v3384_v24 }
 0x6a4   :  { %3716 = vmatpush3.bf16.msra.mxu1 %v3360_v16 }
 0x6a5   :  { %3738 = vmatpush3.bf16.msra.mxu0 %v3376_v29 }
 0x6a7   :  { %3505 = vmatmul.mubr.bf16.vlgmr.msra.gmra.mrb[12].mxu1 %v3317_v8 }
 0x6a8   :  { %3545 = vmatmul.mubr.bf16.vlgmr.msra.gmra.mrb[16].mxu0 %v3319_v59 }
 0x75a   :  { %v3673_v5 = vpop.f32.mrb[8].mxu1 }
 0x75b   :  { %v3695_v25 = vpop.f32.mrb[12].mxu0  ;;  %v3674_v30 = vpop.f32.mrb[9].mxu1 }
 0x75c   :  { %v3696_v53 = vpop.f32.mrb[13].mxu0  ;;  %v3675_v15 = vadd.f32 %v3674_v30, %v3673_v5  ;;  %v3676_v32 = vpop.f32.mrb[10].mxu1 }
 0x75d   :  { %v3697_v57 = vadd.f32 %v3696_v53, %v3695_v25  ;;  %v3698_v33 = vpop.f32.mrb[14].mxu0  ;;  %v3677_v2 = vpop.f32.mrb[11].mxu1 }
 0x75e   :  { %v3699_v34 = vpop.f32.mrb[15].mxu0  ;;  %v3427_v46 = vadd.f32 %v3675_v15, %v3646_v28 }
 0x760   :  { %v3467_v35 = vadd.f32 %v3697_v57, %v3427_v46 }
 0x77a   :  { %v3717_v6 = vpop.f32.mrb[12].mxu1 }
 0x77b   :  { %v3739_v38 = vpop.f32.mrb[16].mxu0  ;;  %v3718_v27 = vpop.f32.mrb[13].mxu1 }
 0x77c   :  { %v3740_v40 = vpop.f32.mrb[17].mxu0  ;;  %v3719_v43 = vadd.f32 %v3718_v27, %v3717_v6  ;;  %v3720_v44 = vpop.f32.mrb[14].mxu1 }
 0x77d   :  { %v3741_v11 = vadd.f32 %v3740_v40, %v3739_v38  ;;  %v3742_v10 = vpop.f32.mrb[18].mxu0  ;;  %v3721_v47 = vpop.f32.mrb[15].mxu1 }
 0x77e   :  { %v3743_v14 = vpop.f32.mrb[19].mxu0  ;;  %v3507_v49 = vadd.f32 %v3719_v43, %v3467_v35 }
 0x780   :  { %v3547_v20 = vadd.f32 %v3741_v11, %v3507_v49 }
 0x782   :  { %3552 = vst [vmem:[#allocation14] sm:$0x3] %v3547_v20 }
 0x783   :  { %4030 = shalt.err (!%p4027_p2)
}
 0x784   :  { %s4031_s30 = scalar_lea.hbm %s4721_s7, 32 }
 0x785   :  { %p4032_p3 = scmp.ne.s32.totalorder %s4721_s7, %s4031_s30  ;;  %p4035_p4 = scmp.lt.u32.totalorder %s4031_s30, %s4721_s7 }
 0x787   :  { %p4037_p5 = pnand %p4035_p4, %p4032_p3 }
 0x789   :  { %4040 = shalt.err (!%p4037_p5)
}
 0x78a   :  { %3562 = dma.vmem_to_hbm [thread:$0]  %s3560_s26, 32, %s4721_s7, [#allocation8]  }
 0x78b   :  { %4051 = dma.done.wait [#allocation8], 32  }
 0x78c   :  { %4052 = vsyncadd [#allocation8], 4294967264 }
 0x78d   :  { %3566 = vsyncpa [#allocation7], 1 }
 0x78e   :  { %3567 = vsyncpa [#allocation10], 1 }
 0x78f   :  { %3568 = vsyncpa [#allocation13], 1 }
 0x790   :  { %3569 = vsyncpa [#allocation8], 1 }
 0x791   :  { %3570 = vsyncmov [#allocation5] }
 0x794   :  { %s3571_s13 = vpop.sfrf %3570 }
 0x795   :  { %p3647_p6 = scmp.ne.s32.totalorder %s3571_s13, 0 }
 0x797   :  { %3575 = shalt.err (%p3647_p6)  }
 0x798   :  { %3577 = vsyncmov [#allocation5 + $0x1] }
 0x79b   :  { %s3578_s14 = vpop.sfrf %3577 }
 0x79c   :  { %p3648_p7 = scmp.ne.s32.totalorder %s3578_s14, 0 }
 0x79e   :  { %3582 = shalt.err (%p3648_p7)  }

</bundles_post_ra>
